<compile_context>
chip_gen: v7x
topology: tpu7x:2x2x1
jax: 0.10.0
libtpu: 0.0.40
codegen_flags: <defaults>
</compile_context>

<pallas_src>
import functools
import math

import jax
import jax.numpy as jnp
from jax import lax
from jax.experimental import pallas as pl
from jax.experimental.pallas import tpu as pltpu

_EPS = 1e-15
_ATANH_CLIP = 1.0 - 1e-7
_MASK_BIAS = -1e30   # finite "minus infinity": avoids NaN for fully-masked rows


# ----------------------------- Poincare-ball math (used in-kernel and in ref) ---

def _artanh(z):
    z = jnp.clip(z, -_ATANH_CLIP, _ATANH_CLIP)
    return 0.5 * jnp.log((1.0 + z) / (1.0 - z))


def _sqnorm(v):
    return jnp.sum(v * v, axis=-1, keepdims=True)


def _mobius_add(u, v, c):
    uv = jnp.sum(u * v, axis=-1, keepdims=True)
    uu = _sqnorm(u)
    vv = _sqnorm(v)
    num = (1.0 + 2.0 * c * uv + c * vv) * u + (1.0 - c * uu) * v
    den = 1.0 + 2.0 * c * uv + c * c * uu * vv
    return num / jnp.maximum(den, _EPS)


def _mobius_scalar_mul(r, v, c):
    sqrt_c = math.sqrt(c)
    vnorm = jnp.sqrt(jnp.maximum(_sqnorm(v), _EPS))
    return jnp.tanh(r * _artanh(sqrt_c * vnorm)) * v / (vnorm * sqrt_c)


def _mobius_matvec(v, w_t, c):
    # v: (N, din), w_t: (din, dout) -> (N, dout)
    sqrt_c = math.sqrt(c)
    mv = jnp.dot(v, w_t, preferred_element_type=jnp.float32)
    vnorm = jnp.sqrt(jnp.maximum(_sqnorm(v), _EPS))
    mvnorm = jnp.sqrt(jnp.maximum(_sqnorm(mv), _EPS))
    return jnp.tanh(mvnorm / vnorm * _artanh(sqrt_c * vnorm)) * mv / (mvnorm * sqrt_c)


def _poincare_linear(v, w_t, b, c):
    return _mobius_add(_mobius_matvec(v, w_t, c), b, c)


def _clamp_abs(v, eps):
    sign = jnp.where(v >= 0.0, 1.0, -1.0)
    return sign * jnp.maximum(jnp.abs(v), eps)


# ----------------------------------------------------------- Pallas kernel -----

def _poincare_attn_kernel(kfac_ref, sqrt_nv_ref,
                          x_ref, tgt_ref, enc0_ref, vmat_ref, aux_ref,
                          w_in_ref, b_in_ref, w_out_ref, b_out_ref,
                          out_ref, wei_ref,
                          q_sc, cqq_sc, m_sc, l_sc, nom_sc, den_sc,
                          *, c, stabilize):
    f32 = jnp.float32
    b_idx = pl.program_id(0)
    s_idx = pl.program_id(2)
    n_s = pl.num_programs(2)
    s_blk = enc0_ref.shape[1]        # static tile width along S

    # ---- prologue: first source tile of this (batch, target-tile) ------------
    @pl.when(s_idx == 0)
    def _init():
        x = x_ref[0]                                       # (Tb, Cp) f32
        tgt = tgt_ref[0]                                   # (Tb, Ep) f32
        # q = sqrt(0.5) (x)_c (target_embedding (+)_c in_projection(x))
        xp = _poincare_linear(x, w_in_ref[...], b_in_ref[...], c)
        q = _mobius_scalar_mul(math.sqrt(0.5), _mobius_add(tgt, xp, c), c)
        cqq_sc[...] = c * _sqnorm(q)                       # c*||q||^2, per row
        q_sc[...] = ((-2.0 * c) * q).astype(q_sc.dtype)    # MXU dot gives 2c*uv
        l_sc[...] = jnp.zeros(l_sc.shape, f32)
        den_sc[...] = jnp.zeros(den_sc.shape, f32)
        nom_sc[...] = jnp.zeros(nom_sc.shape, f32)
        if stabilize:
            m_sc[...] = jnp.full(m_sc.shape, -jnp.inf, f32)

    # ---- streamed source tile: distance -> masked scores -> softmax accum ----
    aux = aux_ref[0]                                       # (4, Sb) f32
    ckk = aux[0:1, :]                                      # c*||k||^2     (1, Sb)
    opk = aux[1:2, :]                                      # 1 + c*||k||^2 (1, Sb)
    bias = aux[2:3, :]                                     # 0 / -1e30     (1, Sb)
    lm1 = aux[3:4, :]                                      # lambda_k - 1  (1, Sb)

    cqq = cqq_sc[...]                                      # (Tb, 1) per-row
    bb = 1.0 - cqq
    bb2 = bb * bb

    # qk2 = -2c * (q . k) = 2c*uv with uv = (-q).k   -- MXU, f32 accumulation
    qk2 = lax.dot_general(q_sc[...], enc0_ref[0], (((1,), (1,)), ((), ())),
                          preferred_element_type=f32)      # (Tb, Sb)
    # closed-form || (-q) (+)_c k || from ||q||^2, ||k||^2, q.k (constant-folded)
    a_ = opk + qk2                                         # 1 + 2c*uv + c*kk
    abb = a_ * bb
    den = a_ - bb * ckk                                    # 1 + 2c*uv + c^2*qq*kk
    cnum = (a_ * cqq) * a_ + abb * qk2 + bb2 * ckk         # c * ||num||^2
    z = jnp.sqrt(jnp.maximum(cnum, 0.0)) * pl.reciprocal(
        jnp.maximum(den, _EPS), approx=True)               # = sqrt(c)*||...||
    z = jnp.minimum(z, _ATANH_CLIP)
    # scores = -dist/exp(scale) = kfac * log((1-z)/(1+z)),  kfac = exp(-scale)/sqrt(c)
    scores = kfac_ref[0] * jnp.log((1.0 - z) * pl.reciprocal(1.0 + z, approx=True))
    scores = scores + bias                                 # finite mask bias, <= 0

    col = s_idx * s_blk
    if s_blk % 128 == 0:
        col = pl.multiple_of(col, 128)                     # lane-aligned slab store

    if stabilize:
        # fallback path (large kfac): flash-style online softmax; slab holds raw scores
        m_prev = m_sc[...]
        m_new = jnp.maximum(m_prev, jnp.max(scores, axis=-1, keepdims=True))
        alpha = jnp.exp(m_prev - m_new)
        p = jnp.exp(scores - m_new)
        l_sc[...] = alpha * l_sc[...] + jnp.sum(p, axis=-1, keepdims=True)
        den_sc[...] = alpha * den_sc[...] + jnp.sum(p * lm1, axis=-1, keepdims=True)
        nom_sc[...] = alpha * nom_sc[...] + jnp.dot(
            p.astype(vmat_ref.dtype), vmat_ref[0], preferred_element_type=f32)
        m_sc[...] = m_new
        wei_ref[0, :, pl.ds(col, s_blk)] = scores.astype(wei_ref.dtype)
    else:
        # common path: scores <= 0 and bounded below, so m = 0 (no max machinery)
        p = jnp.exp(scores)
        l_sc[...] = l_sc[...] + jnp.sum(p, axis=-1, keepdims=True)
        den_sc[...] = den_sc[...] + jnp.sum(p * lm1, axis=-1, keepdims=True)
        nom_sc[...] = nom_sc[...] + jnp.dot(
            p.astype(vmat_ref.dtype), vmat_ref[0], preferred_element_type=f32)
        wei_ref[0, :, pl.ds(col, s_blk)] = p.astype(wei_ref.dtype)

    # ---- epilogue: normalize slab, gyromidpoint, out-projection, residual ----
    @pl.when(s_idx == n_s - 1)
    def _fin():
        l = jnp.maximum(l_sc[...], _EPS)                   # (Tb, 1)
        inv_l = 1.0 / l                                    # exact, per-row scalar
        # in-kernel normalization of the resident attention slab
        w = wei_ref[0].astype(f32)                         # (Tb, S)
        if stabilize:
            w = jnp.exp(w - m_sc[...])
        wei_ref[0] = (w * inv_l).astype(wei_ref.dtype)
        # weighted Mobius gyromidpoint; the two 1/l factors cancel -> single norm
        den_n = den_sc[...] * inv_l                        # attn @ (lam-1)
        factor = inv_l / _clamp_abs(den_n, 1e-10)
        two_mean = nom_sc[...] * factor
        mid = _mobius_scalar_mul(0.5, two_mean, c)
        # rescale by sqrt(#unpadded source positions) (per-batch scalar, SMEM)
        mid = _mobius_scalar_mul(sqrt_nv_ref[b_idx], mid, c)
        # out projection, residual Mobius add, sqrt(0.5) Mobius scaling
        op = _poincare_linear(mid, w_out_ref[...], b_out_ref[...], c)
        out = _mobius_scalar_mul(math.sqrt(0.5), _mobius_add(x_ref[0], op, c), c)
        out_ref[0] = out.astype(out_ref.dtype)


# -------------------------------------------------------------- wrapper --------

def _round_up(n, m):
    return ((n + m - 1) // m) * m


def _pad_last(a, new_last):
    pad = new_last - a.shape[-1]
    if pad == 0:
        return a
    return jnp.pad(a, [(0, 0)] * (a.ndim - 1) + [(0, pad)])


def _pad2(a, rows, cols):
    return jnp.pad(a, ((0, rows - a.shape[0]), (0, cols - a.shape[1])))


def _pick_block(n, cap, align):
    """Largest multiple of `align` <= cap that divides n, else the full extent."""
    if n <= cap:
        return n
    blk = (cap // align) * align
    while blk >= align:
        if n % blk == 0:
            return blk
        blk -= align
    return n


def poincare_attention_layer(x, target_embedding, encoder_out0, encoder_out1,
                             encoder_padding_mask, w_in, b_in, w_out, b_out,
                             scale, c, *, qk_dtype=jnp.float32,
                             pv_dtype=jnp.bfloat16, wei_dtype=jnp.float32,
                             t_block=None, s_block=None, stabilize=None):
    B, T, C = x.shape
    E = target_embedding.shape[-1]
    S = encoder_out0.shape[1]
    c = float(c)
    sqrt_c = math.sqrt(c)
    f32 = jnp.float32

    x_f = x.astype(f32)
    tgt_f = target_embedding.astype(f32)
    enc0_f = encoder_out0.astype(f32)
    enc1_f = encoder_out1.astype(f32)
    if encoder_padding_mask is None:
        mask_f = jnp.zeros((B, S), f32)
    else:
        mask_f = encoder_padding_mask.astype(f32)

    # static decision: scores lie in [-16.8*kfac, 0]; only large kfac needs the
    # online-max (stabilized) fallback path.
    if stabilize is None:
        try:
            kfac_host = math.exp(-float(scale)) / sqrt_c
            stabilize = bool(kfac_host > 5.0)
        except Exception:        # traced scale -> be conservative
            stabilize = True

    # ---- per-batch / per-source invariants hoisted out of the kernel (XLA) ----
    ckk = c * jnp.sum(enc0_f * enc0_f, axis=-1)                          # (B,S)
    lam = 2.0 / jnp.maximum(1.0 - c * jnp.sum(enc1_f * enc1_f, axis=-1), _EPS)
    bias = jnp.where(mask_f > 0.5, _MASK_BIAS, 0.0)
    aux = jnp.stack([ckk, 1.0 + ckk, bias, lam - 1.0], axis=1).astype(f32)  # (B,4,S)
    kfac = (jnp.exp(-jnp.asarray(scale, f32)) / sqrt_c).reshape(1)       # (1,)
    sqrt_nv = jnp.sqrt(jnp.maximum(S - jnp.sum(mask_f, axis=-1), 0.0)).astype(f32)

    # ---- zero-pad feature dims to 128 lanes (exact for the Poincare ops) ------
    Cp = _round_up(C, 128)
    Ep = _round_up(E, 128)
    x_p = _pad_last(x_f, Cp)
    tgt_p = _pad_last(tgt_f, Ep)
    enc0_p = _pad_last(enc0_f, Ep).astype(qk_dtype)
    vmat_p = _pad_last(lam[..., None] * enc1_f, Ep).astype(pv_dtype)     # lam * v
    w_in_t = _pad2(jnp.transpose(w_in).astype(f32), Cp, Ep)              # (Cp,Ep)
    w_out_t = _pad2(jnp.transpose(w_out).astype(f32), Ep, Cp)            # (Ep,Cp)
    b_in_p = _pad_last(b_in.astype(f32).reshape(1, E), Ep)
    b_out_p = _pad_last(b_out.astype(f32).reshape(1, C), Cp)

    kb = jnp.dtype(qk_dtype).itemsize
    pb = jnp.dtype(pv_dtype).itemsize
    wb = jnp.dtype(wei_dtype).itemsize

    # ---- block selection -------------------------------------------------------
    t_blk = _pick_block(T, 256 if t_block is None else t_block, 8)
    # v7x megacore: keep the parallel extent B*(T/t_blk) >= 2 when possible
    if B * (T // t_blk) < 2:
        alt = _pick_block(T, max(8, (T // 2) // 8 * 8), 8)
        if T // alt >= 2:
            t_blk = alt
    # cap the resident weights slab (2 buffers x t_blk x S) to ~24 MiB of VMEM
    while t_blk > 8 and 2 * t_blk * S * wb > (24 << 20):
        nt = _pick_block(T, max(8, t_blk // 2), 8)
        if nt >= t_blk:
            break
        t_blk = nt

    if s_block is None:
        if S * Ep * (kb + pb) <= (4 << 20):
            s_blk = S                      # single S tile: K/V fetched once per (b,t)
        else:
            s_blk = _pick_block(S, 1024, 128)
    else:
        s_blk = _pick_block(S, s_block, 128)

    grid = (B, T // t_blk, S // s_blk)

    # ---- VMEM limit sized from the actual tile footprint (capped at 48 MiB) ---
    est = (2 * t_blk * Cp * 4 + 2 * t_blk * Ep * 4          # x, tgt
           + 2 * s_blk * Ep * kb + 2 * s_blk * Ep * pb      # keys, lam*values
           + 2 * 8 * s_blk * 4                              # aux
           + 2 * (Cp * Ep + Ep + Ep * Cp + Cp) * 4          # weights / biases
           + 2 * t_blk * Cp * 4 + 2 * t_blk * S * wb        # x_out, resident weights
           + t_blk * Ep * (kb + 4) + 6 * t_blk * 128 * 4    # scratch
           + 10 * t_blk * s_blk * 4)                        # elementwise temporaries
    vmem_limit = int(min(48 << 20, max(32 << 20, est + (8 << 20))))

    kernel = functools.partial(_poincare_attn_kernel, c=c, stabilize=stabilize)

    out_p, wei = pl.pallas_call(
        kernel,
        out_shape=(jax.ShapeDtypeStruct((B, T, Cp), f32),
                   jax.ShapeDtypeStruct((B, T, S), wei_dtype)),
        grid=grid,
        in_specs=[
            pl.BlockSpec(memory_space=pltpu.MemorySpace.SMEM),            # kfac
            pl.BlockSpec(memory_space=pltpu.MemorySpace.SMEM),            # sqrt_nv
            pl.BlockSpec((1, t_blk, Cp), lambda b, t, s: (b, t, 0)),      # x
            pl.BlockSpec((1, t_blk, Ep), lambda b, t, s: (b, t, 0)),      # target_emb
            pl.BlockSpec((1, s_blk, Ep), lambda b, t, s: (b, s, 0)),      # keys
            pl.BlockSpec((1, s_blk, Ep), lambda b, t, s: (b, s, 0)),      # lam*values
            pl.BlockSpec((1, 4, s_blk), lambda b, t, s: (b, 0, s)),       # ckk/1+ckk/bias/lam-1
            pl.BlockSpec((Cp, Ep), lambda b, t, s: (0, 0)),               # W_in^T
            pl.BlockSpec((1, Ep), lambda b, t, s: (0, 0)),                # b_in
            pl.BlockSpec((Ep, Cp), lambda b, t, s: (0, 0)),               # W_out^T
            pl.BlockSpec((1, Cp), lambda b, t, s: (0, 0)),                # b_out
        ],
        out_specs=(
            pl.BlockSpec((1, t_blk, Cp), lambda b, t, s: (b, t, 0)),      # x_out
            pl.BlockSpec((1, t_blk, S), lambda b, t, s: (b, t, 0)),       # attn (resident over S)
        ),
        scratch_shapes=[
            pltpu.VMEM((t_blk, Ep), qk_dtype),    # (-2c)*q  (MXU operand)
            pltpu.VMEM((t_blk, 1), f32),          # c*||q||^2
            pltpu.VMEM((t_blk, 1), f32),          # running max m (stabilized path)
            pltpu.VMEM((t_blk, 1), f32),          # running sum l
            pltpu.VMEM((t_blk, Ep), f32),         # running nominator
            pltpu.VMEM((t_blk, 1), f32),          # running denominator
        ],
        compiler_params=pltpu.CompilerParams(
            dimension_semantics=("parallel", "parallel", "arbitrary"),
            vmem_limit_bytes=vmem_limit),
    )(kfac, sqrt_nv, x_p, tgt_p, enc0_p, vmat_p, aux,
      w_in_t, b_in_p, w_out_t, b_out_p)

    return out_p[:, :, :C], wei


# ----------------------------------------------------- pure-JAX reference ------

def _ref_single(x, tgt, enc0, enc1, mask, w_in_t, b_in, w_out_t, b_out, scale, c):
    sqrt_c = math.sqrt(c)
    xp = _poincare_linear(x, w_in_t, b_in, c)
    q = _mobius_scalar_mul(math.sqrt(0.5), _mobius_add(tgt, xp, c), c)
    diff = _mobius_add(-q[:, None, :], enc0[None, :, :], c)     # (T, S, E)
    dist = (2.0 / sqrt_c) * _artanh(
        sqrt_c * jnp.sqrt(jnp.maximum(jnp.sum(diff * diff, -1), 0.0)))
    scores = -dist / jnp.exp(scale)
    scores = jnp.where(mask[None, :] > 0.5, -jnp.inf, scores)
    attn = jax.nn.softmax(scores, axis=-1)
    lam = 2.0 / jnp.maximum(1.0 - c * _sqnorm(enc1), _EPS)
    mid = _mobius_scalar_mul(0.5, (attn @ (lam * enc1)) /
                             _clamp_abs(attn @ (lam - 1.0), 1e-10), c)
    n_valid = enc1.shape[0] - jnp.sum(mask)
    mid = _mobius_scalar_mul(jnp.sqrt(n_valid), mid, c)
    op = _poincare_linear(mid, w_out_t, b_out, c)
    out = _mobius_scalar_mul(math.sqrt(0.5), _mobius_add(x, op, c), c)
    return out, attn


# ------------------------------------------------------------------ main -------

if __name__ == "__main__":
    # batch, tgt len, src len, conv_channels, embed_dim (small, but multi-tile)
    B, T, S, C, E = 2, 16, 256, 8, 32
    c = 1.0
    key = jax.random.PRNGKey(0)
    ks = jax.random.split(key, 8)

    def to_ball(v, radius=0.7):
        n = jnp.linalg.norm(v, axis=-1, keepdims=True)
        return v / (1.0 + n) * (radius / math.sqrt(c))

    x = to_ball(jax.random.normal(ks[0], (B, T, C), jnp.float32))
    tgt = to_ball(jax.random.normal(ks[1], (B, T, E), jnp.float32))
    enc0 = to_ball(jax.random.normal(ks[2], (B, S, E), jnp.float32))
    enc1 = to_ball(jax.random.normal(ks[3], (B, S, E), jnp.float32))
    mask = jnp.zeros((B, S), jnp.float32).at[1, S - 5:].set(1.0)  # batch 1: pad last 5

    # deterministic synthetic parameters (torch Linear layout: weight = (out, in))
    w_in = 0.2 * jax.random.normal(ks[4], (E, C), jnp.float32)
    b_in = 0.01 * jax.random.normal(ks[5], (E,), jnp.float32)
    w_out = 0.2 * jax.random.normal(ks[6], (C, E), jnp.float32)
    b_out = 0.01 * jax.random.normal(ks[7], (C,), jnp.float32)
    scale = 0.0   # nn.Parameter(torch.zeros(1))

    ref_out, ref_attn = jax.vmap(
        lambda xb, tb, e0b, e1b, mb: _ref_single(
            xb, tb, e0b, e1b, mb, w_in.T, b_in.reshape(1, E), w_out.T,
            b_out.reshape(1, C), jnp.float32(scale), c)
    )(x, tgt, enc0, enc1, mask)

    # 1) default auto blocks (single S tile), all-f32 MXU operands
    out32, attn32 = poincare_attention_layer(
        x, tgt, enc0, enc1, mask, w_in, b_in, w_out, b_out, scale, c,
        qk_dtype=jnp.float32, pv_dtype=jnp.float32)
    jax.block_until_ready((out32, attn32))
    assert jnp.allclose(out32, ref_out, atol=3e-3, rtol=3e-3), "f32 output mismatch"
    assert jnp.allclose(attn32, ref_attn, atol=3e-3, rtol=3e-3), "f32 attn mismatch"

    # 2) performance path: f32 q@k^T, bf16 p@v, explicit tiling -> grid (2,2,2)
    out_bf, attn_bf = poincare_attention_layer(
        x, tgt, enc0, enc1, mask, w_in, b_in, w_out, b_out, scale, c,
        qk_dtype=jnp.float32, pv_dtype=jnp.bfloat16, t_block=8, s_block=128)
    jax.block_until_ready((out_bf, attn_bf))
    assert jnp.allclose(out_bf, ref_out, atol=2e-2, rtol=2e-2), "bf16 output mismatch"
    assert jnp.allclose(attn_bf, ref_attn, atol=2e-2, rtol=2e-2), "bf16 attn mismatch"

    # 3) stabilized fallback path (online max + epilogue exp), multi-tile, f32
    out_st, attn_st = poincare_attention_layer(
        x, tgt, enc0, enc1, mask, w_in, b_in, w_out, b_out, scale, c,
        qk_dtype=jnp.float32, pv_dtype=jnp.float32, t_block=8, s_block=128,
        stabilize=True)
    jax.block_until_ready((out_st, attn_st))
    assert jnp.allclose(out_st, ref_out, atol=3e-3, rtol=3e-3), "stab output mismatch"
    assert jnp.allclose(attn_st, ref_attn, atol=3e-3, rtol=3e-3), "stab attn mismatch"

    print("KERNEL_OK")
</pallas_src>

<mosaic_0001>
module attributes {stable_mosaic.version = 11 : i64} {
  func.func @_poincare_attn_kernel(%arg0: i32, %arg1: i32, %arg2: i32, %arg3: memref<1xf32, #tpu.memory_space<smem>>, %arg4: memref<2xf32, #tpu.memory_space<smem>>, %arg5: memref<1x16x128xf32, #tpu.memory_space<vmem>>, %arg6: memref<1x16x128xf32, #tpu.memory_space<vmem>>, %arg7: memref<1x256x128xf32, #tpu.memory_space<vmem>>, %arg8: memref<1x256x128xf32, #tpu.memory_space<vmem>>, %arg9: memref<1x4x256xf32, #tpu.memory_space<vmem>>, %arg10: memref<128x128xf32, #tpu.memory_space<vmem>>, %arg11: memref<1x128xf32, #tpu.memory_space<vmem>>, %arg12: memref<128x128xf32, #tpu.memory_space<vmem>>, %arg13: memref<1x128xf32, #tpu.memory_space<vmem>>, %arg14: memref<1x16x128xf32, #tpu.memory_space<vmem>>, %arg15: memref<1x16x256xf32, #tpu.memory_space<vmem>>, %arg16: memref<16x128xf32, #tpu.memory_space<vmem>>, %arg17: memref<16x1xf32, #tpu.memory_space<vmem>>, %arg18: memref<16x1xf32, #tpu.memory_space<vmem>>, %arg19: memref<16x1xf32, #tpu.memory_space<vmem>>, %arg20: memref<16x128xf32, #tpu.memory_space<vmem>>, %arg21: memref<16x1xf32, #tpu.memory_space<vmem>>) attributes {dimension_semantics = [#tpu.dimension_semantics<parallel>, #tpu.dimension_semantics<parallel>, #tpu.dimension_semantics<arbitrary>], iteration_bounds = array<i64: 2, 1, 1>, scalar_prefetch = 0 : i64, scratch_operands = 6 : i64, tpu.core_type = #tpu.core_type<tc>, window_params = [{transform_indices = @transform_0, window_bounds = array<i64: 1>}, {transform_indices = @transform_1, window_bounds = array<i64: 2>}, {transform_indices = @transform_2, window_bounds = array<i64: 1, 16, 128>}, {transform_indices = @transform_3, window_bounds = array<i64: 1, 16, 128>}, {transform_indices = @transform_4, window_bounds = array<i64: 1, 256, 128>}, {transform_indices = @transform_5, window_bounds = array<i64: 1, 256, 128>}, {transform_indices = @transform_6, window_bounds = array<i64: 1, 4, 256>}, {pipeline_mode = #tpu.pipeline_mode<synchronous>, transform_indices = @transform_7, window_bounds = array<i64: 128, 128>}, {pipeline_mode = #tpu.pipeline_mode<synchronous>, transform_indices = @transform_8, window_bounds = array<i64: 1, 128>}, {pipeline_mode = #tpu.pipeline_mode<synchronous>, transform_indices = @transform_9, window_bounds = array<i64: 128, 128>}, {pipeline_mode = #tpu.pipeline_mode<synchronous>, transform_indices = @transform_10, window_bounds = array<i64: 1, 128>}, {transform_indices = @transform_11, window_bounds = array<i64: 1, 16, 128>}, {transform_indices = @transform_12, window_bounds = array<i64: 1, 16, 256>}]} {
    %c0_i32 = arith.constant 0 : i32
    %0 = arith.cmpi eq, %arg2, %c0_i32 : i32
    %1 = arith.extui %0 : i1 to i32
    %c0_i32_0 = arith.constant 0 : i32
    %2 = arith.cmpi ne, %1, %c0_i32_0 : i32
    scf.if %2 {
      %c0_39 = arith.constant 0 : index
      %c0_40 = arith.constant 0 : index
      %c0_41 = arith.constant 0 : index
      %83 = vector.load %arg5[%c0_39, %c0_40, %c0_41] : memref<1x16x128xf32, #tpu.memory_space<vmem>>, vector<1x16x128xf32>
      %84 = vector.shape_cast %83 : vector<1x16x128xf32> to vector<16x128xf32>
      %c0_42 = arith.constant 0 : index
      %c0_43 = arith.constant 0 : index
      %c0_44 = arith.constant 0 : index
      %85 = vector.load %arg6[%c0_42, %c0_43, %c0_44] : memref<1x16x128xf32, #tpu.memory_space<vmem>>, vector<1x16x128xf32>
      %86 = vector.shape_cast %85 : vector<1x16x128xf32> to vector<16x128xf32>
      %c0_45 = arith.constant 0 : index
      %c0_46 = arith.constant 0 : index
      %87 = vector.load %arg10[%c0_45, %c0_46] : memref<128x128xf32, #tpu.memory_space<vmem>>, vector<128x128xf32>
      %c0_47 = arith.constant 0 : index
      %c0_48 = arith.constant 0 : index
      %88 = vector.load %arg11[%c0_47, %c0_48] : memref<1x128xf32, #tpu.memory_space<vmem>>, vector<1x128xf32>
      %cst_49 = arith.constant dense<0.000000e+00> : vector<16x128xf32>
      %89 = tpu.matmul %84, %87, %cst_49 {dimension_numbers = #tpu.dot_dimension_numbers<[1], [0], [0], [1], [0, 0, 1, 1], [], []>} : vector<16x128xf32>, vector<128x128xf32>, vector<16x128xf32> -> vector<16x128xf32>
      %90 = arith.mulf %84, %84 : vector<16x128xf32>
      %cst_50 = arith.constant dense<0.000000e+00> : vector<16xf32>
      %91 = vector.multi_reduction <add>, %90, %cst_50 [1] : vector<16x128xf32> to vector<16xf32>
      %92 = vector.shape_cast %91 : vector<16xf32> to vector<16x1xf32>
      %cst_51 = arith.constant 1.000000e-15 : f32
      %93 = vector.broadcast %cst_51 : f32 to vector<16x1xf32>
      %94 = arith.maximumf %92, %93 : vector<16x1xf32>
      %95 = math.sqrt %94 : vector<16x1xf32>
      %96 = arith.mulf %89, %89 : vector<16x128xf32>
      %cst_52 = arith.constant dense<0.000000e+00> : vector<16xf32>
      %97 = vector.multi_reduction <add>, %96, %cst_52 [1] : vector<16x128xf32> to vector<16xf32>
      %98 = vector.shape_cast %97 : vector<16xf32> to vector<16x1xf32>
      %cst_53 = arith.constant 1.000000e-15 : f32
      %99 = vector.broadcast %cst_53 : f32 to vector<16x1xf32>
      %100 = arith.maximumf %98, %99 : vector<16x1xf32>
      %101 = math.sqrt %100 : vector<16x1xf32>
      %102 = arith.divf %101, %95 : vector<16x1xf32>
      %cst_54 = arith.constant 1.000000e+00 : f32
      %103 = vector.broadcast %cst_54 : f32 to vector<16x1xf32>
      %104 = arith.mulf %103, %95 : vector<16x1xf32>
      %cst_55 = arith.constant -0.99999988 : f32
      %cst_56 = arith.constant 0.99999988 : f32
      %105 = vector.broadcast %cst_55 : f32 to vector<16x1xf32>
      %106 = arith.maximumf %105, %104 : vector<16x1xf32>
      %107 = vector.broadcast %cst_56 : f32 to vector<16x1xf32>
      %108 = arith.minimumf %107, %106 : vector<16x1xf32>
      %cst_57 = arith.constant 1.000000e+00 : f32
      %109 = vector.broadcast %cst_57 : f32 to vector<16x1xf32>
      %110 = arith.addf %109, %108 : vector<16x1xf32>
      %cst_58 = arith.constant 1.000000e+00 : f32
      %111 = vector.broadcast %cst_58 : f32 to vector<16x1xf32>
      %112 = arith.subf %111, %108 : vector<16x1xf32>
      %113 = arith.divf %110, %112 : vector<16x1xf32>
      %114 = math.log %113 : vector<16x1xf32>
      %cst_59 = arith.constant 5.000000e-01 : f32
      %115 = vector.broadcast %cst_59 : f32 to vector<16x1xf32>
      %116 = arith.mulf %115, %114 : vector<16x1xf32>
      %117 = arith.mulf %102, %116 : vector<16x1xf32>
      %118 = math.tanh %117 : vector<16x1xf32>
      %119 = vector.broadcast %118 : vector<16x1xf32> to vector<16x128xf32>
      %120 = arith.mulf %119, %89 : vector<16x128xf32>
      %cst_60 = arith.constant 1.000000e+00 : f32
      %121 = vector.broadcast %cst_60 : f32 to vector<16x1xf32>
      %122 = arith.mulf %101, %121 : vector<16x1xf32>
      %123 = vector.broadcast %122 : vector<16x1xf32> to vector<16x128xf32>
      %124 = arith.divf %120, %123 : vector<16x128xf32>
      %125 = vector.broadcast %88 : vector<1x128xf32> to vector<16x128xf32>
      %126 = arith.mulf %124, %125 : vector<16x128xf32>
      %cst_61 = arith.constant dense<0.000000e+00> : vector<16xf32>
      %127 = vector.multi_reduction <add>, %126, %cst_61 [1] : vector<16x128xf32> to vector<16xf32>
      %128 = vector.shape_cast %127 : vector<16xf32> to vector<16x1xf32>
      %129 = arith.mulf %124, %124 : vector<16x128xf32>
      %cst_62 = arith.constant dense<0.000000e+00> : vector<16xf32>
      %130 = vector.multi_reduction <add>, %129, %cst_62 [1] : vector<16x128xf32> to vector<16xf32>
      %131 = vector.shape_cast %130 : vector<16xf32> to vector<16x1xf32>
      %132 = arith.mulf %88, %88 : vector<1x128xf32>
      %cst_63 = arith.constant dense<0.000000e+00> : vector<1xf32>
      %133 = vector.multi_reduction <add>, %132, %cst_63 [1] : vector<1x128xf32> to vector<1xf32>
      %134 = vector.shape_cast %133 : vector<1xf32> to vector<1x1xf32>
      %cst_64 = arith.constant 2.000000e+00 : f32
      %135 = vector.broadcast %cst_64 : f32 to vector<16x1xf32>
      %136 = arith.mulf %135, %128 : vector<16x1xf32>
      %cst_65 = arith.constant 1.000000e+00 : f32
      %137 = vector.broadcast %cst_65 : f32 to vector<16x1xf32>
      %138 = arith.addf %137, %136 : vector<16x1xf32>
      %cst_66 = arith.constant 1.000000e+00 : f32
      %139 = vector.broadcast %cst_66 : f32 to vector<1x1xf32>
      %140 = arith.mulf %139, %134 : vector<1x1xf32>
      %141 = vector.broadcast %140 : vector<1x1xf32> to vector<16x1xf32>
      %142 = arith.addf %138, %141 : vector<16x1xf32>
      %143 = vector.broadcast %142 : vector<16x1xf32> to vector<16x128xf32>
      %144 = arith.mulf %143, %124 : vector<16x128xf32>
      %cst_67 = arith.constant 1.000000e+00 : f32
      %145 = vector.broadcast %cst_67 : f32 to vector<16x1xf32>
      %146 = arith.mulf %145, %131 : vector<16x1xf32>
      %cst_68 = arith.constant 1.000000e+00 : f32
      %147 = vector.broadcast %cst_68 : f32 to vector<16x1xf32>
      %148 = arith.subf %147, %146 : vector<16x1xf32>
      %149 = vector.broadcast %148 : vector<16x1xf32> to vector<16x128xf32>
      %150 = vector.broadcast %88 : vector<1x128xf32> to vector<16x128xf32>
      %151 = arith.mulf %149, %150 : vector<16x128xf32>
      %152 = arith.addf %144, %151 : vector<16x128xf32>
      %cst_69 = arith.constant 2.000000e+00 : f32
      %153 = vector.broadcast %cst_69 : f32 to vector<16x1xf32>
      %154 = arith.mulf %153, %128 : vector<16x1xf32>
      %cst_70 = arith.constant 1.000000e+00 : f32
      %155 = vector.broadcast %cst_70 : f32 to vector<16x1xf32>
      %156 = arith.addf %155, %154 : vector<16x1xf32>
      %cst_71 = arith.constant 1.000000e+00 : f32
      %157 = vector.broadcast %cst_71 : f32 to vector<16x1xf32>
      %158 = arith.mulf %157, %131 : vector<16x1xf32>
      %159 = vector.broadcast %134 : vector<1x1xf32> to vector<16x1xf32>
      %160 = arith.mulf %158, %159 : vector<16x1xf32>
      %161 = arith.addf %156, %160 : vector<16x1xf32>
      %cst_72 = arith.constant 1.000000e-15 : f32
      %162 = vector.broadcast %cst_72 : f32 to vector<16x1xf32>
      %163 = arith.maximumf %161, %162 : vector<16x1xf32>
      %164 = vector.broadcast %163 : vector<16x1xf32> to vector<16x128xf32>
      %165 = arith.divf %152, %164 : vector<16x128xf32>
      %166 = arith.mulf %86, %165 : vector<16x128xf32>
      %cst_73 = arith.constant dense<0.000000e+00> : vector<16xf32>
      %167 = vector.multi_reduction <add>, %166, %cst_73 [1] : vector<16x128xf32> to vector<16xf32>
      %168 = vector.shape_cast %167 : vector<16xf32> to vector<16x1xf32>
      %169 = arith.mulf %86, %86 : vector<16x128xf32>
      %cst_74 = arith.constant dense<0.000000e+00> : vector<16xf32>
      %170 = vector.multi_reduction <add>, %169, %cst_74 [1] : vector<16x128xf32> to vector<16xf32>
      %171 = vector.shape_cast %170 : vector<16xf32> to vector<16x1xf32>
      %172 = arith.mulf %165, %165 : vector<16x128xf32>
      %cst_75 = arith.constant dense<0.000000e+00> : vector<16xf32>
      %173 = vector.multi_reduction <add>, %172, %cst_75 [1] : vector<16x128xf32> to vector<16xf32>
      %174 = vector.shape_cast %173 : vector<16xf32> to vector<16x1xf32>
      %cst_76 = arith.constant 2.000000e+00 : f32
      %175 = vector.broadcast %cst_76 : f32 to vector<16x1xf32>
      %176 = arith.mulf %175, %168 : vector<16x1xf32>
      %cst_77 = arith.constant 1.000000e+00 : f32
      %177 = vector.broadcast %cst_77 : f32 to vector<16x1xf32>
      %178 = arith.addf %177, %176 : vector<16x1xf32>
      %cst_78 = arith.constant 1.000000e+00 : f32
      %179 = vector.broadcast %cst_78 : f32 to vector<16x1xf32>
      %180 = arith.mulf %179, %174 : vector<16x1xf32>
      %181 = arith.addf %178, %180 : vector<16x1xf32>
      %182 = vector.broadcast %181 : vector<16x1xf32> to vector<16x128xf32>
      %183 = arith.mulf %182, %86 : vector<16x128xf32>
      %cst_79 = arith.constant 1.000000e+00 : f32
      %184 = vector.broadcast %cst_79 : f32 to vector<16x1xf32>
      %185 = arith.mulf %184, %171 : vector<16x1xf32>
      %cst_80 = arith.constant 1.000000e+00 : f32
      %186 = vector.broadcast %cst_80 : f32 to vector<16x1xf32>
      %187 = arith.subf %186, %185 : vector<16x1xf32>
      %188 = vector.broadcast %187 : vector<16x1xf32> to vector<16x128xf32>
      %189 = arith.mulf %188, %165 : vector<16x128xf32>
      %190 = arith.addf %183, %189 : vector<16x128xf32>
      %cst_81 = arith.constant 2.000000e+00 : f32
      %191 = vector.broadcast %cst_81 : f32 to vector<16x1xf32>
      %192 = arith.mulf %191, %168 : vector<16x1xf32>
      %cst_82 = arith.constant 1.000000e+00 : f32
      %193 = vector.broadcast %cst_82 : f32 to vector<16x1xf32>
      %194 = arith.addf %193, %192 : vector<16x1xf32>
      %cst_83 = arith.constant 1.000000e+00 : f32
      %195 = vector.broadcast %cst_83 : f32 to vector<16x1xf32>
      %196 = arith.mulf %195, %171 : vector<16x1xf32>
      %197 = arith.mulf %196, %174 : vector<16x1xf32>
      %198 = arith.addf %194, %197 : vector<16x1xf32>
      %cst_84 = arith.constant 1.000000e-15 : f32
      %199 = vector.broadcast %cst_84 : f32 to vector<16x1xf32>
      %200 = arith.maximumf %198, %199 : vector<16x1xf32>
      %201 = vector.broadcast %200 : vector<16x1xf32> to vector<16x128xf32>
      %202 = arith.divf %190, %201 : vector<16x128xf32>
      %203 = arith.mulf %202, %202 : vector<16x128xf32>
      %cst_85 = arith.constant dense<0.000000e+00> : vector<16xf32>
      %204 = vector.multi_reduction <add>, %203, %cst_85 [1] : vector<16x128xf32> to vector<16xf32>
      %205 = vector.shape_cast %204 : vector<16xf32> to vector<16x1xf32>
      %cst_86 = arith.constant 1.000000e-15 : f32
      %206 = vector.broadcast %cst_86 : f32 to vector<16x1xf32>
      %207 = arith.maximumf %205, %206 : vector<16x1xf32>
      %208 = math.sqrt %207 : vector<16x1xf32>
      %cst_87 = arith.constant 1.000000e+00 : f32
      %209 = vector.broadcast %cst_87 : f32 to vector<16x1xf32>
      %210 = arith.mulf %209, %208 : vector<16x1xf32>
      %cst_88 = arith.constant -0.99999988 : f32
      %cst_89 = arith.constant 0.99999988 : f32
      %211 = vector.broadcast %cst_88 : f32 to vector<16x1xf32>
      %212 = arith.maximumf %211, %210 : vector<16x1xf32>
      %213 = vector.broadcast %cst_89 : f32 to vector<16x1xf32>
      %214 = arith.minimumf %213, %212 : vector<16x1xf32>
      %cst_90 = arith.constant 1.000000e+00 : f32
      %215 = vector.broadcast %cst_90 : f32 to vector<16x1xf32>
      %216 = arith.addf %215, %214 : vector<16x1xf32>
      %cst_91 = arith.constant 1.000000e+00 : f32
      %217 = vector.broadcast %cst_91 : f32 to vector<16x1xf32>
      %218 = arith.subf %217, %214 : vector<16x1xf32>
      %219 = arith.divf %216, %218 : vector<16x1xf32>
      %220 = math.log %219 : vector<16x1xf32>
      %cst_92 = arith.constant 5.000000e-01 : f32
      %221 = vector.broadcast %cst_92 : f32 to vector<16x1xf32>
      %222 = arith.mulf %221, %220 : vector<16x1xf32>
      %cst_93 = arith.constant 0.707106769 : f32
      %223 = vector.broadcast %cst_93 : f32 to vector<16x1xf32>
      %224 = arith.mulf %223, %222 : vector<16x1xf32>
      %225 = math.tanh %224 : vector<16x1xf32>
      %226 = vector.broadcast %225 : vector<16x1xf32> to vector<16x128xf32>
      %227 = arith.mulf %226, %202 : vector<16x128xf32>
      %cst_94 = arith.constant 1.000000e+00 : f32
      %228 = vector.broadcast %cst_94 : f32 to vector<16x1xf32>
      %229 = arith.mulf %208, %228 : vector<16x1xf32>
      %230 = vector.broadcast %229 : vector<16x1xf32> to vector<16x128xf32>
      %231 = arith.divf %227, %230 : vector<16x128xf32>
      %232 = arith.mulf %231, %231 : vector<16x128xf32>
      %cst_95 = arith.constant dense<0.000000e+00> : vector<16xf32>
      %233 = vector.multi_reduction <add>, %232, %cst_95 [1] : vector<16x128xf32> to vector<16xf32>
      %234 = vector.shape_cast %233 : vector<16xf32> to vector<16x1xf32>
      %cst_96 = arith.constant 1.000000e+00 : f32
      %235 = vector.broadcast %cst_96 : f32 to vector<16x1xf32>
      %236 = arith.mulf %235, %234 : vector<16x1xf32>
      %c0_97 = arith.constant 0 : index
      %c0_98 = arith.constant 0 : index
      %237 = vector.load %arg17[%c0_97, %c0_98] : memref<16x1xf32, #tpu.memory_space<vmem>>, vector<16x1xf32>
      tpu.vector_store %arg17[%c0_97, %c0_98], %236 {strides = array<i32>} : memref<16x1xf32, #tpu.memory_space<vmem>>, vector<16x1xf32>,
      %cst_99 = arith.constant -2.000000e+00 : f32
      %238 = vector.broadcast %cst_99 : f32 to vector<16x128xf32>
      %239 = arith.mulf %238, %231 : vector<16x128xf32>
      %c0_100 = arith.constant 0 : index
      %c0_101 = arith.constant 0 : index
      %240 = vector.load %arg16[%c0_100, %c0_101] : memref<16x128xf32, #tpu.memory_space<vmem>>, vector<16x128xf32>
      tpu.vector_store %arg16[%c0_100, %c0_101], %239 {strides = array<i32>} : memref<16x128xf32, #tpu.memory_space<vmem>>, vector<16x128xf32>,
      %cst_102 = arith.constant 0.000000e+00 : f32
      %241 = vector.broadcast %cst_102 : f32 to vector<16x1xf32>
      %c0_103 = arith.constant 0 : index
      %c0_104 = arith.constant 0 : index
      %242 = vector.load %arg19[%c0_103, %c0_104] : memref<16x1xf32, #tpu.memory_space<vmem>>, vector<16x1xf32>
      tpu.vector_store %arg19[%c0_103, %c0_104], %241 {strides = array<i32>} : memref<16x1xf32, #tpu.memory_space<vmem>>, vector<16x1xf32>,
      %cst_105 = arith.constant 0.000000e+00 : f32
      %243 = vector.broadcast %cst_105 : f32 to vector<16x1xf32>
      %c0_106 = arith.constant 0 : index
      %c0_107 = arith.constant 0 : index
      %244 = vector.load %arg21[%c0_106, %c0_107] : memref<16x1xf32, #tpu.memory_space<vmem>>, vector<16x1xf32>
      tpu.vector_store %arg21[%c0_106, %c0_107], %243 {strides = array<i32>} : memref<16x1xf32, #tpu.memory_space<vmem>>, vector<16x1xf32>,
      %cst_108 = arith.constant 0.000000e+00 : f32
      %245 = vector.broadcast %cst_108 : f32 to vector<16x128xf32>
      %c0_109 = arith.constant 0 : index
      %c0_110 = arith.constant 0 : index
      %246 = vector.load %arg20[%c0_109, %c0_110] : memref<16x128xf32, #tpu.memory_space<vmem>>, vector<16x128xf32>
      tpu.vector_store %arg20[%c0_109, %c0_110], %245 {strides = array<i32>} : memref<16x128xf32, #tpu.memory_space<vmem>>, vector<16x128xf32>,
    } else {
    }
    %c0 = arith.constant 0 : index
    %c0_1 = arith.constant 0 : index
    %c0_2 = arith.constant 0 : index
    %3 = vector.load %arg9[%c0, %c0_1, %c0_2] : memref<1x4x256xf32, #tpu.memory_space<vmem>>, vector<1x4x256xf32>
    %4 = vector.shape_cast %3 : vector<1x4x256xf32> to vector<4x256xf32>
    %5 = vector.extract_strided_slice %4 {offsets = [0, 0], sizes = [1, 256], strides = [1, 1]} : vector<4x256xf32> to vector<1x256xf32>
    %6 = vector.extract_strided_slice %4 {offsets = [1, 0], sizes = [1, 256], strides = [1, 1]} : vector<4x256xf32> to vector<1x256xf32>
    %7 = vector.extract_strided_slice %4 {offsets = [2, 0], sizes = [1, 256], strides = [1, 1]} : vector<4x256xf32> to vector<1x256xf32>
    %8 = vector.extract_strided_slice %4 {offsets = [3, 0], sizes = [1, 256], strides = [1, 1]} : vector<4x256xf32> to vector<1x256xf32>
    %c0_3 = arith.constant 0 : index
    %c0_4 = arith.constant 0 : index
    %9 = vector.load %arg17[%c0_3, %c0_4] : memref<16x1xf32, #tpu.memory_space<vmem>>, vector<16x1xf32>
    %cst = arith.constant 1.000000e+00 : f32
    %10 = vector.broadcast %cst : f32 to vector<16x1xf32>
    %11 = arith.subf %10, %9 : vector<16x1xf32>
    %12 = arith.mulf %11, %11 : vector<16x1xf32>
    %c0_5 = arith.constant 0 : index
    %c0_6 = arith.constant 0 : index
    %13 = vector.load %arg16[%c0_5, %c0_6] : memref<16x128xf32, #tpu.memory_space<vmem>>, vector<16x128xf32>
    %c0_7 = arith.constant 0 : index
    %c0_8 = arith.constant 0 : index
    %c0_9 = arith.constant 0 : index
    %14 = vector.load %arg7[%c0_7, %c0_8, %c0_9] : memref<1x256x128xf32, #tpu.memory_space<vmem>>, vector<1x256x128xf32>
    %15 = vector.shape_cast %14 : vector<1x256x128xf32> to vector<256x128xf32>
    %cst_10 = arith.constant dense<0.000000e+00> : vector<16x256xf32>
    %16 = tpu.matmul %13, %15, %cst_10 {dimension_numbers = #tpu.dot_dimension_numbers<[1], [1], [0], [0], [0, 0, 1, 0], [], []>} : vector<16x128xf32>, vector<256x128xf32>, vector<16x256xf32> -> vector<16x256xf32>
    %17 = vector.broadcast %6 : vector<1x256xf32> to vector<16x256xf32>
    %18 = arith.addf %17, %16 : vector<16x256xf32>
    %19 = vector.broadcast %11 : vector<16x1xf32> to vector<16x256xf32>
    %20 = arith.mulf %18, %19 : vector<16x256xf32>
    %21 = vector.broadcast %11 : vector<16x1xf32> to vector<16x256xf32>
    %22 = vector.broadcast %5 : vector<1x256xf32> to vector<16x256xf32>
    %23 = arith.mulf %21, %22 : vector<16x256xf32>
    %24 = arith.subf %18, %23 : vector<16x256xf32>
    %25 = vector.broadcast %9 : vector<16x1xf32> to vector<16x256xf32>
    %26 = arith.mulf %18, %25 : vector<16x256xf32>
    %27 = arith.mulf %26, %18 : vector<16x256xf32>
    %28 = arith.mulf %20, %16 : vector<16x256xf32>
    %29 = arith.addf %27, %28 : vector<16x256xf32>
    %30 = vector.broadcast %12 : vector<16x1xf32> to vector<16x256xf32>
    %31 = vector.broadcast %5 : vector<1x256xf32> to vector<16x256xf32>
    %32 = arith.mulf %30, %31 : vector<16x256xf32>
    %33 = arith.addf %29, %32 : vector<16x256xf32>
    %cst_11 = arith.constant 0.000000e+00 : f32
    %34 = vector.broadcast %cst_11 : f32 to vector<16x256xf32>
    %35 = arith.maximumf %33, %34 : vector<16x256xf32>
    %36 = math.sqrt %35 : vector<16x256xf32>
    %cst_12 = arith.constant 1.000000e-15 : f32
    %37 = vector.broadcast %cst_12 : f32 to vector<16x256xf32>
    %38 = arith.maximumf %24, %37 : vector<16x256xf32>
    %39 = tpu.reciprocal %38 {approx = true} : vector<16x256xf32> -> vector<16x256xf32>
    %40 = arith.mulf %36, %39 : vector<16x256xf32>
    %cst_13 = arith.constant 0.99999988 : f32
    %41 = vector.broadcast %cst_13 : f32 to vector<16x256xf32>
    %42 = arith.minimumf %40, %41 : vector<16x256xf32>
    %c0_14 = arith.constant 0 : index
    %43 = memref.load %arg3[%c0_14] : memref<1xf32, #tpu.memory_space<smem>>
    %cst_15 = arith.constant 1.000000e+00 : f32
    %44 = vector.broadcast %cst_15 : f32 to vector<16x256xf32>
    %45 = arith.subf %44, %42 : vector<16x256xf32>
    %cst_16 = arith.constant 1.000000e+00 : f32
    %46 = vector.broadcast %cst_16 : f32 to vector<16x256xf32>
    %47 = arith.addf %46, %42 : vector<16x256xf32>
    %48 = tpu.reciprocal %47 {approx = true} : vector<16x256xf32> -> vector<16x256xf32>
    %49 = arith.mulf %45, %48 : vector<16x256xf32>
    %50 = math.log %49 : vector<16x256xf32>
    %51 = vector.broadcast %43 : f32 to vector<16x256xf32>
    %52 = arith.mulf %51, %50 : vector<16x256xf32>
    %53 = vector.broadcast %7 : vector<1x256xf32> to vector<16x256xf32>
    %54 = arith.addf %52, %53 : vector<16x256xf32>
    %c256_i32 = arith.constant 256 : i32
    %55 = arith.muli %arg2, %c256_i32 : i32
    %56 = tpu.assume_multiple %55, 128 : i32
    %57 = math.exp %54 : vector<16x256xf32>
    %c0_17 = arith.constant 0 : index
    %c0_18 = arith.constant 0 : index
    %58 = vector.load %arg19[%c0_17, %c0_18] : memref<16x1xf32, #tpu.memory_space<vmem>>, vector<16x1xf32>
    %cst_19 = arith.constant dense<0.000000e+00> : vector<16xf32>
    %59 = vector.multi_reduction <add>, %57, %cst_19 [1] : vector<16x256xf32> to vector<16xf32>
    %60 = vector.shape_cast %59 : vector<16xf32> to vector<16x1xf32>
    %61 = arith.addf %58, %60 : vector<16x1xf32>
    %c0_20 = arith.constant 0 : index
    %c0_21 = arith.constant 0 : index
    %62 = vector.load %arg19[%c0_20, %c0_21] : memref<16x1xf32, #tpu.memory_space<vmem>>, vector<16x1xf32>
    tpu.vector_store %arg19[%c0_20, %c0_21], %61 {strides = array<i32>} : memref<16x1xf32, #tpu.memory_space<vmem>>, vector<16x1xf32>,
    %c0_22 = arith.constant 0 : index
    %c0_23 = arith.constant 0 : index
    %63 = vector.load %arg21[%c0_22, %c0_23] : memref<16x1xf32, #tpu.memory_space<vmem>>, vector<16x1xf32>
    %64 = vector.broadcast %8 : vector<1x256xf32> to vector<16x256xf32>
    %65 = arith.mulf %57, %64 : vector<16x256xf32>
    %cst_24 = arith.constant dense<0.000000e+00> : vector<16xf32>
    %66 = vector.multi_reduction <add>, %65, %cst_24 [1] : vector<16x256xf32> to vector<16xf32>
    %67 = vector.shape_cast %66 : vector<16xf32> to vector<16x1xf32>
    %68 = arith.addf %63, %67 : vector<16x1xf32>
    %c0_25 = arith.constant 0 : index
    %c0_26 = arith.constant 0 : index
    %69 = vector.load %arg21[%c0_25, %c0_26] : memref<16x1xf32, #tpu.memory_space<vmem>>, vector<16x1xf32>
    tpu.vector_store %arg21[%c0_25, %c0_26], %68 {strides = array<i32>} : memref<16x1xf32, #tpu.memory_space<vmem>>, vector<16x1xf32>,
    %c0_27 = arith.constant 0 : index
    %c0_28 = arith.constant 0 : index
    %70 = vector.load %arg20[%c0_27, %c0_28] : memref<16x128xf32, #tpu.memory_space<vmem>>, vector<16x128xf32>
    %c0_29 = arith.constant 0 : index
    %c0_30 = arith.constant 0 : index
    %c0_31 = arith.constant 0 : index
    %71 = vector.load %arg8[%c0_29, %c0_30, %c0_31] : memref<1x256x128xf32, #tpu.memory_space<vmem>>, vector<1x256x128xf32>
    %72 = vector.shape_cast %71 : vector<1x256x128xf32> to vector<256x128xf32>
    %cst_32 = arith.constant dense<0.000000e+00> : vector<16x128xf32>
    %73 = tpu.matmul %57, %72, %cst_32 {dimension_numbers = #tpu.dot_dimension_numbers<[1], [0], [0], [1], [0, 0, 1, 1], [], []>} : vector<16x256xf32>, vector<256x128xf32>, vector<16x128xf32> -> vector<16x128xf32>
    %74 = arith.addf %70, %73 : vector<16x128xf32>
    %c0_33 = arith.constant 0 : index
    %c0_34 = arith.constant 0 : index
    %75 = vector.load %arg20[%c0_33, %c0_34] : memref<16x128xf32, #tpu.memory_space<vmem>>, vector<16x128xf32>
    tpu.vector_store %arg20[%c0_33, %c0_34], %74 {strides = array<i32>} : memref<16x128xf32, #tpu.memory_space<vmem>>, vector<16x128xf32>,
    %c0_35 = arith.constant 0 : index
    %c0_36 = arith.constant 0 : index
    %76 = arith.index_cast %56 : i32 to index
    %77 = vector.load %arg15[%c0_35, %c0_36, %76] : memref<1x16x256xf32, #tpu.memory_space<vmem>>, vector<1x16x256xf32>
    %78 = vector.shape_cast %77 : vector<1x16x256xf32> to vector<16x256xf32>
    %79 = vector.shape_cast %57 : vector<16x256xf32> to vector<1x16x256xf32>
    tpu.vector_store %arg15[%c0_35, %c0_36, %76], %79 {strides = array<i32>} : memref<1x16x256xf32, #tpu.memory_space<vmem>>, vector<1x16x256xf32>,
    %c0_i32_37 = arith.constant 0 : i32
    %80 = arith.cmpi eq, %arg2, %c0_i32_37 : i32
    %81 = arith.extui %80 : i1 to i32
    %c0_i32_38 = arith.constant 0 : i32
    %82 = arith.cmpi ne, %81, %c0_i32_38 : i32
    scf.if %82 {
      %c0_39 = arith.constant 0 : index
      %c0_40 = arith.constant 0 : index
      %83 = vector.load %arg19[%c0_39, %c0_40] : memref<16x1xf32, #tpu.memory_space<vmem>>, vector<16x1xf32>
      %cst_41 = arith.constant 1.000000e-15 : f32
      %84 = vector.broadcast %cst_41 : f32 to vector<16x1xf32>
      %85 = arith.maximumf %83, %84 : vector<16x1xf32>
      %cst_42 = arith.constant 1.000000e+00 : f32
      %86 = vector.broadcast %cst_42 : f32 to vector<16x1xf32>
      %87 = arith.divf %86, %85 : vector<16x1xf32>
      %c0_43 = arith.constant 0 : index
      %c0_44 = arith.constant 0 : index
      %c0_45 = arith.constant 0 : index
      %88 = vector.load %arg15[%c0_43, %c0_44, %c0_45] : memref<1x16x256xf32, #tpu.memory_space<vmem>>, vector<1x16x256xf32>
      %89 = vector.shape_cast %88 : vector<1x16x256xf32> to vector<16x256xf32>
      %90 = vector.broadcast %87 : vector<16x1xf32> to vector<16x256xf32>
      %91 = arith.mulf %89, %90 : vector<16x256xf32>
      %c0_46 = arith.constant 0 : index
      %c0_47 = arith.constant 0 : index
      %c0_48 = arith.constant 0 : index
      %92 = vector.load %arg15[%c0_46, %c0_47, %c0_48] : memref<1x16x256xf32, #tpu.memory_space<vmem>>, vector<1x16x256xf32>
      %93 = vector.shape_cast %92 : vector<1x16x256xf32> to vector<16x256xf32>
      %94 = vector.shape_cast %91 : vector<16x256xf32> to vector<1x16x256xf32>
      tpu.vector_store %arg15[%c0_46, %c0_47, %c0_48], %94 {strides = array<i32>} : memref<1x16x256xf32, #tpu.memory_space<vmem>>, vector<1x16x256xf32>,
      %c0_49 = arith.constant 0 : index
      %c0_50 = arith.constant 0 : index
      %95 = vector.load %arg21[%c0_49, %c0_50] : memref<16x1xf32, #tpu.memory_space<vmem>>, vector<16x1xf32>
      %96 = arith.mulf %95, %87 : vector<16x1xf32>
      %cst_51 = arith.constant 0.000000e+00 : f32
      %97 = vector.broadcast %cst_51 : f32 to vector<16x1xf32>
      %98 = arith.cmpf oge, %96, %97 : vector<16x1xf32>
      %cst_52 = arith.constant 1.000000e+00 : f32
      %cst_53 = arith.constant -1.000000e+00 : f32
      %99 = vector.broadcast %cst_52 : f32 to vector<16x1xf32>
      %100 = vector.broadcast %cst_53 : f32 to vector<16x1xf32>
      %101 = arith.select %98, %99, %100 : vector<16x1xi1>, vector<16x1xf32>
      %102 = math.absf %96 : vector<16x1xf32>
      %cst_54 = arith.constant 1.000000e-10 : f32
      %103 = vector.broadcast %cst_54 : f32 to vector<16x1xf32>
      %104 = arith.maximumf %102, %103 : vector<16x1xf32>
      %105 = arith.mulf %101, %104 : vector<16x1xf32>
      %106 = arith.divf %87, %105 : vector<16x1xf32>
      %c0_55 = arith.constant 0 : index
      %c0_56 = arith.constant 0 : index
      %107 = vector.load %arg20[%c0_55, %c0_56] : memref<16x128xf32, #tpu.memory_space<vmem>>, vector<16x128xf32>
      %108 = vector.broadcast %106 : vector<16x1xf32> to vector<16x128xf32>
      %109 = arith.mulf %107, %108 : vector<16x128xf32>
      %110 = arith.mulf %109, %109 : vector<16x128xf32>
      %cst_57 = arith.constant dense<0.000000e+00> : vector<16xf32>
      %111 = vector.multi_reduction <add>, %110, %cst_57 [1] : vector<16x128xf32> to vector<16xf32>
      %112 = vector.shape_cast %111 : vector<16xf32> to vector<16x1xf32>
      %cst_58 = arith.constant 1.000000e-15 : f32
      %113 = vector.broadcast %cst_58 : f32 to vector<16x1xf32>
      %114 = arith.maximumf %112, %113 : vector<16x1xf32>
      %115 = math.sqrt %114 : vector<16x1xf32>
      %cst_59 = arith.constant 1.000000e+00 : f32
      %116 = vector.broadcast %cst_59 : f32 to vector<16x1xf32>
      %117 = arith.mulf %116, %115 : vector<16x1xf32>
      %cst_60 = arith.constant -0.99999988 : f32
      %cst_61 = arith.constant 0.99999988 : f32
      %118 = vector.broadcast %cst_60 : f32 to vector<16x1xf32>
      %119 = arith.maximumf %118, %117 : vector<16x1xf32>
      %120 = vector.broadcast %cst_61 : f32 to vector<16x1xf32>
      %121 = arith.minimumf %120, %119 : vector<16x1xf32>
      %cst_62 = arith.constant 1.000000e+00 : f32
      %122 = vector.broadcast %cst_62 : f32 to vector<16x1xf32>
      %123 = arith.addf %122, %121 : vector<16x1xf32>
      %cst_63 = arith.constant 1.000000e+00 : f32
      %124 = vector.broadcast %cst_63 : f32 to vector<16x1xf32>
      %125 = arith.subf %124, %121 : vector<16x1xf32>
      %126 = arith.divf %123, %125 : vector<16x1xf32>
      %127 = math.log %126 : vector<16x1xf32>
      %cst_64 = arith.constant 5.000000e-01 : f32
      %128 = vector.broadcast %cst_64 : f32 to vector<16x1xf32>
      %129 = arith.mulf %128, %127 : vector<16x1xf32>
      %cst_65 = arith.constant 5.000000e-01 : f32
      %130 = vector.broadcast %cst_65 : f32 to vector<16x1xf32>
      %131 = arith.mulf %130, %129 : vector<16x1xf32>
      %132 = math.tanh %131 : vector<16x1xf32>
      %133 = vector.broadcast %132 : vector<16x1xf32> to vector<16x128xf32>
      %134 = arith.mulf %133, %109 : vector<16x128xf32>
      %cst_66 = arith.constant 1.000000e+00 : f32
      %135 = vector.broadcast %cst_66 : f32 to vector<16x1xf32>
      %136 = arith.mulf %115, %135 : vector<16x1xf32>
      %137 = vector.broadcast %136 : vector<16x1xf32> to vector<16x128xf32>
      %138 = arith.divf %134, %137 : vector<16x128xf32>
      %139 = arith.index_cast %arg0 : i32 to index
      %140 = memref.load %arg4[%139] : memref<2xf32, #tpu.memory_space<smem>>
      %141 = arith.mulf %138, %138 : vector<16x128xf32>
      %cst_67 = arith.constant dense<0.000000e+00> : vector<16xf32>
      %142 = vector.multi_reduction <add>, %141, %cst_67 [1] : vector<16x128xf32> to vector<16xf32>
      %143 = vector.shape_cast %142 : vector<16xf32> to vector<16x1xf32>
      %cst_68 = arith.constant 1.000000e-15 : f32
      %144 = vector.broadcast %cst_68 : f32 to vector<16x1xf32>
      %145 = arith.maximumf %143, %144 : vector<16x1xf32>
      %146 = math.sqrt %145 : vector<16x1xf32>
      %cst_69 = arith.constant 1.000000e+00 : f32
      %147 = vector.broadcast %cst_69 : f32 to vector<16x1xf32>
      %148 = arith.mulf %147, %146 : vector<16x1xf32>
      %cst_70 = arith.constant -0.99999988 : f32
      %cst_71 = arith.constant 0.99999988 : f32
      %149 = vector.broadcast %cst_70 : f32 to vector<16x1xf32>
      %150 = arith.maximumf %149, %148 : vector<16x1xf32>
      %151 = vector.broadcast %cst_71 : f32 to vector<16x1xf32>
      %152 = arith.minimumf %151, %150 : vector<16x1xf32>
      %cst_72 = arith.constant 1.000000e+00 : f32
      %153 = vector.broadcast %cst_72 : f32 to vector<16x1xf32>
      %154 = arith.addf %153, %152 : vector<16x1xf32>
      %cst_73 = arith.constant 1.000000e+00 : f32
      %155 = vector.broadcast %cst_73 : f32 to vector<16x1xf32>
      %156 = arith.subf %155, %152 : vector<16x1xf32>
      %157 = arith.divf %154, %156 : vector<16x1xf32>
      %158 = math.log %157 : vector<16x1xf32>
      %cst_74 = arith.constant 5.000000e-01 : f32
      %159 = vector.broadcast %cst_74 : f32 to vector<16x1xf32>
      %160 = arith.mulf %159, %158 : vector<16x1xf32>
      %161 = vector.broadcast %140 : f32 to vector<16x1xf32>
      %162 = arith.mulf %161, %160 : vector<16x1xf32>
      %163 = math.tanh %162 : vector<16x1xf32>
      %164 = vector.broadcast %163 : vector<16x1xf32> to vector<16x128xf32>
      %165 = arith.mulf %164, %138 : vector<16x128xf32>
      %cst_75 = arith.constant 1.000000e+00 : f32
      %166 = vector.broadcast %cst_75 : f32 to vector<16x1xf32>
      %167 = arith.mulf %146, %166 : vector<16x1xf32>
      %168 = vector.broadcast %167 : vector<16x1xf32> to vector<16x128xf32>
      %169 = arith.divf %165, %168 : vector<16x128xf32>
      %c0_76 = arith.constant 0 : index
      %c0_77 = arith.constant 0 : index
      %170 = vector.load %arg12[%c0_76, %c0_77] : memref<128x128xf32, #tpu.memory_space<vmem>>, vector<128x128xf32>
      %c0_78 = arith.constant 0 : index
      %c0_79 = arith.constant 0 : index
      %171 = vector.load %arg13[%c0_78, %c0_79] : memref<1x128xf32, #tpu.memory_space<vmem>>, vector<1x128xf32>
      %cst_80 = arith.constant dense<0.000000e+00> : vector<16x128xf32>
      %172 = tpu.matmul %169, %170, %cst_80 {dimension_numbers = #tpu.dot_dimension_numbers<[1], [0], [0], [1], [0, 0, 1, 1], [], []>} : vector<16x128xf32>, vector<128x128xf32>, vector<16x128xf32> -> vector<16x128xf32>
      %173 = arith.mulf %169, %169 : vector<16x128xf32>
      %cst_81 = arith.constant dense<0.000000e+00> : vector<16xf32>
      %174 = vector.multi_reduction <add>, %173, %cst_81 [1] : vector<16x128xf32> to vector<16xf32>
      %175 = vector.shape_cast %174 : vector<16xf32> to vector<16x1xf32>
      %cst_82 = arith.constant 1.000000e-15 : f32
      %176 = vector.broadcast %cst_82 : f32 to vector<16x1xf32>
      %177 = arith.maximumf %175, %176 : vector<16x1xf32>
      %178 = math.sqrt %177 : vector<16x1xf32>
      %179 = arith.mulf %172, %172 : vector<16x128xf32>
      %cst_83 = arith.constant dense<0.000000e+00> : vector<16xf32>
      %180 = vector.multi_reduction <add>, %179, %cst_83 [1] : vector<16x128xf32> to vector<16xf32>
      %181 = vector.shape_cast %180 : vector<16xf32> to vector<16x1xf32>
      %cst_84 = arith.constant 1.000000e-15 : f32
      %182 = vector.broadcast %cst_84 : f32 to vector<16x1xf32>
      %183 = arith.maximumf %181, %182 : vector<16x1xf32>
      %184 = math.sqrt %183 : vector<16x1xf32>
      %185 = arith.divf %184, %178 : vector<16x1xf32>
      %cst_85 = arith.constant 1.000000e+00 : f32
      %186 = vector.broadcast %cst_85 : f32 to vector<16x1xf32>
      %187 = arith.mulf %186, %178 : vector<16x1xf32>
      %cst_86 = arith.constant -0.99999988 : f32
      %cst_87 = arith.constant 0.99999988 : f32
      %188 = vector.broadcast %cst_86 : f32 to vector<16x1xf32>
      %189 = arith.maximumf %188, %187 : vector<16x1xf32>
      %190 = vector.broadcast %cst_87 : f32 to vector<16x1xf32>
      %191 = arith.minimumf %190, %189 : vector<16x1xf32>
      %cst_88 = arith.constant 1.000000e+00 : f32
      %192 = vector.broadcast %cst_88 : f32 to vector<16x1xf32>
      %193 = arith.addf %192, %191 : vector<16x1xf32>
      %cst_89 = arith.constant 1.000000e+00 : f32
      %194 = vector.broadcast %cst_89 : f32 to vector<16x1xf32>
      %195 = arith.subf %194, %191 : vector<16x1xf32>
      %196 = arith.divf %193, %195 : vector<16x1xf32>
      %197 = math.log %196 : vector<16x1xf32>
      %cst_90 = arith.constant 5.000000e-01 : f32
      %198 = vector.broadcast %cst_90 : f32 to vector<16x1xf32>
      %199 = arith.mulf %198, %197 : vector<16x1xf32>
      %200 = arith.mulf %185, %199 : vector<16x1xf32>
      %201 = math.tanh %200 : vector<16x1xf32>
      %202 = vector.broadcast %201 : vector<16x1xf32> to vector<16x128xf32>
      %203 = arith.mulf %202, %172 : vector<16x128xf32>
      %cst_91 = arith.constant 1.000000e+00 : f32
      %204 = vector.broadcast %cst_91 : f32 to vector<16x1xf32>
      %205 = arith.mulf %184, %204 : vector<16x1xf32>
      %206 = vector.broadcast %205 : vector<16x1xf32> to vector<16x128xf32>
      %207 = arith.divf %203, %206 : vector<16x128xf32>
      %208 = vector.broadcast %171 : vector<1x128xf32> to vector<16x128xf32>
      %209 = arith.mulf %207, %208 : vector<16x128xf32>
      %cst_92 = arith.constant dense<0.000000e+00> : vector<16xf32>
      %210 = vector.multi_reduction <add>, %209, %cst_92 [1] : vector<16x128xf32> to vector<16xf32>
      %211 = vector.shape_cast %210 : vector<16xf32> to vector<16x1xf32>
      %212 = arith.mulf %207, %207 : vector<16x128xf32>
      %cst_93 = arith.constant dense<0.000000e+00> : vector<16xf32>
      %213 = vector.multi_reduction <add>, %212, %cst_93 [1] : vector<16x128xf32> to vector<16xf32>
      %214 = vector.shape_cast %213 : vector<16xf32> to vector<16x1xf32>
      %215 = arith.mulf %171, %171 : vector<1x128xf32>
      %cst_94 = arith.constant dense<0.000000e+00> : vector<1xf32>
      %216 = vector.multi_reduction <add>, %215, %cst_94 [1] : vector<1x128xf32> to vector<1xf32>
      %217 = vector.shape_cast %216 : vector<1xf32> to vector<1x1xf32>
      %cst_95 = arith.constant 2.000000e+00 : f32
      %218 = vector.broadcast %cst_95 : f32 to vector<16x1xf32>
      %219 = arith.mulf %218, %211 : vector<16x1xf32>
      %cst_96 = arith.constant 1.000000e+00 : f32
      %220 = vector.broadcast %cst_96 : f32 to vector<16x1xf32>
      %221 = arith.addf %220, %219 : vector<16x1xf32>
      %cst_97 = arith.constant 1.000000e+00 : f32
      %222 = vector.broadcast %cst_97 : f32 to vector<1x1xf32>
      %223 = arith.mulf %222, %217 : vector<1x1xf32>
      %224 = vector.broadcast %223 : vector<1x1xf32> to vector<16x1xf32>
      %225 = arith.addf %221, %224 : vector<16x1xf32>
      %226 = vector.broadcast %225 : vector<16x1xf32> to vector<16x128xf32>
      %227 = arith.mulf %226, %207 : vector<16x128xf32>
      %cst_98 = arith.constant 1.000000e+00 : f32
      %228 = vector.broadcast %cst_98 : f32 to vector<16x1xf32>
      %229 = arith.mulf %228, %214 : vector<16x1xf32>
      %cst_99 = arith.constant 1.000000e+00 : f32
      %230 = vector.broadcast %cst_99 : f32 to vector<16x1xf32>
      %231 = arith.subf %230, %229 : vector<16x1xf32>
      %232 = vector.broadcast %231 : vector<16x1xf32> to vector<16x128xf32>
      %233 = vector.broadcast %171 : vector<1x128xf32> to vector<16x128xf32>
      %234 = arith.mulf %232, %233 : vector<16x128xf32>
      %235 = arith.addf %227, %234 : vector<16x128xf32>
      %cst_100 = arith.constant 2.000000e+00 : f32
      %236 = vector.broadcast %cst_100 : f32 to vector<16x1xf32>
      %237 = arith.mulf %236, %211 : vector<16x1xf32>
      %cst_101 = arith.constant 1.000000e+00 : f32
      %238 = vector.broadcast %cst_101 : f32 to vector<16x1xf32>
      %239 = arith.addf %238, %237 : vector<16x1xf32>
      %cst_102 = arith.constant 1.000000e+00 : f32
      %240 = vector.broadcast %cst_102 : f32 to vector<16x1xf32>
      %241 = arith.mulf %240, %214 : vector<16x1xf32>
      %242 = vector.broadcast %217 : vector<1x1xf32> to vector<16x1xf32>
      %243 = arith.mulf %241, %242 : vector<16x1xf32>
      %244 = arith.addf %239, %243 : vector<16x1xf32>
      %cst_103 = arith.constant 1.000000e-15 : f32
      %245 = vector.broadcast %cst_103 : f32 to vector<16x1xf32>
      %246 = arith.maximumf %244, %245 : vector<16x1xf32>
      %247 = vector.broadcast %246 : vector<16x1xf32> to vector<16x128xf32>
      %248 = arith.divf %235, %247 : vector<16x128xf32>
      %c0_104 = arith.constant 0 : index
      %c0_105 = arith.constant 0 : index
      %c0_106 = arith.constant 0 : index
      %249 = vector.load %arg5[%c0_104, %c0_105, %c0_106] : memref<1x16x128xf32, #tpu.memory_space<vmem>>, vector<1x16x128xf32>
      %250 = vector.shape_cast %249 : vector<1x16x128xf32> to vector<16x128xf32>
      %251 = arith.mulf %250, %248 : vector<16x128xf32>
      %cst_107 = arith.constant dense<0.000000e+00> : vector<16xf32>
      %252 = vector.multi_reduction <add>, %251, %cst_107 [1] : vector<16x128xf32> to vector<16xf32>
      %253 = vector.shape_cast %252 : vector<16xf32> to vector<16x1xf32>
      %254 = arith.mulf %250, %250 : vector<16x128xf32>
      %cst_108 = arith.constant dense<0.000000e+00> : vector<16xf32>
      %255 = vector.multi_reduction <add>, %254, %cst_108 [1] : vector<16x128xf32> to vector<16xf32>
      %256 = vector.shape_cast %255 : vector<16xf32> to vector<16x1xf32>
      %257 = arith.mulf %248, %248 : vector<16x128xf32>
      %cst_109 = arith.constant dense<0.000000e+00> : vector<16xf32>
      %258 = vector.multi_reduction <add>, %257, %cst_109 [1] : vector<16x128xf32> to vector<16xf32>
      %259 = vector.shape_cast %258 : vector<16xf32> to vector<16x1xf32>
      %cst_110 = arith.constant 2.000000e+00 : f32
      %260 = vector.broadcast %cst_110 : f32 to vector<16x1xf32>
      %261 = arith.mulf %260, %253 : vector<16x1xf32>
      %cst_111 = arith.constant 1.000000e+00 : f32
      %262 = vector.broadcast %cst_111 : f32 to vector<16x1xf32>
      %263 = arith.addf %262, %261 : vector<16x1xf32>
      %cst_112 = arith.constant 1.000000e+00 : f32
      %264 = vector.broadcast %cst_112 : f32 to vector<16x1xf32>
      %265 = arith.mulf %264, %259 : vector<16x1xf32>
      %266 = arith.addf %263, %265 : vector<16x1xf32>
      %267 = vector.broadcast %266 : vector<16x1xf32> to vector<16x128xf32>
      %268 = arith.mulf %267, %250 : vector<16x128xf32>
      %cst_113 = arith.constant 1.000000e+00 : f32
      %269 = vector.broadcast %cst_113 : f32 to vector<16x1xf32>
      %270 = arith.mulf %269, %256 : vector<16x1xf32>
      %cst_114 = arith.constant 1.000000e+00 : f32
      %271 = vector.broadcast %cst_114 : f32 to vector<16x1xf32>
      %272 = arith.subf %271, %270 : vector<16x1xf32>
      %273 = vector.broadcast %272 : vector<16x1xf32> to vector<16x128xf32>
      %274 = arith.mulf %273, %248 : vector<16x128xf32>
      %275 = arith.addf %268, %274 : vector<16x128xf32>
      %cst_115 = arith.constant 2.000000e+00 : f32
      %276 = vector.broadcast %cst_115 : f32 to vector<16x1xf32>
      %277 = arith.mulf %276, %253 : vector<16x1xf32>
      %cst_116 = arith.constant 1.000000e+00 : f32
      %278 = vector.broadcast %cst_116 : f32 to vector<16x1xf32>
      %279 = arith.addf %278, %277 : vector<16x1xf32>
      %cst_117 = arith.constant 1.000000e+00 : f32
      %280 = vector.broadcast %cst_117 : f32 to vector<16x1xf32>
      %281 = arith.mulf %280, %256 : vector<16x1xf32>
      %282 = arith.mulf %281, %259 : vector<16x1xf32>
      %283 = arith.addf %279, %282 : vector<16x1xf32>
      %cst_118 = arith.constant 1.000000e-15 : f32
      %284 = vector.broadcast %cst_118 : f32 to vector<16x1xf32>
      %285 = arith.maximumf %283, %284 : vector<16x1xf32>
      %286 = vector.broadcast %285 : vector<16x1xf32> to vector<16x128xf32>
      %287 = arith.divf %275, %286 : vector<16x128xf32>
      %288 = arith.mulf %287, %287 : vector<16x128xf32>
      %cst_119 = arith.constant dense<0.000000e+00> : vector<16xf32>
      %289 = vector.multi_reduction <add>, %288, %cst_119 [1] : vector<16x128xf32> to vector<16xf32>
      %290 = vector.shape_cast %289 : vector<16xf32> to vector<16x1xf32>
      %cst_120 = arith.constant 1.000000e-15 : f32
      %291 = vector.broadcast %cst_120 : f32 to vector<16x1xf32>
      %292 = arith.maximumf %290, %291 : vector<16x1xf32>
      %293 = math.sqrt %292 : vector<16x1xf32>
      %cst_121 = arith.constant 1.000000e+00 : f32
      %294 = vector.broadcast %cst_121 : f32 to vector<16x1xf32>
      %295 = arith.mulf %294, %293 : vector<16x1xf32>
      %cst_122 = arith.constant -0.99999988 : f32
      %cst_123 = arith.constant 0.99999988 : f32
      %296 = vector.broadcast %cst_122 : f32 to vector<16x1xf32>
      %297 = arith.maximumf %296, %295 : vector<16x1xf32>
      %298 = vector.broadcast %cst_123 : f32 to vector<16x1xf32>
      %299 = arith.minimumf %298, %297 : vector<16x1xf32>
      %cst_124 = arith.constant 1.000000e+00 : f32
      %300 = vector.broadcast %cst_124 : f32 to vector<16x1xf32>
      %301 = arith.addf %300, %299 : vector<16x1xf32>
      %cst_125 = arith.constant 1.000000e+00 : f32
      %302 = vector.broadcast %cst_125 : f32 to vector<16x1xf32>
      %303 = arith.subf %302, %299 : vector<16x1xf32>
      %304 = arith.divf %301, %303 : vector<16x1xf32>
      %305 = math.log %304 : vector<16x1xf32>
      %cst_126 = arith.constant 5.000000e-01 : f32
      %306 = vector.broadcast %cst_126 : f32 to vector<16x1xf32>
      %307 = arith.mulf %306, %305 : vector<16x1xf32>
      %cst_127 = arith.constant 0.707106769 : f32
      %308 = vector.broadcast %cst_127 : f32 to vector<16x1xf32>
      %309 = arith.mulf %308, %307 : vector<16x1xf32>
      %310 = math.tanh %309 : vector<16x1xf32>
      %311 = vector.broadcast %310 : vector<16x1xf32> to vector<16x128xf32>
      %312 = arith.mulf %311, %287 : vector<16x128xf32>
      %cst_128 = arith.constant 1.000000e+00 : f32
      %313 = vector.broadcast %cst_128 : f32 to vector<16x1xf32>
      %314 = arith.mulf %293, %313 : vector<16x1xf32>
      %315 = vector.broadcast %314 : vector<16x1xf32> to vector<16x128xf32>
      %316 = arith.divf %312, %315 : vector<16x128xf32>
      %c0_129 = arith.constant 0 : index
      %c0_130 = arith.constant 0 : index
      %c0_131 = arith.constant 0 : index
      %317 = vector.load %arg14[%c0_129, %c0_130, %c0_131] : memref<1x16x128xf32, #tpu.memory_space<vmem>>, vector<1x16x128xf32>
      %318 = vector.shape_cast %317 : vector<1x16x128xf32> to vector<16x128xf32>
      %319 = vector.shape_cast %316 : vector<16x128xf32> to vector<1x16x128xf32>
      tpu.vector_store %arg14[%c0_129, %c0_130, %c0_131], %319 {strides = array<i32>} : memref<1x16x128xf32, #tpu.memory_space<vmem>>, vector<1x16x128xf32>,
    } else {
    }
    return
  }
  func.func @transform_0(%arg0: i32, %arg1: i32, %arg2: i32) -> i32 {
    %c0_i32 = arith.constant 0 : i32
    %c0_i32_0 = arith.constant 0 : i32
    return %c0_i32 : i32
  }
  func.func @transform_1(%arg0: i32, %arg1: i32, %arg2: i32) -> i32 {
    %c0_i32 = arith.constant 0 : i32
    %c0_i32_0 = arith.constant 0 : i32
    return %c0_i32 : i32
  }
  func.func @transform_2(%arg0: i32, %arg1: i32, %arg2: i32) -> (i32, i32, i32) {
    %c0_i32 = arith.constant 0 : i32
    %c0_i32_0 = arith.constant 0 : i32
    return %arg0, %arg1, %c0_i32 : i32, i32, i32
  }
  func.func @transform_3(%arg0: i32, %arg1: i32, %arg2: i32) -> (i32, i32, i32) {
    %c0_i32 = arith.constant 0 : i32
    %c0_i32_0 = arith.constant 0 : i32
    return %arg0, %arg1, %c0_i32 : i32, i32, i32
  }
  func.func @transform_4(%arg0: i32, %arg1: i32, %arg2: i32) -> (i32, i32, i32) {
    %c0_i32 = arith.constant 0 : i32
    %c0_i32_0 = arith.constant 0 : i32
    return %arg0, %arg2, %c0_i32 : i32, i32, i32
  }
  func.func @transform_5(%arg0: i32, %arg1: i32, %arg2: i32) -> (i32, i32, i32) {
    %c0_i32 = arith.constant 0 : i32
    %c0_i32_0 = arith.constant 0 : i32
    return %arg0, %arg2, %c0_i32 : i32, i32, i32
  }
  func.func @transform_6(%arg0: i32, %arg1: i32, %arg2: i32) -> (i32, i32, i32) {
    %c0_i32 = arith.constant 0 : i32
    %c0_i32_0 = arith.constant 0 : i32
    return %arg0, %c0_i32, %arg2 : i32, i32, i32
  }
  func.func @transform_7(%arg0: i32, %arg1: i32, %arg2: i32) -> (i32, i32) {
    %c0_i32 = arith.constant 0 : i32
    %c0_i32_0 = arith.constant 0 : i32
    %c0_i32_1 = arith.constant 0 : i32
    return %c0_i32, %c0_i32_0 : i32, i32
  }
  func.func @transform_8(%arg0: i32, %arg1: i32, %arg2: i32) -> (i32, i32) {
    %c0_i32 = arith.constant 0 : i32
    %c0_i32_0 = arith.constant 0 : i32
    %c0_i32_1 = arith.constant 0 : i32
    return %c0_i32, %c0_i32_0 : i32, i32
  }
  func.func @transform_9(%arg0: i32, %arg1: i32, %arg2: i32) -> (i32, i32) {
    %c0_i32 = arith.constant 0 : i32
    %c0_i32_0 = arith.constant 0 : i32
    %c0_i32_1 = arith.constant 0 : i32
    return %c0_i32, %c0_i32_0 : i32, i32
  }
  func.func @transform_10(%arg0: i32, %arg1: i32, %arg2: i32) -> (i32, i32) {
    %c0_i32 = arith.constant 0 : i32
    %c0_i32_0 = arith.constant 0 : i32
    %c0_i32_1 = arith.constant 0 : i32
    return %c0_i32, %c0_i32_0 : i32, i32
  }
  func.func @transform_11(%arg0: i32, %arg1: i32, %arg2: i32) -> (i32, i32, i32) {
    %c0_i32 = arith.constant 0 : i32
    %c0_i32_0 = arith.constant 0 : i32
    return %arg0, %arg1, %c0_i32 : i32, i32, i32
  }
  func.func @transform_12(%arg0: i32, %arg1: i32, %arg2: i32) -> (i32, i32, i32) {
    %c0_i32 = arith.constant 0 : i32
    %c0_i32_0 = arith.constant 0 : i32
    return %arg0, %arg1, %c0_i32 : i32, i32, i32
  }
}

</mosaic_0001>

<bundles_post_ra>
// kernel: tpu_custom_call.1
= control target key start
LH: loop header
LB: loop body
LE: loop exit
PB: predicated region body
PF: predicated region fallthrough
CT: control target
= control target key end

     0   :  { %s4124_s0 = inlined_call_operand.<no memory space> [shape: f32[1], index: 0, kind: input, shape index: {}]   ;;  %s4125_s1 = inlined_call_operand.vmem [shape: f32[2], index: 1, kind: input, shape index: {}]   ;;  %s4126_s2 = inlined_call_operand.hbm [shape: f32[2,16,128], index: 2, kind: input, shape index: {}]   ;;  %s4127_s3 = inlined_call_operand.hbm [shape: f32[2,16,128], index: 3, kind: input, shape index: {}]   ;;  %s4128_s4 = inlined_call_operand.hbm [shape: f32[2,256,128], index: 4, kind: input, shape index: {}]   ;;  %s4129_s5 = inlined_call_operand.hbm [shape: f32[2,256,128], index: 5, kind: input, shape index: {}]   ;;  %s4130_s6 = inlined_call_operand.vmem [shape: f32[2,4,256], index: 6, kind: input, shape index: {}]   ;;  %s4131_s7 = inlined_call_operand.hbm [shape: f32[128,128], index: 7, kind: input, shape index: {}]   ;;  %s4132_s8 = inlined_call_operand.vmem [shape: f32[1,128], index: 8, kind: input, shape index: {}]   ;;  %s4133_s9 = inlined_call_operand.hbm [shape: f32[128,128], index: 9, kind: input, shape index: {}]   ;;  %s4134_s10 = inlined_call_operand.vmem [shape: f32[1,128], index: 10, kind: input, shape index: {}]   ;;  %s4135_s11 = inlined_call_operand.hbm [shape: f32[2,16,128], index: 11, kind: output, shape index: {0}]   ;;  %s4136_s12 = inlined_call_operand.hbm [shape: f32[2,16,256], index: 12, kind: output, shape index: {1}]  }
   0x1   :  { %4166 = sst [smem:[#allocation39_spill]] %s4125_s1 }
   0x2   :  { %4167 = sst [smem:[#allocation40_spill]] %s4127_s3 }
   0x3   :  { %4168 = sst [smem:[#allocation41_spill]] %s4130_s6 }
   0x4   :  { %4169 = sst [smem:[#allocation42_spill]] %s4131_s7 }
   0x5   :  { %4170 = sst [smem:[#allocation43_spill]] %s4132_s8 }
   0x6   :  { %4171 = sst [smem:[#allocation44_spill]] %s4134_s10 }
   0x7   :  { %4172 = sst [smem:[#allocation45_spill]] %s4135_s11 }
   0x8   :  { %4173 = sst [smem:[#allocation46_spill]] %s4136_s12 }
   0x9   :  { %18 = sst [smem:[#allocation8]] %s4124_s0 }
   0xa   :  { %19 = vsyncpa [#allocation12], 0 }
   0xb   :  { %20 = vsyncpa [#allocation10], 0 }
   0xc   :  { %22 = vsyncpa [#allocation10 + $0x1], 0 }
   0xd   :  { %23 = vsyncpa [#allocation15], 0 }
   0xe   :  { %25 = vsyncpa [#allocation15 + $0x1], 0 }
   0xf   :  { %26 = vsyncpa [#allocation18], 0 }
  0x10   :  { %28 = vsyncpa [#allocation18 + $0x1], 0 }
  0x11   :  { %29 = vsyncpa [#allocation21], 0 }
  0x12   :  { %30 = vsyncpa [#allocation11], 0 }
  0x13   :  { %32 = vsyncpa [#allocation11 + $0x1], 0 }
  0x14   :  { %33 = vsyncpa [#allocation24], 0 }
  0x15   :  { %35 = vsyncpa [#allocation24 + $0x1], 0  ;;  %s3401_s23 = smov 0   ;;  %s3403_s24 = smov 0  }
  0x16   :  { %s3405_s25 = smov 0   ;;  %s3407_s26 = smov 0  }
  0x17   :  { %s3409_s0 = smov 0   ;;  %s3411_s27 = smov 0  }
  0x18 LB: > { %4174 = sst [smem:[#allocation33_spill]] %s3293_s23  ;;  %s3432_s28 = sadd.s32 4294967295, %s3313_s27   ;;  %s3313_s27 = sphi %s3411_s27, %s41_s27   ;;  %s3309_s0 = sphi %s3409_s0, %s4230_s0   ;;  %s3305_s26 = sphi %s3407_s26, %s4229_s26   ;;  %s3301_s25 = sphi %s3405_s25, %s4228_s25   ;;  %s3297_s24 = sphi %s3403_s24, %s4227_s24   ;;  %s3293_s23 = sphi %s3401_s23, %s4226_s23  }
  0x19   : > { %4175 = sst [smem:[#allocation34_spill]] %s3305_s26  ;;  %s2299_s29 = sadd.s32 4294967294, %s3313_s27  }
  0x1a   : > { %p118_p0 = scmp.ne.s32.totalorder %s3301_s25, %s3297_s24  ;;  %p119_p1 = scmp.eq.s32.totalorder %s3313_s27, 0 }
  0x1b   : > { %p124_p2 = scmp.ne.s32.totalorder %s3297_s24, %s3293_s23  ;;  %p4143_p3 = scmp.eq.s32.totalorder %s3432_s28, 0 }
  0x1c   : > { %p346_p4 = scmp.eq.s32.totalorder %s3432_s28, 1  ;;  %p3443_p5 = por %p119_p1, %p118_p0 }
  0x1d   : > { %p352_p6 = scmp.eq.s32.totalorder %s2299_s29, 1  ;;  %p3449_p7 = por %p4143_p3, %p124_p2 }
  0x1e   : > { %p3453_p8 = por %p346_p4, %p118_p0  ;;  %p2300_p10 = scmp.ge.s32.totalorder %s3313_s27, 1 }
  0x1f   : > { %s4177_s14 = scalar_select %p3449_p7, 1, 0 }
  0x20   : > { %s4179_s15 = scalar_select %p3453_p8, 1, 0 }
  0x21   : > { %4178 = sst [smem:[#allocation35_spill]] %s4177_s14  ;;  %p3457_p9 = por %p352_p6, %p124_p2 }
  0x22   : > { %4180 = sst [smem:[#allocation36_spill]] %s4179_s15  ;;  %p387_p11 = scmp.lt.s32.totalorder %s3313_s27, 3 }
  0x23   : > { %s4181_s16 = scalar_select %p3457_p9, 1, 0 }
  0x24   : > { %p3463_p12 = pnand %p2300_p10, %p387_p11  ;;  %s3315_s18 = smov [#allocation19]  }
  0x25   : > { %4182 = sst [smem:[#allocation37_spill]] %s4181_s16  ;;  %s413_s19 = sshll.u32 %s3315_s18, 4  ;;  %s3467_s19 = int_to_ptr.vmem [resolvable:$true] %s413_s19 }
  0x26   : > { %s4183_s17 = scalar_select %p3463_p12, 1, 0 }
  0x27   : > { %p2688_p13 = pneg %p3463_p12  ;;  %s60_s21 = sadd.s32 1, %s3309_s0 }
  0x28   : > { %s3481_s22 = sand.u32 1, %s3301_s25   ;;  %p3483_p4 = scmp.ge.s32.totalorder %s60_s21, 2 }
  0x29   : > { %p3475_p2 = pnand %p2688_p13, %p4143_p3  ;;  %s4186_s7 = sld [smem:[#allocation42_spill]] }
  0x2b   : > { %s4184_s20 = scalar_select %p3475_p2, 1, 0 }
  0x2c   : > { %p3495_p10 = pneg %p3475_p2 }
  0x2e   : > { %s4187_s12 = scalar_select %p3495_p10, 1, 0 }
  0x2f   : > { %s2988_s16 = scalar_lea.hbm %s4186_s7, 2048 }
  0x30   : > { %p2989_p6 = scmp.ne.s32.totalorder %s4186_s7, %s2988_s16  ;;  %p2995_p0 = scmp.lt.u32.totalorder %s2988_s16, %s4186_s7 }
  0x32   : > { %p2991_p11 = pnand %p3495_p10, %p2989_p6 }
  0x34   : > { %p2992_p13 = pneg %p2991_p11 }
  0x36   : > { %p2997_p3 = pnand %p2995_p0, %p2992_p13 }
  0x38   : > { %3000 = shalt.err (!%p2997_p3)
}
  0x39   : > { %s3001_s11 = scalar_lea.vmem %s3467_s19, 2048  ;;  %p3009_p7 = scmp.lt.s32.totalorder %s3467_s19, %s3467_s19 }
  0x3a   : > { %p3002_p1 = scmp.ne.s32.totalorder %s3467_s19, %s3001_s11  ;;  %p3010_p12 = scmp.lt.s32.totalorder %s3001_s11, %s3001_s11 }
  0x3c   : > { %p3004_p9 = pnand %p3002_p1, %p3495_p10  ;;  %p3011_p6 = por %p3010_p12, %p3009_p7 }
  0x3e   : > { %p3005_p8 = pneg %p3004_p9 }
  0x40   : > { %p3012_p11 = pnand %p3011_p6, %p3005_p8 }
  0x42   : > { %3015 = shalt.err (!%p3012_p11)
}
  0x43   : > { %s4150_s23 = smov 128   ;;  %s4159_s10 = smov 8  }
  0x44   : > { %2694 = dma.hbm_to_vmem [thread:$0]  (!%p3475_p2), %s4186_s7, 2048, %s3467_s19, [#allocation18], %s4150_s23, %s4150_s23, %s4159_s10  }
  0x45   : > { %s4232_s21 = smov (%p3483_p4, %s60_s21), 0  ;;  %s4152_s16 = sshll.u32 %s3481_s22, 4 }
  0x46   : > { %4188 = sst [smem:[#allocation38_spill]] %s4232_s21  ;;  %s4153_s18 = sshll.u32 %s3309_s0, 8 }
  0x47   : > { %s106_s11 = ssub.s32 %s3309_s0, %s4232_s21  ;;  %p4189_p3 = scmp.lt.s32.totalorder %s3313_s27, 2 }
  0x48   : > { %p109_p8 = scmp.eq.s32.totalorder %s106_s11, 0  ;;  %s4154_s26 = sand.u32 1, %s3313_s27  }
  0x49   : > { %p3531_p7 = pnand %p4189_p3, %p3443_p5  ;;  %s4191_s8 = sadd.s32 1, %s3301_s25 }
  0x4a   : > { %s3539_s14 = scalar_select %p109_p8, %s3301_s25, %s4191_s8  }
  0x4b   : > { %s4190_s6 = scalar_select %p3531_p7, 1, 0 }
  0x4c   : > { %s4192_s3 = sld [smem:[#allocation40_spill]]  ;;  %s473_s13 = scalar_lea.vmem [#allocation14], %s4152_s16 }
  0x4d   : > { %s482_s15 = sshll.u32 %s473_s13, 4  ;;  %s3554_s11 = scalar_lea.sflag [#allocation15], %s4154_s26  ;;  %s3550_s15 = int_to_ptr.vmem [resolvable:$true] %s482_s15 }
  0x4e   : > { %p3560_p9 = pneg %p3531_p7 }
  0x50   : > { %s4193_s23 = scalar_select %p3560_p9, 1, 0 }
  0x52   : > { %s3546_s30 = scalar_lea.hbm %s4192_s3, %s4153_s18  ;;  %s3021_s13 = scalar_lea.hbm %s4192_s3, 512 }
  0x53   : > { %s3016_s8 = scalar_lea.hbm %s3546_s30, 256  ;;  %p3022_p1 = scmp.lt.u32.totalorder %s3546_s30, %s4192_s3 }
  0x54   : > { %p3017_p5 = scmp.ne.s32.totalorder %s3546_s30, %s3016_s8  ;;  %p3023_p4 = scmp.lt.u32.totalorder %s3021_s13, %s3016_s8 }
  0x55   : > { %p3025_p6 = scmp.lt.u32.totalorder %s3016_s8, %s3546_s30 }
  0x56   : > { %p3019_p12 = pnand %p3560_p9, %p3017_p5  ;;  %p3024_p13 = por %p3023_p4, %p3022_p1 }
  0x58   : > { %p3020_p0 = pneg %p3019_p12  ;;  %p3026_p11 = por %p3025_p6, %p3024_p13 }
  0x5a   : > { %p3027_p3 = pnand %p3026_p11, %p3020_p0 }
  0x5c   : > { %3030 = shalt.err (!%p3027_p3)
}
  0x5d   : > { %s3031_s26 = scalar_lea.vmem %s3550_s15, 256  ;;  %s3318_s19 = smov [#allocation14]  }
  0x5e   : > { %p3032_p8 = scmp.ne.s32.totalorder %s3550_s15, %s3031_s26  ;;  %s3036_s29 = sshll.u32 %s3318_s19, 4  ;;  %s3037_s29 = int_to_ptr.vmem [resolvable:$false] %s3036_s29 }
  0x5f   : > { %s3038_s16 = scalar_lea.vmem %s3037_s29, 512  ;;  %p3039_p2 = scmp.lt.s32.totalorder %s3550_s15, %s3037_s29 }
  0x60   : > { %p3034_p5 = pnand %p3032_p8, %p3560_p9  ;;  %p3040_p10 = scmp.lt.s32.totalorder %s3038_s16, %s3031_s26 }
  0x62   : > { %p3035_p12 = pneg %p3034_p5  ;;  %p3041_p1 = por %p3040_p10, %p3039_p2 }
  0x64   : > { %p3042_p4 = pnand %p3041_p1, %p3035_p12 }
  0x66   : > { %3045 = shalt.err (!%p3042_p4)
}
  0x67   : > { %s4194_s18 = smov 128   ;;  %s4195_s1 = sld [smem:[#allocation39_spill]] }
  0x68   : > { %2704 = dma.hbm_to_vmem [thread:$0]  (!%p3531_p7), %s3546_s30, 256, %s3550_s15, %s3554_s11, %s4194_s18, %s4194_s18, %s4159_s10  }
  0x69   : > { %p4196_p2 = scmp.ne.s32.totalorder %s4187_s12, 0 }
  0x6d   : > { %s403_s19 = sshll.u32 %s4195_s1, 4  ;;  %s404_s19 = int_to_ptr.vmem [resolvable:$true] %s403_s19 }
  0x6e   : > { %s3046_s29 = scalar_lea.vmem %s404_s19, 16  ;;  %p3054_p6 = scmp.lt.s32.totalorder %s404_s19, %s404_s19 }
  0x6f   : > { %p3047_p0 = scmp.ne.s32.totalorder %s404_s19, %s3046_s29  ;;  %p3055_p11 = scmp.lt.s32.totalorder %s3046_s29, %s3046_s29 }
  0x71   : > { %p3049_p10 = pnand %p3047_p0, %p4196_p2  ;;  %p3056_p3 = por %p3055_p11, %p3054_p6 }
  0x73   : > { %p3050_p13 = pneg %p3049_p10 }
  0x75   : > { %p3057_p8 = pnand %p3056_p3, %p3050_p13 }
  0x77   : > { %3060 = shalt.err (!%p3057_p8)
}
  0x78   : > { %s3319_s26 = smov [#allocation9]   ;;  %p4197_p5 = scmp.ne.s32.totalorder %s4184_s20, 0 }
  0x79   : > { %s3320_s30 = smov [#allocation20]   ;;  %s4198_s16 = sshll.u32 %s3309_s0, 8 }
  0x7a   : > { %2691 = dma.vmem_to_smem (!%p4197_p5), %s404_s19, 16, %s3319_s26, [#allocation12]  }
  0x7b   : > { %s429_s15 = sshll.u32 %s3320_s30, 4  ;;  %s3599_s10 = scalar_lea.hbm %s4126_s2, %s4198_s16  ;;  %s430_s15 = int_to_ptr.vmem [resolvable:$true] %s429_s15 }
  0x7c   : > { %s3061_s3 = scalar_lea.hbm %s4133_s9, 2048 }
  0x7d   : > { %p3062_p12 = scmp.ne.s32.totalorder %s4133_s9, %s3061_s3  ;;  %p3068_p0 = scmp.lt.u32.totalorder %s3061_s3, %s4133_s9 }
  0x7f   : > { %p3064_p1 = pnand %p3062_p12, %p4196_p2 }
  0x81   : > { %p3065_p4 = pneg %p3064_p1 }
  0x83   : > { %p3070_p10 = pnand %p3068_p0, %p3065_p4 }
  0x85   : > { %3073 = shalt.err (!%p3070_p10)
}
  0x86   : > { %s3074_s30 = scalar_lea.vmem %s430_s15, 2048  ;;  %p3082_p3 = scmp.lt.s32.totalorder %s430_s15, %s430_s15 }
  0x87   : > { %p3075_p13 = scmp.ne.s32.totalorder %s430_s15, %s3074_s30  ;;  %p3083_p8 = scmp.lt.s32.totalorder %s3074_s30, %s3074_s30 }
  0x89   : > { %p3077_p6 = pnand %p3075_p13, %p4196_p2  ;;  %p3084_p7 = por %p3083_p8, %p3082_p3 }
  0x8b   : > { %p3078_p11 = pneg %p3077_p6 }
  0x8d   : > { %p3085_p9 = pnand %p3084_p7, %p3078_p11 }
  0x8f   : > { %3088 = shalt.err (!%p3085_p9)
}
  0x90   : > { %s4199_s1 = smov 8   ;;  %s4200_s12 = sshll.u32 %s3481_s22, 4 }
  0x91   : > { %2697 = dma.hbm_to_vmem [thread:$0]  (!%p4197_p5), %s4133_s9, 2048, %s430_s15, [#allocation21], %s4194_s18, %s4194_s18, %s4199_s1  }
  0x92   : > { %s450_s21 = scalar_lea.vmem [#allocation13], %s4200_s12  ;;  %s2311_s8 = sshll.u32 %s3481_s22, 8 }
  0x93   : > { %s459_s16 = sshll.u32 %s450_s21, 4  ;;  %s447_s20 = scalar_lea.sflag [#allocation10], %s3481_s22  ;;  %s3625_s16 = int_to_ptr.vmem [resolvable:$true] %s459_s16 }
  0x94   : > { %s3089_s13 = scalar_lea.hbm %s3599_s10, 256  ;;  %p4201_p9 = scmp.ne.s32.totalorder %s4193_s23, 0 }
  0x95   : > { %p3090_p7 = scmp.ne.s32.totalorder %s3599_s10, %s3089_s13  ;;  %s3094_s26 = scalar_lea.hbm %s4126_s2, 512 }
  0x96   : > { %p3095_p5 = scmp.lt.u32.totalorder %s3599_s10, %s4126_s2  ;;  %p3096_p1 = scmp.lt.u32.totalorder %s3094_s26, %s3089_s13 }
  0x97   : > { %p3092_p2 = pnand %p3090_p7, %p4201_p9  ;;  %p3098_p0 = scmp.lt.u32.totalorder %s3089_s13, %s3599_s10 }
  0x98   : > { %p3097_p4 = por %p3096_p1, %p3095_p5 }
  0x99   : > { %p3093_p12 = pneg %p3092_p2 }
  0x9a   : > { %p3099_p10 = por %p3098_p0, %p3097_p4 }
  0x9c   : > { %p3100_p13 = pnand %p3099_p10, %p3093_p12 }
  0x9e   : > { %3103 = shalt.err (!%p3100_p13)
}
  0x9f   : > { %s3104_s15 = scalar_lea.vmem %s3625_s16, 256  ;;  %s3321_s3 = smov [#allocation13]  }
  0xa0   : > { %p3105_p6 = scmp.ne.s32.totalorder %s3625_s16, %s3104_s15  ;;  %s3109_s12 = sshll.u32 %s3321_s3, 4  ;;  %s3110_s12 = int_to_ptr.vmem [resolvable:$false] %s3109_s12 }
  0xa1   : > { %s3111_s21 = scalar_lea.vmem %s3110_s12, 512  ;;  %p3112_p8 = scmp.lt.s32.totalorder %s3625_s16, %s3110_s12 }
  0xa2   : > { %p3107_p11 = pnand %p3105_p6, %p4201_p9  ;;  %p3113_p7 = scmp.lt.s32.totalorder %s3111_s21, %s3104_s15 }
  0xa4   : > { %p3108_p3 = pneg %p3107_p11  ;;  %p3114_p2 = por %p3113_p7, %p3112_p8 }
  0xa6   : > { %p3115_p5 = pnand %p3114_p2, %p3108_p3 }
  0xa8   : > { %3118 = shalt.err (!%p3115_p5)
}
  0xa9   : > { %p4202_p12 = scmp.ne.s32.totalorder %s4190_s6, 0  ;;  %s2351_s13 = sshll.u32 %s3309_s0, 12 }
  0xaa   : > { %s496_s29 = scalar_lea.vmem [#allocation16], %s2311_s8  ;;  %s3662_s7 = scalar_lea.hbm %s4128_s4, %s2351_s13 }
  0xab   : > { %2701 = dma.hbm_to_vmem [thread:$0]  (!%p4202_p12), %s3599_s10, 256, %s3625_s16, %s447_s20, %s4194_s18, %s4194_s18, %s4199_s1  }
  0xac   : > { %s505_s19 = sshll.u32 %s496_s29, 4  ;;  %s3119_s15 = scalar_lea.hbm %s3662_s7, 4096  ;;  %s3664_s19 = int_to_ptr.vmem [resolvable:$true] %s505_s19 }
  0xad   : > { %p3120_p1 = scmp.ne.s32.totalorder %s3662_s7, %s3119_s15  ;;  %s3124_s20 = scalar_lea.hbm %s4128_s4, 8192 }
  0xae   : > { %p3125_p10 = scmp.lt.u32.totalorder %s3662_s7, %s4128_s4  ;;  %p3126_p13 = scmp.lt.u32.totalorder %s3124_s20, %s3119_s15 }
  0xaf   : > { %p3122_p4 = pnand %p3120_p1, %p4201_p9  ;;  %p3128_p11 = scmp.lt.u32.totalorder %s3119_s15, %s3662_s7 }
  0xb0   : > { %p3127_p6 = por %p3126_p13, %p3125_p10 }
  0xb1   : > { %p3123_p0 = pneg %p3122_p4 }
  0xb2   : > { %p3129_p3 = por %p3128_p11, %p3127_p6 }
  0xb4   : > { %p3130_p8 = pnand %p3129_p3, %p3123_p0 }
  0xb6   : > { %3133 = shalt.err (!%p3130_p8)
}
  0xb7   : > { %s3134_s21 = scalar_lea.vmem %s3664_s19, 4096  ;;  %s3322_s29 = smov [#allocation16]  }
  0xb8   : > { %p3135_p7 = scmp.ne.s32.totalorder %s3664_s19, %s3134_s21  ;;  %s3139_s26 = sshll.u32 %s3322_s29, 4  ;;  %s3140_s26 = int_to_ptr.vmem [resolvable:$false] %s3139_s26 }
  0xb9   : > { %s3141_s30 = scalar_lea.vmem %s3140_s26, 8192  ;;  %p3142_p1 = scmp.lt.s32.totalorder %s3664_s19, %s3140_s26 }
  0xba   : > { %p3137_p2 = pnand %p3135_p7, %p4201_p9  ;;  %p3143_p4 = scmp.lt.s32.totalorder %s3141_s30, %s3134_s21 }
  0xbc   : > { %p3138_p5 = pneg %p3137_p2  ;;  %p3144_p10 = por %p3143_p4, %p3142_p1 }
  0xbe   : > { %p3145_p13 = pnand %p3144_p10, %p3138_p5 }
  0xc0   : > { %3148 = shalt.err (!%p3145_p13)
}
  0xc1   : > { %2707 = dma.hbm_to_vmem [thread:$0]  (!%p4202_p12), %s3662_s7, 4096, %s3664_s19, %s3554_s11, %s4194_s18, %s4194_s18, %s4199_s1  }
  0xc2   : > { %s3696_s16 = scalar_lea.hbm %s4129_s5, %s2351_s13  ;;  %s519_s20 = scalar_lea.vmem [#allocation17], %s2311_s8 }
  0xc3   : > { %s528_s3 = sshll.u32 %s519_s20, 4  ;;  %s4203_s12 = sand.u32 1, %s3313_s27   ;;  %s3700_s3 = int_to_ptr.vmem [resolvable:$true] %s528_s3 }
  0xc4   : > { %s3704_s21 = scalar_lea.sflag [#allocation18], %s4203_s12  ;;  %s3149_s29 = scalar_lea.hbm %s3696_s16, 4096 }
  0xc5   : > { %p3150_p0 = scmp.ne.s32.totalorder %s3696_s16, %s3149_s29  ;;  %s3154_s22 = scalar_lea.hbm %s4129_s5, 8192 }
  0xc6   : > { %p3155_p3 = scmp.lt.u32.totalorder %s3696_s16, %s4129_s5  ;;  %p3156_p8 = scmp.lt.u32.totalorder %s3154_s22, %s3149_s29 }
  0xc7   : > { %p3152_p6 = pnand %p3150_p0, %p4201_p9  ;;  %p3158_p2 = scmp.lt.u32.totalorder %s3149_s29, %s3696_s16 }
  0xc8   : > { %p3157_p7 = por %p3156_p8, %p3155_p3 }
  0xc9   : > { %p3153_p11 = pneg %p3152_p6 }
  0xca   : > { %p3159_p5 = por %p3158_p2, %p3157_p7 }
  0xcc   : > { %p3160_p1 = pnand %p3159_p5, %p3153_p11 }
  0xce   : > { %3163 = shalt.err (!%p3160_p1)
}
  0xcf   : > { %s3164_s8 = scalar_lea.vmem %s3700_s3, 4096  ;;  %s3323_s26 = smov [#allocation17]  }
  0xd0   : > { %p3165_p4 = scmp.ne.s32.totalorder %s3700_s3, %s3164_s8  ;;  %s3169_s30 = sshll.u32 %s3323_s26, 4  ;;  %s3170_s30 = int_to_ptr.vmem [resolvable:$false] %s3169_s30 }
  0xd1   : > { %s3171_s15 = scalar_lea.vmem %s3170_s30, 8192  ;;  %p3172_p0 = scmp.lt.s32.totalorder %s3700_s3, %s3170_s30 }
  0xd2   : > { %p3167_p10 = pnand %p3165_p4, %p4201_p9  ;;  %p3173_p6 = scmp.lt.s32.totalorder %s3171_s15, %s3164_s8 }
  0xd4   : > { %p3168_p13 = pneg %p3167_p10  ;;  %p3174_p3 = por %p3173_p6, %p3172_p0 }
  0xd6   : > { %p3175_p8 = pnand %p3174_p3, %p3168_p13 }
  0xd8   : > { %3178 = shalt.err (!%p3175_p8)
}
  0xd9   : > { %2710 = dma.hbm_to_vmem [thread:$0]  (!%p4202_p12), %s3696_s16, 4096, %s3700_s3, %s3704_s21, %s4194_s18, %s4194_s18, %s4199_s1  }
  0xda   : > { %p4204_p9 = scmp.ne.s32.totalorder %s4183_s17, 0 }
  0xdb   : > { %p4205_p11 = scmp.eq.s32.totalorder (!%p4204_p9), %s3432_s28, 0 }
  0xdc   : > { %553 = sbr.rel (%p4204_p9) target bundleno = 3296 (0xce0), region = 64 }
  0xe3   : > { %3260 = dma.done.wait (%p4205_p11), [#allocation12], 16   ;;  %p4206_p7 = pmov %p4205_p11 }
  0xe4   : > { %s4207_s23 = sld [smem:[#allocation35_spill]]  ;;  %s3738_s10 = sand.u32 1, %s3297_s24  }
  0xe5   : > { %3262 = vsyncadd (%p4206_p7), [#allocation12], 4294967280  ;;  %s3741_s6 = sshll.u32 %s3738_s10, 4  ;;  %s560_s20 = scalar_lea.sflag [#allocation10], %s3738_s10 }
  0xe6   : > { %s3745_s18 = scalar_lea.vmem [#allocation13], %s3741_s6 }
  0xea   : > { %p4208_p12 = scmp.ne.s32.totalorder %s4207_s23, 0 }
  0xec   : > { %3264 = dma.done.wait (%p4208_p12), %s560_s20, 256  }
  0xed   : > { %3266 = vsyncadd (%p4208_p12), %s560_s20, 4294967040  ;;  %s568_s17 = sand.u32 1, %s3432_s28   ;;  %s572_s16 = scalar_lea.vmem [#allocation14], %s3741_s6 }
  0xee   : > { %s569_s1 = scalar_lea.sflag [#allocation15], %s568_s17 }
  0xef   : > { %3268 = dma.done.wait (%p4208_p12), %s569_s1, 4352  }
  0xf0   : > { %3270 = vsyncadd (%p4208_p12), %s569_s1, 4294962944  ;;  %s2321_s3 = sshll.u32 %s3738_s10, 8  ;;  %s587_s21 = scalar_lea.sflag [#allocation18], %s568_s17 }
  0xf1   : > { %s3758_s12 = scalar_lea.vmem [#allocation16], %s2321_s3  ;;  %s3760_s29 = scalar_lea.vmem [#allocation17], %s2321_s3 }
  0xf2   : > { %3272 = dma.done.wait (%p4208_p12), %s587_s21, 4096  }
  0xf3   : > { %3274 = vsyncadd (%p4208_p12), %s587_s21, 4294963200  ;;  %p4209_p2 = pmov %p4206_p7 }
  0xf5   : > { %3276 = dma.done.wait (%p4209_p2), [#allocation18], 2048   ;;  %p4210_p5 = pmov %p4209_p2 }
  0xf6   : > { %p4211_p1 = pmov %p4209_p2 }
  0xf7   : > { %3278 = vsyncadd (%p4210_p5), [#allocation18], 4294965248 }
  0xf8   : > { %3280 = dma.done.wait (%p4211_p1), [#allocation21], 2048   ;;  %p4212_p4 = pmov %p4211_p1 }
  0xfa   : > { %3282 = vsyncadd (%p4212_p4), [#allocation21], 4294965248 }
  0xfb   : > { %603 = sfence }
  0xfc   : > { %v693_v0 = vld [vmem:[#allocation19] sm:$0xff]  ;;  %v694_v1 = vld [vmem:[#allocation19 + $0x8] sm:$0xff]  ;;  %v695_v2 = vld [vmem:[#allocation19 + $0x10] sm:$0xff]  ;;  %s4213_s13 = sld [smem:[#allocation43_spill]]  ;;  %vm880_vm0 = vcmask 1040384   ;;  %vm1010_vm13 = vcmask 7168  }
  0xfd   : > { %v2536_v3 = vpack.c.bf16 %v694_v1, %v693_v0  ;;  %v696_v4 = vld [vmem:[#allocation19 + $0x18] sm:$0xff]  ;;  %v697_v6 = vld [vmem:[#allocation19 + $0x20] sm:$0xff]  ;;  %v698_v7 = vld [vmem:[#allocation19 + $0x28] sm:$0xff]  ;;  %s4214_s22 = sld [smem:[#allocation34_spill]]  ;;  %s1296_s23 = sld [smem:[#allocation8]] }
  0xfe   : > { %v2540_v5 = vpack.c.bf16 %v696_v4, %v695_v2  ;;  %v2544_v8 = vpack.c.bf16 %v698_v7, %v697_v6  ;;  %v689_v9 = vld [vmem:[%s3745_s18] sm:$0xff]  ;;  %v700_v11 = vld [vmem:[#allocation19 + $0x38] sm:$0xff]  ;;  %v702_v17 = vld [vmem:[#allocation19 + $0x48] sm:$0xff]  ;;  %s4215_s30 = sld [smem:[#allocation41_spill]]  ;;  %s4217_s21 = sld [smem:[#allocation36_spill]] }
  0xff   : > { %2537 = vmatprep.subr.bf16.mxu0 %v2536_v3  ;;  %v699_v10 = vld [vmem:[#allocation19 + $0x30] sm:$0xff]  ;;  %2498 = vmatprep.mubr.f32.mxu0 %v689_v9  ;;  %v785_v12 = vmul.f32 %v689_v9, %v689_v9  ;;  %v690_v13 = vld [vmem:[%s3745_s18 + $0x8] sm:$0xff]  ;;  %v701_v16 = vld [vmem:[#allocation19 + $0x40] sm:$0xff]  ;;  %s3327_s26 = smov [#allocation23]  }
 0x100   : > { %2539 = vmatpush3.bf16.msra.mxu0 %v2536_v3  ;;  %v786_v14 = vmul.f32 %v690_v13, %v690_v13  ;;  %v2548_v15 = vpack.c.bf16 %v700_v11, %v699_v10  ;;  %v2552_v18 = vpack.c.bf16 %v702_v17, %v701_v16  ;;  %v703_v19 = vld [vmem:[#allocation19 + $0x50] sm:$0xff]  ;;  %v704_v20 = vld [vmem:[#allocation19 + $0x58] sm:$0xff]  ;;  %v705_v22 = vld [vmem:[#allocation19 + $0x60] sm:$0xff]  ;;  %v862_v17 = vlaneseq }
 0x101   : > { %2541 = vmatprep.subr.bf16.mxu0 %v2540_v5  ;;  %787 = vadd.xlane.f32.xlu0 %v785_v12  ;;  %v2556_v21 = vpack.c.bf16 %v704_v20, %v703_v19  ;;  %v706_v23 = vld [vmem:[#allocation19 + $0x68] sm:$0xff]  ;;  %v707_v25 = vld [vmem:[#allocation19 + $0x70] sm:$0xff]  ;;  %v708_v26 = vld [vmem:[#allocation19 + $0x78] sm:$0xff] }
 0x102   : > { %v2560_v24 = vpack.c.bf16 %v706_v23, %v705_v22  ;;  %v2564_v27 = vpack.c.bf16 %v708_v26, %v707_v25  ;;  %v3787_v32 = vld [vmem:[%s4213_s13] sm:$0x1]  ;;  %v3792_v22 = vshrl.u32 %v862_v17, 7  ;;  %s4218_s13 = sld [smem:[#allocation46_spill]] }
 0x103   : > { %v879_v33 = vmul.f32 %v3787_v32, %v3787_v32  ;;  %p674_p10 = scmp.lt.s32.totalorder %s4214_s22, 1  ;;  %s1640_s20 = sld [smem:[#allocation9 + %s4214_s22]] }
 0x104   : > { %2543 = vmatpush3.bf16.msra.mxu0 %v2540_v5  ;;  %v3795_v23 = vsub.s32 0, %v3792_v22  ;;  %s2355_s3 = sshll.u32 %s4214_s22, 9  ;;  %p4219_p0 = scmp.ne.s32.totalorder %s4217_s21, 0 }
 0x105   : > { %2545 = vmatprep.subr.bf16.mxu0 %v2544_v8  ;;  %789 = vadd.xlane.f32.xlu0 %v786_v14  ;;  %v881_v34 = vsel %vm880_vm0, %v879_v33, 0.0  ;;  %s675_s19 = scalar_select %p674_p10, %s4214_s22, 1 }
 0x106   : > { %v865_v25 = vrot.slane %v3787_v32, %v3795_v23 }
 0x107   : > { %s2353_s7 = sshll.u32 %s675_s19, 3 }
 0x108   : > { %2547 = vmatpush3.bf16.msra.mxu0 %v2544_v8  ;;  %s681_s15 = scalar_lea.vmem %s4215_s30, %s2353_s7  ;;  %s4031_s19 = scalar_lea.hbm %s4218_s13, %s2355_s3 }
 0x109   : > { %2549 = vmatprep.subr.bf16.mxu0 %v2548_v15  ;;  %s2013_s7 = scalar_lea.sflag [#allocation24], %s3738_s10  ;;  %s3183_s30 = sshll.u32 %s3327_s26, 4  ;;  %s3184_s30 = int_to_ptr.vmem [resolvable:$false] %s3183_s30 }
 0x10c   : > { %2551 = vmatpush3.bf16.msra.mxu0 %v2548_v15 }
 0x10d   : > { %2553 = vmatprep.subr.bf16.mxu0 %v2552_v18 }
 0x110   : > { %2555 = vmatpush3.bf16.msra.mxu0 %v2552_v18 }
 0x111   : > { %2557 = vmatprep.subr.bf16.mxu0 %v2556_v21 }
 0x114   : > { %2559 = vmatpush3.bf16.msra.mxu0 %v2556_v21 }
 0x115   : > { %2561 = vmatprep.subr.bf16.mxu0 %v2560_v24 }
 0x118   : > { %2563 = vmatpush3.bf16.msra.mxu0 %v2560_v24 }
 0x119   : > { %2565 = vmatprep.subr.bf16.mxu0 %v2564_v27 }
 0x11c   : > { %2567 = vmatpush3.bf16.msra.mxu0 %v2564_v27 }
 0x11f   : > { %2499 = vmatmul.mubr.f32.vlgmr.msra.gmra.mrb[0].mxu0 %v690_v13 }
 0x18e   : > { %v788_v35 = vpop.xlane.xlu0 %787 }
 0x18f   : > { %v791_v36 = vmax.f32 %v788_v35, 1e-15 }
 0x191   : > { %2788 = vrsqrt.f32 %v791_v36  ;;  %vm795_vm1 = vcmp.eq.f32.partialorder %v791_v36, inf  ;;  %v798_v42 = vand.u32 2147483648, %v791_v36  ;;  %vm797_vm2 = vcmp.eq.f32.partialorder %v791_v36, 0.0 }
 0x192   : > { %v790_v37 = vpop.xlane.xlu0 %789 }
 0x193   : > { %v792_v38 = vmax.f32 %v790_v37, 1e-15 }
 0x195   : > { %2790 = vrsqrt.f32 %v792_v38  ;;  %vm802_vm3 = vcmp.eq.f32.partialorder %v792_v38, inf  ;;  %v805_v46 = vand.u32 2147483648, %v792_v38  ;;  %vm804_vm4 = vcmp.eq.f32.partialorder %v792_v38, 0.0 }
 0x19b   : > { %v2789_v39 = vpop.eup %2788 }
 0x19c   : > { %v794_v40 = vmul.f32 %v2789_v39, %v791_v36  ;;  %v3803_v39 = vld [vmem:[%s572_s16] sm:$0xff] }
 0x19e   : > { %v796_v43 = vsel %vm795_vm1, %v791_v36, %v794_v40 }
 0x19f   : > { %v2791_v41 = vpop.eup %2790  ;;  %v799_v45 = vsel %vm797_vm2, %v798_v42, %v796_v43 }
 0x1a0   : > { %v801_v44 = vmul.f32 %v2791_v41, %v792_v38  ;;  %v2329_v48 = vclamps-f32 %v799_v45, 0.9999999 }
 0x1a2   : > { %v803_v47 = vsel %vm802_vm3, %v792_v38, %v801_v44  ;;  %v839_v50 = vsub.f32 1.0, %v2329_v48  ;;  %v837_v53 = vadd.f32 1.0, %v2329_v48 }
 0x1a3   : > { %v806_v49 = vsel %vm804_vm4, %v805_v46, %v803_v47 }
 0x1a4   : > { %v2330_v51 = vclamps-f32 %v806_v49, 0.9999999  ;;  %2792 = vrcp.f32 %v839_v50 }
 0x1a6   : > { %v840_v52 = vsub.f32 1.0, %v2330_v51  ;;  %v838_v55 = vadd.f32 1.0, %v2330_v51 }
 0x1a8   : > { %2794 = vrcp.f32 %v840_v52 }
 0x1ae   : > { %v2793_v54 = vpop.eup %2792 }
 0x1af   : > { %v842_v56 = vmul.f32 %v2793_v54, %v837_v53 }
 0x1b1   : > { %2796 = vlog2.f32 %v842_v56 }
 0x1b2   : > { %v2795_v57 = vpop.eup %2794 }
 0x1b3   : > { %v844_v60 = vmul.f32 %v2795_v57, %v838_v55 }
 0x1bb   : > { %v2797_v63 = vpop.eup %2796 }
 0x1bc   : > { %v846_v2 = vmul.f32 0.6931472, %v2797_v63 }
 0x1be   : > { %v849_v11 = vmul.f32 0.5, %v846_v2 }
 0x1f2   : > { %v3776_v28 = vpop.f32.mrb[0].mxu0 }
 0x1f3   : > { %v3778_v29 = vpop.f32.mrb[1].mxu0  ;;  %v808_v31 = vmul.f32 %v3776_v28, %v3776_v28 }
 0x1f4   : > { %v807_v30 = vmul.f32 %v3778_v29, %v3778_v29 }
 0x1f6   : > { %809 = vadd.xlane.f32.xlu1 %v807_v30 }
 0x1fa   : > { %811 = vadd.xlane.f32.xlu1 %v808_v31 }
 0x1fe   : > { %882 = vadd.xlane.f32.xlu1 %v881_v34 }
 0x283   : > { %v810_v58 = vpop.xlane.xlu1 %809 }
 0x284   : > { %v813_v59 = vmax.f32 %v810_v58, 1e-15 }
 0x286   : > { %2798 = vrsqrt.f32 %v813_v59  ;;  %vm817_vm5 = vcmp.eq.f32.partialorder %v813_v59, inf  ;;  %v820_v4 = vand.u32 2147483648, %v813_v59  ;;  %vm819_vm6 = vcmp.eq.f32.partialorder %v813_v59, 0.0 }
 0x287   : > { %v812_v61 = vpop.xlane.xlu1 %811  ;;  %2800 = vlog2.f32 %v844_v60 }
 0x288   : > { %v814_v62 = vmax.f32 %v812_v61, 1e-15  ;;  %2802 = vrcp.f32 %v799_v45 }
 0x28a   : > { %2804 = vrsqrt.f32 %v814_v62  ;;  %vm824_vm7 = vcmp.eq.f32.partialorder %v814_v62, inf  ;;  %v827_v13 = vand.u32 2147483648, %v814_v62  ;;  %vm826_vm8 = vcmp.eq.f32.partialorder %v814_v62, 0.0 }
 0x28b   : > { %2806 = vrcp.f32 %v806_v49  ;;  %v883_v32 = vpop.xlane.xlu1 %882 }
 0x290   : > { %v2799_v0 = vpop.eup %2798 }
 0x291   : > { %v816_v1 = vmul.f32 %v2799_v0, %v813_v59  ;;  %v2801_v3 = vpop.eup %2800 }
 0x292   : > { %v2803_v5 = vpop.eup %2802  ;;  %v848_v12 = vmul.f32 0.6931472, %v2801_v3 }
 0x293   : > { %v818_v6 = vsel %vm817_vm5, %v813_v59, %v816_v1 }
 0x294   : > { %v2805_v7 = vpop.eup %2804  ;;  %v821_v8 = vsel %vm819_vm6, %v820_v4, %v818_v6  ;;  %v850_v20 = vmul.f32 0.5, %v848_v12 }
 0x295   : > { %v823_v9 = vmul.f32 %v2805_v7, %v814_v62  ;;  %v830_v10 = vmul.f32 %v2803_v5, %v821_v8  ;;  %v2807_v16 = vpop.eup %2806  ;;  %v692_v5 = vld [vmem:[%s572_s16 + $0x8] sm:$0xff]  ;;  %s4216_s16 = sld [smem:[#allocation44_spill]] }
 0x297   : > { %v825_v14 = vsel %vm824_vm7, %v814_v62, %v823_v9  ;;  %v851_v15 = vmul.f32 %v849_v11, %v830_v10  ;;  %v919_v9 = vmul.f32 %v692_v5, %v692_v5 }
 0x298   : > { %v828_v18 = vsel %vm826_vm8, %v827_v13, %v825_v14 }
 0x299   : > { %2808 = vtanh.f32 %v851_v15  ;;  %v832_v19 = vmul.f32 %v2807_v16, %v828_v18 }
 0x29a   : > { %2810 = vrcp.f32 %v821_v8 }
 0x29b   : > { %v852_v21 = vmul.f32 %v850_v20, %v832_v19 }
 0x29d   : > { %2812 = vtanh.f32 %v852_v21 }
 0x29e   : > { %2814 = vrcp.f32 %v828_v18 }
 0x2a3   : > { %v2809_v24 = vpop.eup %2808 }
 0x2a4   : > { %v855_v26 = vmul.f32 %v2809_v24, %v3778_v29  ;;  %v2811_v27 = vpop.eup %2810  ;;  %v918_v29 = vmul.f32 %v3803_v39, %v3803_v39 }
 0x2a6   : > { %v858_v30 = vmul.f32 %v2811_v27, %v855_v26 }
 0x2a7   : > { %v2813_v31 = vpop.eup %2812 }
 0x2a8   : > { %v867_v33 = vmul.f32 %v865_v25, %v858_v30  ;;  %v856_v34 = vmul.f32 %v2813_v31, %v3776_v28  ;;  %v2815_v35 = vpop.eup %2814  ;;  %v873_v37 = vmul.f32 %v858_v30, %v858_v30  ;;  %v891_v28 = vrot.slane %v883_v32, %v3795_v23 }
 0x2aa   : > { %869 = vadd.xlane.f32.xlu0 %v867_v33  ;;  %v860_v36 = vmul.f32 %v2815_v35, %v856_v34 }
 0x2ac   : > { %v868_v38 = vmul.f32 %v865_v25, %v860_v36  ;;  %v874_v40 = vmul.f32 %v860_v36, %v860_v36 }
 0x2ae   : > { %875 = vadd.xlane.f32.xlu0 %v873_v37  ;;  %871 = vadd.xlane.f32.xlu1 %v868_v38 }
 0x2b2   : > { %877 = vadd.xlane.f32.xlu0 %v874_v40 }
 0x2b6   : > { %920 = vadd.xlane.f32.xlu0 %v918_v29 }
 0x337   : > { %v870_v41 = vpop.xlane.xlu0 %869 }
 0x338   : > { %v884_v42 = vmul.f32 2.0, %v870_v41 }
 0x33a   : > { %v886_v45 = vadd.f32 1.0, %v884_v42 }
 0x33b   : > { %v876_v43 = vpop.xlane.xlu0 %875  ;;  %v872_v44 = vpop.xlane.xlu1 %871 }
 0x33c   : > { %v902_v46 = vmul.f32 %v891_v28, %v876_v43  ;;  %v885_v47 = vmul.f32 2.0, %v872_v44  ;;  %v892_v53 = vadd.f32 %v891_v28, %v886_v45  ;;  %v896_v54 = vsub.f32 1.0, %v876_v43 }
 0x33e   : > { %v904_v48 = vadd.f32 %v902_v46, %v886_v45  ;;  %v887_v51 = vadd.f32 1.0, %v885_v47  ;;  %v894_v57 = vmul.f32 %v892_v53, %v858_v30  ;;  %v898_v58 = vmul.f32 %v896_v54, %v865_v25  ;;  %v1048_v45 = vld [vmem:[%s3758_s12 + $0x80] sm:$0xff]  ;;  %v1049_v46 = vld [vmem:[%s3758_s12 + $0x88] sm:$0xff]  ;;  %v1034_v54 = vld [vmem:[%s3758_s12 + $0x10] sm:$0xff] }
 0x33f   : > { %v878_v49 = vpop.xlane.xlu0 %877  ;;  %v2568_v47 = vpack.c.bf16 %v1049_v46, %v1048_v45 }
 0x340   : > { %v906_v50 = vmax.f32 %v904_v48, 1e-15  ;;  %v903_v52 = vmul.f32 %v891_v28, %v878_v49  ;;  %v893_v59 = vadd.f32 %v891_v28, %v887_v51  ;;  %v897_v60 = vsub.f32 1.0, %v878_v49  ;;  %v1032_v48 = vld [vmem:[%s3758_s12] sm:$0xff]  ;;  %v1033_v49 = vld [vmem:[%s3758_s12 + $0x8] sm:$0xff] }
 0x341   : > { %v900_v61 = vadd.f32 %v898_v58, %v894_v57  ;;  %2569 = vmatprep.subr.bf16.mxu1 %v2568_v47  ;;  %v1052_v57 = vld [vmem:[%s3758_s12 + $0xa0] sm:$0xff]  ;;  %v1053_v58 = vld [vmem:[%s3758_s12 + $0xa8] sm:$0xff] }
 0x342   : > { %2816 = vrcp.f32 %v906_v50  ;;  %v905_v55 = vadd.f32 %v903_v52, %v887_v51  ;;  %v895_v63 = vmul.f32 %v893_v59, %v860_v36  ;;  %v899_v0 = vmul.f32 %v897_v60, %v865_v25  ;;  %v1050_v51 = vld [vmem:[%s3758_s12 + $0x90] sm:$0xff]  ;;  %v1051_v52 = vld [vmem:[%s3758_s12 + $0x98] sm:$0xff]  ;;  %v1036_v59 = vld [vmem:[%s3758_s12 + $0x20] sm:$0xff] }
 0x343   : > { %v921_v12 = vpop.xlane.xlu0 %920  ;;  %v2570_v50 = vpack.c.bf16 %v1033_v49, %v1032_v48  ;;  %v2572_v53 = vpack.c.bf16 %v1051_v52, %v1050_v51  ;;  %v2576_v60 = vpack.c.bf16 %v1053_v58, %v1052_v57 }
 0x344   : > { %v907_v56 = vmax.f32 %v905_v55, 1e-15  ;;  %v901_v3 = vadd.f32 %v899_v0, %v895_v63  ;;  %v938_v31 = vsub.f32 1.0, %v921_v12  ;;  %v1035_v55 = vld [vmem:[%s3758_s12 + $0x18] sm:$0xff] }
 0x345   : > { %2571 = vmatpush3.bf16.xpose.msra.mxu1 %v2570_v50  ;;  %v1055_v63 = vld [vmem:[%s3758_s12 + $0xb8] sm:$0xff] }
 0x346   : > { %2818 = vrcp.f32 %v907_v56  ;;  %v2574_v56 = vpack.c.bf16 %v1035_v55, %v1034_v54  ;;  %2573 = vmatprep.subr.bf16.mxu1 %v2572_v53 }
 0x34c   : > { %v2817_v62 = vpop.eup %2816 }
 0x34d   : > { %v909_v1 = vmul.f32 %v2817_v62, %v900_v61  ;;  %2575 = vmatpush3.bf16.xpose.msra.mxu1 %v2574_v56  ;;  %v1037_v61 = vld [vmem:[%s3758_s12 + $0x28] sm:$0xff]  ;;  %v1054_v62 = vld [vmem:[%s3758_s12 + $0xb0] sm:$0xff] }
 0x34e   : > { %v2578_v0 = vpack.c.bf16 %v1037_v61, %v1036_v59  ;;  %2577 = vmatprep.subr.bf16.mxu1 %v2576_v60 }
 0x34f   : > { %v912_v2 = vmul.f32 %v909_v1, %v3803_v39  ;;  %v924_v7 = vmul.f32 %v909_v1, %v909_v1  ;;  %v940_v37 = vmul.f32 %v938_v31, %v909_v1  ;;  %v2580_v1 = vpack.c.bf16 %v1055_v63, %v1054_v62  ;;  %v1047_v31 = vld [vmem:[%s3758_s12 + $0x78] sm:$0xff] }
 0x350   : > { %v2819_v4 = vpop.eup %2818 }
 0x351   : > { %914 = vadd.xlane.f32.xlu1 %v912_v2  ;;  %v911_v6 = vmul.f32 %v2819_v4, %v901_v3  ;;  %v1038_v2 = vld [vmem:[%s3758_s12 + $0x30] sm:$0xff]  ;;  %v1039_v3 = vld [vmem:[%s3758_s12 + $0x38] sm:$0xff]  ;;  %v1056_v4 = vld [vmem:[%s3758_s12 + $0xc0] sm:$0xff] }
 0x353   : > { %v913_v8 = vmul.f32 %v911_v6, %v692_v5  ;;  %v925_v10 = vmul.f32 %v911_v6, %v911_v6 }
 0x355   : > { %926 = vadd.xlane.f32.xlu1 %v924_v7  ;;  %916 = vadd.xlane.f32.xlu0 %v913_v8  ;;  %v1040_v8 = vld [vmem:[%s3758_s12 + $0x40] sm:$0xff] }
 0x356   : > { %2579 = vmatpush3.bf16.xpose.msra.mxu1 %v2578_v0 }
 0x357   : > { %2581 = vmatprep.subr.bf16.mxu1 %v2580_v1 }
 0x359   : > { %922 = vadd.xlane.f32.xlu1 %v919_v9  ;;  %928 = vadd.xlane.f32.xlu0 %v925_v10  ;;  %v1041_v9 = vld [vmem:[%s3758_s12 + $0x48] sm:$0xff]  ;;  %v1058_v10 = vld [vmem:[%s3758_s12 + $0xd0] sm:$0xff] }
 0x3de   : > { %v915_v11 = vpop.xlane.xlu1 %914 }
 0x3df   : > { %v930_v13 = vmul.f32 2.0, %v915_v11  ;;  %v1059_v11 = vld [vmem:[%s3758_s12 + $0xd8] sm:$0xff] }
 0x3e1   : > { %v932_v15 = vadd.f32 1.0, %v930_v13  ;;  %v2588_v13 = vpack.c.bf16 %v1059_v11, %v1058_v10 }
 0x3e2   : > { %v927_v14 = vpop.xlane.xlu1 %926  ;;  %v917_v16 = vpop.xlane.xlu0 %916 }
 0x3e3   : > { %v944_v17 = vmul.f32 %v927_v14, %v921_v12  ;;  %v931_v18 = vmul.f32 2.0, %v917_v16  ;;  %v934_v27 = vadd.f32 %v932_v15, %v927_v14  ;;  %v2586_v12 = vpack.c.bf16 %v1041_v9, %v1040_v8  ;;  %v1042_v14 = vld [vmem:[%s3758_s12 + $0x50] sm:$0xff]  ;;  %v1060_v16 = vld [vmem:[%s3758_s12 + $0xe0] sm:$0xff] }
 0x3e5   : > { %v946_v19 = vadd.f32 %v944_v17, %v932_v15  ;;  %v933_v25 = vadd.f32 1.0, %v931_v18  ;;  %v936_v34 = vmul.f32 %v934_v27, %v3803_v39  ;;  %v1043_v15 = vld [vmem:[%s3758_s12 + $0x58] sm:$0xff]  ;;  %v1061_v17 = vld [vmem:[%s3758_s12 + $0xe8] sm:$0xff] }
 0x3e6   : > { %v923_v20 = vpop.xlane.xlu1 %922  ;;  %v929_v24 = vpop.xlane.xlu0 %928  ;;  %v2590_v18 = vpack.c.bf16 %v1043_v15, %v1042_v14 }
 0x3e7   : > { %v948_v21 = vmax.f32 %v946_v19, 1e-15  ;;  %v945_v26 = vmul.f32 %v929_v24, %v923_v20  ;;  %v935_v35 = vadd.f32 %v933_v25, %v929_v24  ;;  %v939_v36 = vsub.f32 1.0, %v923_v20  ;;  %v1044_v20 = vld [vmem:[%s3758_s12 + $0x60] sm:$0xff]  ;;  %v1062_v24 = vld [vmem:[%s3758_s12 + $0xf0] sm:$0xff] }
 0x3e8   : > { %v942_v38 = vadd.f32 %v940_v37, %v936_v34  ;;  %v2592_v19 = vpack.c.bf16 %v1061_v17, %v1060_v16 }
 0x3e9   : > { %2820 = vrcp.f32 %v948_v21  ;;  %v947_v30 = vadd.f32 %v945_v26, %v933_v25  ;;  %v937_v29 = vmul.f32 %v935_v35, %v692_v5  ;;  %v941_v32 = vmul.f32 %v939_v36, %v911_v6  ;;  %v1057_v5 = vld [vmem:[%s3758_s12 + $0xc8] sm:$0xff]  ;;  %v1063_v25 = vld [vmem:[%s3758_s12 + $0xf8] sm:$0xff] }
 0x3ea   : > { %v2582_v6 = vpack.c.bf16 %v1039_v3, %v1038_v2  ;;  %v2584_v7 = vpack.c.bf16 %v1057_v5, %v1056_v4  ;;  %v1045_v21 = vld [vmem:[%s3758_s12 + $0x68] sm:$0xff]  ;;  %v2596_v27 = vpack.c.bf16 %v1063_v25, %v1062_v24  ;;  %v1406_v25 = vld [vmem:[%s3760_s29] sm:$0xff] }
 0x3eb   : > { %v949_v33 = vmax.f32 %v947_v30, 1e-15  ;;  %v943_v39 = vadd.f32 %v941_v32, %v937_v29  ;;  %v2594_v26 = vpack.c.bf16 %v1045_v21, %v1044_v20  ;;  %v1046_v30 = vld [vmem:[%s3758_s12 + $0x70] sm:$0xff]  ;;  %v1422_v20 = vld [vmem:[%s3760_s29 + $0x80] sm:$0xff]  ;;  %v1423_v21 = vld [vmem:[%s3760_s29 + $0x88] sm:$0xff] }
 0x3ec   : > { %2583 = vmatpush3.bf16.xpose.msra.mxu1 %v2582_v6  ;;  %v2600_v24 = vpack.c.bf16 %v1423_v21, %v1422_v20 }
 0x3ed   : > { %2822 = vrcp.f32 %v949_v33  ;;  %2585 = vmatprep.subr.bf16.mxu1 %v2584_v7  ;;  %v2598_v33 = vpack.c.bf16 %v1047_v31, %v1046_v30  ;;  %v1424_v30 = vld [vmem:[%s3760_s29 + $0x90] sm:$0xff]  ;;  %v1425_v31 = vld [vmem:[%s3760_s29 + $0x98] sm:$0xff] }
 0x3ee   : > { %2601 = vmatprep.subr.bf16.mxu0 %v2600_v24 }
 0x3f3   : > { %v2821_v40 = vpop.eup %2820 }
 0x3f4   : > { %v3812_v41 = vmul.f32 %v2821_v40, %v942_v38  ;;  %2587 = vmatpush3.bf16.xpose.msra.mxu1 %v2586_v12 }
 0x3f5   : > { %2589 = vmatprep.subr.bf16.mxu1 %v2588_v13  ;;  %v3324_v13 = vmov 0  }
 0x3f6   : > { %v954_v42 = vmul.f32 %v3812_v41, %v3812_v41  ;;  %2786 = vset.pattern.permute.xlu0 %v3324_v13  ;;  %2787 = vset.pattern.permute.xlu1 %v3324_v13  ;;  %v1144_v13 = vsub.s32 1, %v3792_v22 }
 0x3f7   : > { %v2823_v28 = vpop.eup %2822 }
 0x3f8   : > { %956 = vadd.xlane.f32.xlu1 %v954_v42  ;;  %v3816_v43 = vmul.f32 %v2823_v28, %v943_v39 }
 0x3fa   : > { %v955_v44 = vmul.f32 %v3816_v43, %v3816_v43 }
 0x3fc   : > { %958 = vadd.xlane.f32.xlu0 %v955_v44  ;;  %2591 = vmatpush3.bf16.xpose.msra.mxu1 %v2590_v18 }
 0x3fd   : > { %2593 = vmatprep.subr.bf16.mxu1 %v2592_v19 }
 0x404   : > { %2595 = vmatpush3.bf16.xpose.msra.mxu1 %v2594_v26  ;;  %v1407_v26 = vld [vmem:[%s3760_s29 + $0x8] sm:$0xff] }
 0x405   : > { %2597 = vmatprep.subr.bf16.mxu1 %v2596_v27  ;;  %v2602_v27 = vpack.c.bf16 %v1407_v26, %v1406_v25 }
 0x407   : > { %2603 = vmatpush3.bf16.msra.mxu0 %v2602_v27 }
 0x40c   : > { %2599 = vmatpush3.bf16.xpose.msra.mxu1 %v2598_v33  ;;  %v2604_v33 = vpack.c.bf16 %v1425_v31, %v1424_v30 }
 0x40e   : > { %2605 = vmatprep.subr.bf16.mxu0 %v2604_v33 }
 0x485   : > { %v957_v34 = vpop.xlane.xlu1 %956 }
 0x486   : > { %v960_v35 = vmax.f32 %v957_v34, 1e-15  ;;  %v1408_v34 = vld [vmem:[%s3760_s29 + $0x10] sm:$0xff] }
 0x488   : > { %2824 = vrsqrt.f32 %v960_v35  ;;  %vm964_vm9 = vcmp.eq.f32.partialorder %v960_v35, inf  ;;  %v967_v29 = vand.u32 2147483648, %v960_v35  ;;  %vm966_vm10 = vcmp.eq.f32.partialorder %v960_v35, 0.0 }
 0x489   : > { %v959_v36 = vpop.xlane.xlu0 %958 }
 0x48a   : > { %v961_v37 = vmax.f32 %v959_v36, 1e-15 }
 0x48c   : > { %2826 = vrsqrt.f32 %v961_v37  ;;  %vm971_vm11 = vcmp.eq.f32.partialorder %v961_v37, inf  ;;  %v974_v45 = vand.u32 2147483648, %v961_v37  ;;  %vm973_vm12 = vcmp.eq.f32.partialorder %v961_v37, 0.0 }
 0x492   : > { %v2825_v38 = vpop.eup %2824 }
 0x493   : > { %v963_v40 = vmul.f32 %v2825_v38, %v960_v35 }
 0x495   : > { %v965_v32 = vsel %vm964_vm9, %v960_v35, %v963_v40  ;;  %v1409_v35 = vld [vmem:[%s3760_s29 + $0x18] sm:$0xff]  ;;  %v1426_v40 = vld [vmem:[%s3760_s29 + $0xa0] sm:$0xff] }
 0x496   : > { %v968_v42 = vsel %vm966_vm10, %v967_v29, %v965_v32  ;;  %v2827_v39 = vpop.eup %2826  ;;  %v1427_v29 = vld [vmem:[%s3760_s29 + $0xa8] sm:$0xff] }
 0x497   : > { %v2331_v28 = vclamps-f32 %v968_v42, 0.9999999  ;;  %v970_v44 = vmul.f32 %v2827_v39, %v961_v37  ;;  %v2608_v32 = vpack.c.bf16 %v1427_v29, %v1426_v40  ;;  %v1411_v39 = vld [vmem:[%s3760_s29 + $0x28] sm:$0xff] }
 0x499   : > { %v982_v46 = vsub.f32 1.0, %v2331_v28  ;;  %v972_v47 = vsel %vm971_vm11, %v961_v37, %v970_v44  ;;  %v980_v51 = vadd.f32 1.0, %v2331_v28  ;;  %v2606_v37 = vpack.c.bf16 %v1409_v35, %v1408_v34 }
 0x49a   : > { %v975_v48 = vsel %vm973_vm12, %v974_v45, %v972_v47  ;;  %v1429_v47 = vld [vmem:[%s3760_s29 + $0xb8] sm:$0xff] }
 0x49b   : > { %2828 = vrcp.f32 %v982_v46  ;;  %v2332_v49 = vclamps-f32 %v975_v48, 0.9999999  ;;  %2607 = vmatpush3.bf16.msra.mxu0 %v2606_v37  ;;  %v1428_v46 = vld [vmem:[%s3760_s29 + $0xb0] sm:$0xff] }
 0x49c   : > { %2609 = vmatprep.subr.bf16.mxu0 %v2608_v32 }
 0x49d   : > { %v983_v50 = vsub.f32 1.0, %v2332_v49  ;;  %v981_v54 = vadd.f32 1.0, %v2332_v49  ;;  %v1412_v49 = vld [vmem:[%s3760_s29 + $0x30] sm:$0xff] }
 0x49f   : > { %2830 = vrcp.f32 %v983_v50  ;;  %v1413_v50 = vld [vmem:[%s3760_s29 + $0x38] sm:$0xff] }
 0x4a5   : > { %v2829_v52 = vpop.eup %2828 }
 0x4a6   : > { %v985_v53 = vmul.f32 %v2829_v52, %v980_v51  ;;  %v2614_v51 = vpack.c.bf16 %v1413_v50, %v1412_v49  ;;  %v1430_v52 = vld [vmem:[%s3760_s29 + $0xc0] sm:$0xff] }
 0x4a8   : > { %2832 = vlog2.f32 %v985_v53  ;;  %v1431_v53 = vld [vmem:[%s3760_s29 + $0xc8] sm:$0xff] }
 0x4a9   : > { %v2831_v55 = vpop.eup %2830 }
 0x4aa   : > { %v987_v56 = vmul.f32 %v2831_v55, %v981_v54  ;;  %v2616_v54 = vpack.c.bf16 %v1431_v53, %v1430_v52  ;;  %v1414_v55 = vld [vmem:[%s3760_s29 + $0x40] sm:$0xff] }
 0x4ac   : > { %2834 = vlog2.f32 %v987_v56  ;;  %v1415_v56 = vld [vmem:[%s3760_s29 + $0x48] sm:$0xff] }
 0x4b2   : > { %v2833_v57 = vpop.eup %2832 }
 0x4b3   : > { %v989_v58 = vmul.f32 0.6931472, %v2833_v57  ;;  %v2618_v57 = vpack.c.bf16 %v1415_v56, %v1414_v55 }
 0x4b5   : > { %v992_v59 = vmul.f32 0.5, %v989_v58  ;;  %v1432_v58 = vld [vmem:[%s3760_s29 + $0xd0] sm:$0xff] }
 0x4b6   : > { %v2835_v60 = vpop.eup %2834 }
 0x4b7   : > { %v994_v61 = vmul.f32 0.70710677, %v992_v59  ;;  %v991_v62 = vmul.f32 0.6931472, %v2835_v60  ;;  %v1433_v59 = vld [vmem:[%s3760_s29 + $0xd8] sm:$0xff] }
 0x4b8   : > { %v2620_v60 = vpack.c.bf16 %v1433_v59, %v1432_v58 }
 0x4b9   : > { %2836 = vtanh.f32 %v994_v61  ;;  %v993_v63 = vmul.f32 0.5, %v991_v62  ;;  %v1416_v61 = vld [vmem:[%s3760_s29 + $0x50] sm:$0xff]  ;;  %v1417_v62 = vld [vmem:[%s3760_s29 + $0x58] sm:$0xff] }
 0x4ba   : > { %2838 = vrcp.f32 %v968_v42  ;;  %v1410_v42 = vld [vmem:[%s3760_s29 + $0x20] sm:$0xff] }
 0x4bb   : > { %v995_v0 = vmul.f32 0.70710677, %v993_v63  ;;  %v2610_v28 = vpack.c.bf16 %v1411_v39, %v1410_v42  ;;  %v2622_v63 = vpack.c.bf16 %v1417_v62, %v1416_v61 }
 0x4bd   : > { %2840 = vtanh.f32 %v995_v0  ;;  %2611 = vmatpush3.bf16.msra.mxu0 %v2610_v28  ;;  %v1434_v0 = vld [vmem:[%s3760_s29 + $0xe0] sm:$0xff] }
 0x4be   : > { %2842 = vrcp.f32 %v975_v48  ;;  %v2612_v48 = vpack.c.bf16 %v1429_v47, %v1428_v46 }
 0x4c0   : > { %2613 = vmatprep.subr.bf16.mxu0 %v2612_v48 }
 0x4c1   : > { %2615 = vmatpush3.bf16.msra.mxu0 %v2614_v51 }
 0x4c2   : > { %2617 = vmatprep.subr.bf16.mxu0 %v2616_v54 }
 0x4c3   : > { %v2837_v1 = vpop.eup %2836 }
 0x4c4   : > { %v998_v2 = vmul.f32 %v2837_v1, %v3812_v41  ;;  %v2839_v3 = vpop.eup %2838  ;;  %v1435_v1 = vld [vmem:[%s3760_s29 + $0xe8] sm:$0xff] }
 0x4c5   : > { %2619 = vmatpush3.bf16.msra.mxu0 %v2618_v57 }
 0x4c6   : > { %v1001_v4 = vmul.f32 %v2839_v3, %v998_v2  ;;  %2621 = vmatprep.subr.bf16.mxu0 %v2620_v60  ;;  %v2624_v2 = vpack.c.bf16 %v1435_v1, %v1434_v0  ;;  %v1418_v3 = vld [vmem:[%s3760_s29 + $0x60] sm:$0xff] }
 0x4c7   : > { %v2841_v5 = vpop.eup %2840 }
 0x4c8   : > { %v1013_v6 = vmul.f32 -2.0, %v1001_v4  ;;  %v1004_v7 = vmul.f32 %v1001_v4, %v1001_v4  ;;  %v999_v8 = vmul.f32 %v2841_v5, %v3816_v43  ;;  %v2843_v9 = vpop.eup %2842  ;;  %v1419_v4 = vld [vmem:[%s3760_s29 + $0x68] sm:$0xff] }
 0x4c9   : > { %2623 = vmatpush3.bf16.msra.mxu0 %v2622_v63  ;;  %v2626_v5 = vpack.c.bf16 %v1419_v4, %v1418_v3 }
 0x4ca   : > { %2406 = vmatprep.mubr.f32.mxu1 %v1013_v6  ;;  %1006 = vadd.xlane.f32.xlu1 %v1004_v7  ;;  %v1003_v10 = vmul.f32 %v2843_v9, %v999_v8  ;;  %v1437_v7 = vld [vmem:[%s3760_s29 + $0xf8] sm:$0xff]  ;;  %v1420_v8 = vld [vmem:[%s3760_s29 + $0x70] sm:$0xff] }
 0x4cb   : > { %2407 = vmatmul.mubr.f32.vlgmr.msra.gmra.mrb[0].mxu1 %v1013_v6  ;;  %2625 = vmatprep.subr.bf16.mxu0 %v2624_v2  ;;  %v1436_v6 = vld [vmem:[%s3760_s29 + $0xf0] sm:$0xff] }
 0x4cc   : > { %v1005_v11 = vmul.f32 %v1003_v10, %v1003_v10  ;;  %v1014_v12 = vmul.f32 -2.0, %v1003_v10  ;;  %v2628_v9 = vpack.c.bf16 %v1437_v7, %v1436_v6  ;;  %v1421_v10 = vld [vmem:[%s3760_s29 + $0x78] sm:$0xff] }
 0x4cd   : > { %2627 = vmatpush3.bf16.msra.mxu0 %v2626_v5 }
 0x4ce   : > { %1008 = vadd.xlane.f32.xlu0 %v1005_v11  ;;  %2408 = vmatprep.mubr.f32.mxu1 %v1014_v12  ;;  %v2630_v11 = vpack.c.bf16 %v1421_v10, %v1420_v8 }
 0x4cf   : > { %2409 = vmatmul.mubr.f32.gmra.mrb[2].mxu1 %v1014_v12  ;;  %2629 = vmatprep.subr.bf16.mxu0 %v2628_v9  ;;  %v3325_v12 = vmov 0.0  }
 0x4d0   : > { %1017 = vst.msk [vmem:[#allocation5] sm:$0xff] %vm1010_vm13, %v3325_v12  ;;  %1018 = vst.msk [vmem:[#allocation5 + $0x8] sm:$0xff] %vm1010_vm13, %v3325_v12 }
 0x4d1   : > { %2631 = vmatpush3.bf16.msra.mxu0 %v2630_v11  ;;  %1019 = vst.msk [vmem:[#allocation7] sm:$0xff] %vm1010_vm13, %v3325_v12  ;;  %1020 = vst.msk [vmem:[#allocation7 + $0x8] sm:$0xff] %vm1010_vm13, %v3325_v12 }
 0x557   : > { %v1007_v41 = vpop.xlane.xlu1 %1006 }
 0x558   : > { %1011 = vst.msk [vmem:[#allocation3] sm:$0xff] %vm1010_vm13, %v1007_v41  ;;  %v1148_v41 = vsub.s32 5, %v3792_v22 }
 0x55b   : > { %v1009_v43 = vpop.xlane.xlu0 %1008 }
 0x55c   : > { %1012 = vst.msk [vmem:[#allocation3 + $0x8] sm:$0xff] %vm1010_vm13, %v1009_v43  ;;  %v3907_v43 = vld [vmem:[%s681_s15] sm:$0xff]  ;;  %s3185_s15 = scalar_lea.vmem %s3184_s30, 1024 }
 0x55d   : > { %v1181_v26 = vrot.slane %v3907_v43, %v3795_v23 }
 0x55f   : > { %v1024_v14 = vld [vmem:[#allocation3] sm:$0xff]  ;;  %v1191_v37 = vrot.slane %v1181_v26, %v3795_v23 }
 0x560   : > { %1206 = vperm.xlu0 %2786, %v1024_v14   ;;  %v1026_v17 = vsub.f32 1.0, %v1024_v14  ;;  %v1145_v14 = vrot.slane %v3907_v43, %v1144_v13 }
 0x562   : > { %v1028_v18 = vmul.f32 %v1026_v17, %v1026_v17 }
 0x563   : > { %v1025_v15 = vld [vmem:[#allocation3 + $0x8] sm:$0xff] }
 0x564   : > { %1211 = vperm.xlu1 %2787, %v1025_v15   ;;  %v1027_v16 = vsub.f32 1.0, %v1025_v15  ;;  %v1149_v15 = vrot.slane %v3907_v43, %v1148_v41 }
 0x566   : > { %v1029_v19 = vmul.f32 %v1027_v16, %v1027_v16 }
 0x568   : > { %1171 = vperm.xlu1 %2787, %v1027_v16   ;;  %v1155_v16 = vrot.slane %v1145_v14, %v1144_v13 }
 0x56c   : > { %1166 = vperm.xlu1 %2787, %v1026_v17   ;;  %v1159_v17 = vrot.slane %v1149_v15, %v1144_v13 }
 0x570   : > { %1232 = vperm.xlu1 %2787, %v1028_v18  }
 0x574   : > { %1237 = vperm.xlu1 %2787, %v1029_v19   ;;  %v1184_v19 = vsub.s32 4, %v3792_v22 }
 0x576   : > { %v1185_v31 = vrot.slane %v3907_v43, %v1184_v19 }
 0x578   : > { %v1195_v28 = vrot.slane %v1185_v31, %v3795_v23 }
 0x59e   : > { %v3864_v36 = vpop.f32.mrb[0].mxu1 }
 0x59f   : > { %v3866_v38 = vpop.f32.mrb[1].mxu1  ;;  %v1160_v21 = vadd.f32 %v1155_v16, %v3864_v36 }
 0x5a0   : > { %v1161_v24 = vadd.f32 %v1159_v17, %v3866_v38 }
 0x5a2   : > { %v3872_v44 = vpop.f32.mrb[2].mxu1 }
 0x5a3   : > { %v3874_v45 = vpop.f32.mrb[3].mxu1  ;;  %v1162_v33 = vadd.f32 %v1155_v16, %v3872_v44 }
 0x5a4   : > { %v1163_v35 = vadd.f32 %v1159_v17, %v3874_v45 }
 0x5df   : > { %v1207_v20 = vpop.permute.xlu0 %1206 }
 0x5e0   : > { %v1214_v27 = vmul.f32 %v1207_v20, %v1160_v21  ;;  %v1215_v30 = vmul.f32 %v1207_v20, %v1161_v24 }
 0x5e2   : > { %v1218_v32 = vmul.f32 %v1214_v27, %v1160_v21  ;;  %v1219_v42 = vmul.f32 %v1215_v30, %v1161_v24 }
 0x5e3   : > { %v1212_v18 = vpop.permute.xlu1 %1211 }
 0x5e4   : > { %v1216_v50 = vmul.f32 %v1212_v18, %v1162_v33  ;;  %v1217_v51 = vmul.f32 %v1212_v18, %v1163_v35 }
 0x5e6   : > { %v1220_v63 = vmul.f32 %v1216_v50, %v1162_v33  ;;  %v1221_v0 = vmul.f32 %v1217_v51, %v1163_v35 }
 0x5e7   : > { %v1172_v25 = vpop.permute.xlu1 %1171 }
 0x5e8   : > { %v1176_v39 = vmul.f32 %v1172_v25, %v1162_v33  ;;  %v1177_v46 = vmul.f32 %v1172_v25, %v1163_v35  ;;  %v1199_v5 = vmul.f32 %v1195_v28, %v1172_v25 }
 0x5ea   : > { %v1224_v58 = vmul.f32 %v1176_v39, %v3872_v44  ;;  %v1225_v62 = vmul.f32 %v1177_v46, %v3874_v45  ;;  %v1203_v45 = vsub.f32 %v1163_v35, %v1199_v5  ;;  %v1332_v5 = vsub.s32 6, %v3792_v22 }
 0x5eb   : > { %v1167_v34 = vpop.permute.xlu1 %1166 }
 0x5ec   : > { %v1174_v40 = vmul.f32 %v1167_v34, %v1160_v21  ;;  %v1175_v29 = vmul.f32 %v1167_v34, %v1161_v24  ;;  %v1196_v47 = vmul.f32 %v1191_v37, %v1167_v34  ;;  %v1197_v52 = vmul.f32 %v1195_v28, %v1167_v34 }
 0x5ed   : > { %v1228_v8 = vadd.f32 %v1224_v58, %v1220_v63  ;;  %v1229_v9 = vadd.f32 %v1225_v62, %v1221_v0  ;;  %v1283_v15 = vmax.f32 %v1203_v45, 1e-15 }
 0x5ee   : > { %v1222_v48 = vmul.f32 %v1174_v40, %v3864_v36  ;;  %v1223_v49 = vmul.f32 %v1175_v29, %v3866_v38  ;;  %v1200_v59 = vsub.f32 %v1160_v21, %v1196_v47  ;;  %v1201_v36 = vsub.f32 %v1161_v24, %v1197_v52 }
 0x5ef   : > { %v1233_v53 = vpop.permute.xlu1 %1232  ;;  %v1198_v38 = vmul.f32 %v1191_v37, %v1172_v25 }
 0x5f0   : > { %v1226_v54 = vadd.f32 %v1222_v48, %v1218_v32  ;;  %v1227_v55 = vadd.f32 %v1223_v49, %v1219_v42  ;;  %v1240_v56 = vmul.f32 %v1233_v53, %v1191_v37  ;;  %v1241_v57 = vmul.f32 %v1233_v53, %v1195_v28 }
 0x5f1   : > { %v1280_v7 = vmax.f32 %v1200_v59, 1e-15  ;;  %v1281_v44 = vmax.f32 %v1201_v36, 1e-15  ;;  %v1202_v10 = vsub.f32 %v1162_v33, %v1198_v38 }
 0x5f2   : > { %v1244_v60 = vadd.f32 %v1240_v56, %v1226_v54  ;;  %v1245_v61 = vadd.f32 %v1241_v57, %v1227_v55 }
 0x5f3   : > { %v1238_v1 = vpop.permute.xlu1 %1237  ;;  %v1282_v14 = vmax.f32 %v1202_v10, 1e-15  ;;  %v1321_v10 = vstv %s1296_s23 }
 0x5f4   : > { %v1248_v2 = vmax.f32 %v1244_v60, 0.0  ;;  %v1249_v3 = vmax.f32 %v1245_v61, 0.0  ;;  %v1242_v4 = vmul.f32 %v1238_v1, %v1191_v37  ;;  %v1243_v6 = vmul.f32 %v1238_v1, %v1195_v28 }
 0x5f6   : > { %2844 = vrsqrt.f32 %v1248_v2  ;;  %v1246_v11 = vadd.f32 %v1242_v4, %v1228_v8  ;;  %v1247_v12 = vadd.f32 %v1243_v6, %v1229_v9  ;;  %vm1254_vm14 = vcmp.eq.f32.partialorder %v1248_v2, inf }
 0x5f7   : > { %2846 = vrsqrt.f32 %v1249_v3  ;;  %v1257_v19 = vand.u32 2147483648, %v1248_v2  ;;  %vm1256_vm15 = vcmp.eq.f32.partialorder %v1248_v2, 0.0  ;;  %vm1261_vm1 = vcmp.eq.f32.partialorder %v1249_v3, inf }
 0x5f8   : > { %2848 = vrcp.f32 %v1280_v7  ;;  %v1250_v13 = vmax.f32 %v1246_v11, 0.0  ;;  %v1251_v41 = vmax.f32 %v1247_v12, 0.0  ;;  %v1264_v24 = vand.u32 2147483648, %v1249_v3 }
 0x5f9   : > { %2850 = vrcp.f32 %v1281_v44  ;;  %vm1263_vm2 = vcmp.eq.f32.partialorder %v1249_v3, 0.0  ;;  %v1333_v9 = vrot.slane %v3907_v43, %v1332_v5 }
 0x5fa   : > { %2852 = vrsqrt.f32 %v1250_v13  ;;  %vm1268_vm3 = vcmp.eq.f32.partialorder %v1250_v13, inf  ;;  %vm1270_vm4 = vcmp.eq.f32.partialorder %v1250_v13, 0.0  ;;  %v1271_v42 = vand.u32 2147483648, %v1250_v13 }
 0x5fb   : > { %2854 = vrsqrt.f32 %v1251_v41  ;;  %vm1275_vm5 = vcmp.eq.f32.partialorder %v1251_v41, inf  ;;  %v1278_v47 = vand.u32 2147483648, %v1251_v41  ;;  %vm1277_vm6 = vcmp.eq.f32.partialorder %v1251_v41, 0.0 }
 0x5fc   : > { %2856 = vrcp.f32 %v1282_v14 }
 0x5fd   : > { %2858 = vrcp.f32 %v1283_v15 }
 0x600   : > { %v2845_v16 = vpop.eup %2844 }
 0x601   : > { %v2847_v17 = vpop.eup %2846  ;;  %v1253_v18 = vmul.f32 %v2845_v16, %v1248_v2 }
 0x602   : > { %v1260_v20 = vmul.f32 %v2847_v17, %v1249_v3  ;;  %v2849_v25 = vpop.eup %2848 }
 0x603   : > { %v1255_v21 = vsel %vm1254_vm14, %v1248_v2, %v1253_v18  ;;  %v2851_v30 = vpop.eup %2850  ;;  %v1328_v2 = vsub.s32 2, %v3792_v22 }
 0x604   : > { %v1258_v26 = vsel %vm1256_vm15, %v1257_v19, %v1255_v21  ;;  %v1262_v27 = vsel %vm1261_vm1, %v1249_v3, %v1260_v20  ;;  %v2853_v34 = vpop.eup %2852 }
 0x605   : > { %v1265_v31 = vsel %vm1263_vm2, %v1264_v24, %v1262_v27  ;;  %v1288_v33 = vmul.f32 %v2849_v25, %v1258_v26  ;;  %v2855_v37 = vpop.eup %2854  ;;  %v1267_v29 = vmul.f32 %v2853_v34, %v1250_v13  ;;  %v1329_v8 = vrot.slane %v3907_v43, %v1328_v2 }
 0x606   : > { %v1289_v35 = vmul.f32 %v2851_v30, %v1265_v31  ;;  %v1274_v39 = vmul.f32 %v2855_v37, %v1251_v41  ;;  %v2857_v48 = vpop.eup %2856  ;;  %v1374_v27 = vsub.s32 3, %v3792_v22  ;;  %v1378_v30 = vsub.s32 7, %v3792_v22 }
 0x607   : > { %v1292_v40 = vmin.f32 %v1288_v33, 0.9999999  ;;  %v1269_v46 = vsel %vm1268_vm3, %v1250_v13, %v1267_v29  ;;  %v2859_v52 = vpop.eup %2858  ;;  %v1339_v45 = vrot.slane %v1329_v8, %v1328_v2 }
 0x608   : > { %v1293_v32 = vmin.f32 %v1289_v35, 0.9999999  ;;  %v1272_v50 = vsel %vm1270_vm4, %v1271_v42, %v1269_v46  ;;  %v1276_v51 = vsel %vm1275_vm5, %v1251_v41, %v1274_v39  ;;  %v1343_v41 = vrot.slane %v1333_v9, %v1328_v2 }
 0x609   : > { %v1301_v28 = vadd.f32 1.0, %v1292_v40  ;;  %v1279_v53 = vsel %vm1277_vm6, %v1278_v47, %v1276_v51  ;;  %v1290_v54 = vmul.f32 %v2857_v48, %v1272_v50  ;;  %v1297_v60 = vsub.f32 1.0, %v1292_v40 }
 0x60a   : > { %v1302_v49 = vadd.f32 1.0, %v1293_v32  ;;  %v1291_v55 = vmul.f32 %v2859_v52, %v1279_v53  ;;  %v1298_v62 = vsub.f32 1.0, %v1293_v32  ;;  %v1375_v37 = vrot.slane %v3907_v43, %v1374_v27 }
 0x60b   : > { %2860 = vrcp.f32 %v1301_v28  ;;  %v1294_v56 = vmin.f32 %v1290_v54, 0.9999999  ;;  %v1379_v40 = vrot.slane %v3907_v43, %v1378_v30  ;;  %v1357_v54 = vld [vmem:[#allocation5] sm:$0xff] }
 0x60c   : > { %2862 = vrcp.f32 %v1302_v49  ;;  %v1295_v57 = vmin.f32 %v1291_v55, 0.9999999  ;;  %v1385_v32 = vrot.slane %v1375_v37, %v1374_v27 }
 0x60d   : > { %v1303_v58 = vadd.f32 1.0, %v1294_v56  ;;  %v1299_v1 = vsub.f32 1.0, %v1294_v56  ;;  %v1389_v42 = vrot.slane %v1379_v40, %v1374_v27 }
 0x60e   : > { %v1304_v59 = vadd.f32 1.0, %v1295_v57  ;;  %v1300_v3 = vsub.f32 1.0, %v1295_v57  ;;  %v1370_v57 = vld [vmem:[#allocation7] sm:$0xff] }
 0x60f   : > { %2864 = vrcp.f32 %v1303_v58  ;;  %v1358_v58 = vld [vmem:[#allocation5 + $0x8] sm:$0xff] }
 0x610   : > { %2866 = vrcp.f32 %v1304_v59 }
 0x615   : > { %v2861_v61 = vpop.eup %2860 }
 0x616   : > { %v2863_v63 = vpop.eup %2862  ;;  %v1309_v0 = vmul.f32 %v2861_v61, %v1297_v60 }
 0x617   : > { %v1310_v36 = vmul.f32 %v2863_v63, %v1298_v62  ;;  %v1371_v62 = vld [vmem:[#allocation7 + $0x8] sm:$0xff] }
 0x618   : > { %2868 = vlog2.f32 %v1309_v0 }
 0x619   : > { %2870 = vlog2.f32 %v1310_v36  ;;  %v2865_v38 = vpop.eup %2864 }
 0x61a   : > { %v2867_v4 = vpop.eup %2866  ;;  %v1311_v6 = vmul.f32 %v2865_v38, %v1299_v1 }
 0x61b   : > { %v1312_v7 = vmul.f32 %v2867_v4, %v1300_v3 }
 0x61c   : > { %2872 = vlog2.f32 %v1311_v6 }
 0x61d   : > { %2874 = vlog2.f32 %v1312_v7 }
 0x622   : > { %v2869_v44 = vpop.eup %2868 }
 0x623   : > { %v2871_v11 = vpop.eup %2870  ;;  %v1314_v12 = vmul.f32 0.6931472, %v2869_v44  ;;  %v3326_v44 = vmov -1.0  }
 0x624   : > { %v1316_v13 = vmul.f32 0.6931472, %v2871_v11 }
 0x625   : > { %v1322_v14 = vmul.f32 %v1321_v10, %v1314_v12 }
 0x626   : > { %v1323_v15 = vmul.f32 %v1321_v10, %v1316_v13  ;;  %v2873_v17 = vpop.eup %2872 }
 0x627   : > { %v1344_v16 = vadd.f32 %v1339_v45, %v1322_v14  ;;  %v2875_v19 = vpop.eup %2874  ;;  %v1318_v21 = vmul.f32 0.6931472, %v2873_v17 }
 0x628   : > { %v1345_v18 = vadd.f32 %v1343_v41, %v1323_v15  ;;  %v1320_v25 = vmul.f32 0.6931472, %v2875_v19 }
 0x629   : > { %v1349_v20 = vmul.f32 1.442695, %v1344_v16  ;;  %v1324_v26 = vmul.f32 %v1321_v10, %v1318_v21 }
 0x62a   : > { %v1351_v24 = vmul.f32 1.442695, %v1345_v18  ;;  %v1325_v31 = vmul.f32 %v1321_v10, %v1320_v25 }
 0x62b   : > { %2876 = vpow2.f32 %v1349_v20  ;;  %v1346_v33 = vadd.f32 %v1339_v45, %v1324_v26 }
 0x62c   : > { %2878 = vpow2.f32 %v1351_v24  ;;  %v1347_v34 = vadd.f32 %v1343_v41, %v1325_v31 }
 0x62d   : > { %v1353_v35 = vmul.f32 1.442695, %v1346_v33 }
 0x62e   : > { %v1355_v29 = vmul.f32 1.442695, %v1347_v34 }
 0x62f   : > { %2880 = vpow2.f32 %v1353_v35 }
 0x630   : > { %2882 = vpow2.f32 %v1355_v29 }
 0x635   : > { %v3933_v39 = vpop.eup %2876 }
 0x636   : > { %v3935_v28 = vpop.eup %2878  ;;  %v1390_v46 = vmul.f32 %v3933_v39, %v1385_v32 }
 0x637   : > { %1502 = vmatprep.mubr.f32.mxu0 %v3935_v28  ;;  %v1359_v22 = vadd.f32 %v3935_v28, %v3933_v39  ;;  %v1391_v47 = vmul.f32 %v3935_v28, %v1389_v42 }
 0x638   : > { %1503 = vmatmul.mubr.f32.vlgmr.msra.gmra.mrb[2].mxu0 %v3933_v39 }
 0x639   : > { %1360 = vadd.xlane.f32.xlu1 %v1359_v22  ;;  %v3943_v43 = vpop.eup %2880  ;;  %v1394_v48 = vadd.f32 %v1391_v47, %v1390_v46 }
 0x63a   : > { %v3945_v49 = vpop.eup %2882  ;;  %v1392_v50 = vmul.f32 %v3943_v43, %v1385_v32 }
 0x63b   : > { %1507 = vmatprep.mubr.f32.mxu0 %v3945_v49  ;;  %v1362_v51 = vadd.f32 %v3945_v49, %v3943_v43  ;;  %v1393_v52 = vmul.f32 %v3945_v49, %v1389_v42 }
 0x63c   : > { %1508 = vmatmul.mubr.f32.gmra.mrb[4].mxu0 %v3943_v43 }
 0x63d   : > { %1395 = vadd.xlane.f32.xlu1 %v1394_v48  ;;  %1363 = vadd.xlane.f32.xlu0 %v1362_v51  ;;  %v1397_v53 = vadd.f32 %v1393_v52, %v1392_v50 }
 0x641   : > { %1398 = vadd.xlane.f32.xlu1 %v1397_v53 }
 0x6c6   : > { %v1361_v55 = vpop.xlane.xlu1 %1360 }
 0x6c7   : > { %v1365_v56 = vadd.f32 %v1361_v55, %v1357_v54 }
 0x6c9   : > { %1368 = vst.msk [vmem:[#allocation5] sm:$0xff] %vm1010_vm13, %v1365_v56 }
 0x6ca   : > { %v1396_v59 = vpop.xlane.xlu1 %1395  ;;  %v1364_v61 = vpop.xlane.xlu0 %1363 }
 0x6cb   : > { %v1400_v60 = vadd.f32 %v1396_v59, %v1370_v57  ;;  %v1366_v63 = vadd.f32 %v1364_v61, %v1358_v58 }
 0x6cd   : > { %1402 = vst.msk [vmem:[#allocation7] sm:$0xff] %vm1010_vm13, %v1400_v60  ;;  %1369 = vst.msk [vmem:[#allocation5 + $0x8] sm:$0xff] %vm1010_vm13, %v1366_v63 }
 0x6ce   : > { %v1399_v0 = vpop.xlane.xlu1 %1398 }
 0x6cf   : > { %v1401_v36 = vadd.f32 %v1399_v0, %v1371_v62 }
 0x6d0   : > { %v1528_v1 = vld [vmem:[#allocation5] sm:$0xff] }
 0x6d1   : > { %1403 = vst.msk [vmem:[#allocation7 + $0x8] sm:$0xff] %vm1010_vm13, %v1401_v36  ;;  %v1530_v38 = vmax.f32 %v1528_v1, 1e-15 }
 0x6d3   : > { %2884 = vrcp.f32 %v1530_v38 }
 0x6d4   : > { %v1529_v2 = vld [vmem:[#allocation5 + $0x8] sm:$0xff]  ;;  %v1558_v5 = vld [vmem:[#allocation7] sm:$0xff] }
 0x6d5   : > { %v1531_v3 = vmax.f32 %v1529_v2, 1e-15 }
 0x6d7   : > { %2886 = vrcp.f32 %v1531_v3 }
 0x6d8   : > { %v1559_v11 = vld [vmem:[#allocation7 + $0x8] sm:$0xff] }
 0x6dd   : > { %v3957_v4 = vpop.eup %2884 }
 0x6de   : > { %v1560_v6 = vmul.f32 %v3957_v4, %v1558_v5 }
 0x6e0   : > { %vm1562_vm7 = vcmp.ge.f32.partialorder %v1560_v6, 0.0  ;;  %v1566_v7 = vand.u32 2147483647, %v1560_v6 }
 0x6e1   : > { %v3960_v9 = vpop.eup %2886  ;;  %v1564_v10 = vsel %vm1562_vm7, 1.0, %v3326_v44 }
 0x6e2   : > { %v1568_v8 = vmax.f32 %v1566_v7, 1e-10  ;;  %v1561_v45 = vmul.f32 %v3960_v9, %v1559_v11 }
 0x6e4   : > { %v1570_v12 = vmul.f32 %v1568_v8, %v1564_v10  ;;  %vm1563_vm8 = vcmp.ge.f32.partialorder %v1561_v45, 0.0  ;;  %v1567_v13 = vand.u32 2147483647, %v1561_v45 }
 0x6e5   : > { %v1565_v14 = vsel %vm1563_vm8, 1.0, %v3326_v44 }
 0x6e6   : > { %2888 = vrcp.f32 %v1570_v12  ;;  %v1569_v41 = vmax.f32 %v1567_v13, 1e-10 }
 0x6e8   : > { %v1571_v15 = vmul.f32 %v1569_v41, %v1565_v14 }
 0x6ea   : > { %2890 = vrcp.f32 %v1571_v15 }
 0x6f0   : > { %v2889_v16 = vpop.eup %2888 }
 0x6f1   : > { %v1573_v17 = vmul.f32 %v2889_v16, %v3957_v4 }
 0x6f3   : > { %1580 = vperm.xlu1 %2787, %v1573_v17   ;;  %v1692_v17 = vld [vmem:[#allocation20] sm:$0xff] }
 0x6f4   : > { %v2891_v18 = vpop.eup %2890 }
 0x6f5   : > { %v1575_v19 = vmul.f32 %v2891_v18, %v3960_v9  ;;  %v1693_v18 = vld [vmem:[#allocation20 + $0x8] sm:$0xff] }
 0x6f7   : > { %1585 = vperm.xlu0 %2786, %v1575_v19   ;;  %v1694_v19 = vld [vmem:[#allocation20 + $0x10] sm:$0xff] }
 0x70b   : > { %v2442_v20 = vpop.f32.mrb[2].mxu0 }
 0x70c   : > { %v2443_v21 = vpop.f32.mrb[3].mxu0 }
 0x70d   : > { %v2444_v24 = vadd.f32 %v2443_v21, %v2442_v20  ;;  %v2632_v20 = vpack.c.bf16 %v1693_v18, %v1692_v17  ;;  %v1695_v21 = vld [vmem:[#allocation20 + $0x18] sm:$0xff] }
 0x70f   : > { %v2445_v25 = vpop.f32.mrb[4].mxu0  ;;  %2633 = vmatprep.subr.bf16.mxu0 %v2632_v20 }
 0x710   : > { %v2446_v26 = vpop.f32.mrb[5].mxu0  ;;  %2635 = vmatpush3.bf16.msra.mxu0 %v2632_v20 }
 0x711   : > { %v2447_v27 = vadd.f32 %v2446_v26, %v2445_v25  ;;  %v1696_v25 = vld [vmem:[#allocation20 + $0x20] sm:$0xff]  ;;  %v1697_v26 = vld [vmem:[#allocation20 + $0x28] sm:$0xff] }
 0x772   : > { %v1581_v30 = vpop.permute.xlu1 %1580 }
 0x773   : > { %v1588_v31 = vmul.f32 %v2444_v24, %v1581_v30  ;;  %v2636_v24 = vpack.c.bf16 %v1695_v21, %v1694_v19  ;;  %v1698_v30 = vld [vmem:[#allocation20 + $0x30] sm:$0xff] }
 0x775   : > { %v1590_v33 = vmul.f32 %v1588_v31, %v1588_v31  ;;  %2637 = vmatprep.subr.bf16.mxu0 %v2636_v24 }
 0x776   : > { %v1586_v34 = vpop.permute.xlu0 %1585  ;;  %2639 = vmatpush3.bf16.msra.mxu0 %v2636_v24 }
 0x777   : > { %1592 = vadd.xlane.f32.xlu1 %v1590_v33  ;;  %v1589_v35 = vmul.f32 %v2447_v27, %v1586_v34  ;;  %v2640_v27 = vpack.c.bf16 %v1697_v26, %v1696_v25  ;;  %v1700_v34 = vld [vmem:[#allocation20 + $0x40] sm:$0xff] }
 0x779   : > { %v1591_v37 = vmul.f32 %v1589_v35, %v1589_v35  ;;  %2641 = vmatprep.subr.bf16.mxu0 %v2640_v27 }
 0x77a   : > { %2643 = vmatpush3.bf16.msra.mxu0 %v2640_v27 }
 0x77b   : > { %1594 = vadd.xlane.f32.xlu0 %v1591_v37 }
 0x804   : > { %v1593_v40 = vpop.xlane.xlu1 %1592 }
 0x805   : > { %v1596_v29 = vmax.f32 %v1593_v40, 1e-15  ;;  %v1702_v40 = vld [vmem:[#allocation20 + $0x50] sm:$0xff] }
 0x807   : > { %2892 = vrsqrt.f32 %v1596_v29  ;;  %vm1600_vm9 = vcmp.eq.f32.partialorder %v1596_v29, inf  ;;  %v1603_v47 = vand.u32 2147483648, %v1596_v29  ;;  %vm1602_vm10 = vcmp.eq.f32.partialorder %v1596_v29, 0.0 }
 0x808   : > { %v1595_v32 = vpop.xlane.xlu0 %1594 }
 0x809   : > { %v1597_v42 = vmax.f32 %v1595_v32, 1e-15 }
 0x80b   : > { %2894 = vrsqrt.f32 %v1597_v42  ;;  %vm1607_vm11 = vcmp.eq.f32.partialorder %v1597_v42, inf  ;;  %v1610_v55 = vand.u32 2147483648, %v1597_v42  ;;  %vm1609_vm12 = vcmp.eq.f32.partialorder %v1597_v42, 0.0 }
 0x811   : > { %v2893_v22 = vpop.eup %2892 }
 0x812   : > { %v1599_v46 = vmul.f32 %v2893_v22, %v1596_v29  ;;  %v1705_v22 = vld [vmem:[#allocation20 + $0x68] sm:$0xff] }
 0x814   : > { %v1601_v48 = vsel %vm1600_vm9, %v1596_v29, %v1599_v46  ;;  %v1703_v29 = vld [vmem:[#allocation20 + $0x58] sm:$0xff] }
 0x815   : > { %v1604_v50 = vsel %vm1602_vm10, %v1603_v47, %v1601_v48  ;;  %v2895_v52 = vpop.eup %2894  ;;  %v2652_v32 = vpack.c.bf16 %v1703_v29, %v1702_v40  ;;  %v1706_v47 = vld [vmem:[#allocation20 + $0x70] sm:$0xff]  ;;  %v1707_v48 = vld [vmem:[#allocation20 + $0x78] sm:$0xff] }
 0x816   : > { %v2333_v51 = vclamps-f32 %v1604_v50, 0.9999999  ;;  %v1606_v53 = vmul.f32 %v2895_v52, %v1597_v42 }
 0x818   : > { %v1618_v54 = vsub.f32 1.0, %v2333_v51  ;;  %v1608_v56 = vsel %vm1607_vm11, %v1597_v42, %v1606_v53  ;;  %v1616_v60 = vadd.f32 1.0, %v2333_v51  ;;  %v1704_v42 = vld [vmem:[#allocation20 + $0x60] sm:$0xff] }
 0x819   : > { %v1611_v57 = vsel %vm1609_vm12, %v1610_v55, %v1608_v56  ;;  %v2656_v46 = vpack.c.bf16 %v1705_v22, %v1704_v42 }
 0x81a   : > { %2896 = vrcp.f32 %v1618_v54  ;;  %v2334_v58 = vclamps-f32 %v1611_v57, 0.9999999 }
 0x81c   : > { %v1619_v59 = vsub.f32 1.0, %v2334_v58  ;;  %v1617_v63 = vadd.f32 1.0, %v2334_v58 }
 0x81e   : > { %2898 = vrcp.f32 %v1619_v59 }
 0x824   : > { %v2897_v61 = vpop.eup %2896 }
 0x825   : > { %v1621_v62 = vmul.f32 %v2897_v61, %v1616_v60 }
 0x827   : > { %2900 = vlog2.f32 %v1621_v62 }
 0x828   : > { %v2899_v0 = vpop.eup %2898 }
 0x829   : > { %v1623_v36 = vmul.f32 %v2899_v0, %v1617_v63 }
 0x82b   : > { %2902 = vlog2.f32 %v1623_v36 }
 0x831   : > { %v2901_v1 = vpop.eup %2900 }
 0x832   : > { %v1625_v38 = vmul.f32 0.6931472, %v2901_v1 }
 0x834   : > { %v1628_v2 = vmul.f32 0.5, %v1625_v38 }
 0x835   : > { %v2903_v5 = vpop.eup %2902 }
 0x836   : > { %v1630_v3 = vmul.f32 0.5, %v1628_v2  ;;  %v1627_v6 = vmul.f32 0.6931472, %v2903_v5 }
 0x838   : > { %2904 = vtanh.f32 %v1630_v3  ;;  %v1629_v7 = vmul.f32 0.5, %v1627_v6 }
 0x839   : > { %2906 = vrcp.f32 %v1604_v50  ;;  %v2660_v50 = vpack.c.bf16 %v1707_v48, %v1706_v47 }
 0x83a   : > { %v1631_v8 = vmul.f32 0.5, %v1629_v7 }
 0x83c   : > { %2908 = vtanh.f32 %v1631_v8 }
 0x83d   : > { %2910 = vrcp.f32 %v1611_v57 }
 0x842   : > { %v2905_v44 = vpop.eup %2904 }
 0x843   : > { %v1634_v10 = vmul.f32 %v2905_v44, %v1588_v31  ;;  %v2907_v11 = vpop.eup %2906  ;;  %v1699_v31 = vld [vmem:[#allocation20 + $0x38] sm:$0xff] }
 0x844   : > { %v2644_v33 = vpack.c.bf16 %v1699_v31, %v1698_v30 }
 0x845   : > { %v3965_v12 = vmul.f32 %v2907_v11, %v1634_v10 }
 0x846   : > { %v2909_v13 = vpop.eup %2908  ;;  %2645 = vmatprep.subr.bf16.mxu0 %v2644_v33 }
 0x847   : > { %v1641_v45 = vmul.f32 %v3965_v12, %v3965_v12  ;;  %v1635_v41 = vmul.f32 %v2909_v13, %v1589_v35  ;;  %v2911_v14 = vpop.eup %2910  ;;  %v1701_v35 = vld [vmem:[#allocation20 + $0x48] sm:$0xff]  ;;  %2647 = vmatpush3.bf16.msra.mxu0 %v2644_v33 }
 0x848   : > { %v2648_v37 = vpack.c.bf16 %v1701_v35, %v1700_v34 }
 0x849   : > { %1643 = vadd.xlane.f32.xlu1 %v1641_v45  ;;  %v3969_v15 = vmul.f32 %v2911_v14, %v1635_v41  ;;  %v1681_v45 = vstv %s1640_s20 }
 0x84a   : > { %2649 = vmatprep.subr.bf16.mxu0 %v2648_v37 }
 0x84b   : > { %v1642_v16 = vmul.f32 %v3969_v15, %v3969_v15  ;;  %2651 = vmatpush3.bf16.msra.mxu0 %v2648_v37 }
 0x84c   : > { %2653 = vmatprep.subr.bf16.mxu0 %v2652_v32 }
 0x84d   : > { %1645 = vadd.xlane.f32.xlu0 %v1642_v16 }
 0x84f   : > { %2655 = vmatpush3.bf16.msra.mxu0 %v2652_v32 }
 0x850   : > { %2657 = vmatprep.subr.bf16.mxu0 %v2656_v46 }
 0x853   : > { %2659 = vmatpush3.bf16.msra.mxu0 %v2656_v46 }
 0x854   : > { %2661 = vmatprep.subr.bf16.mxu0 %v2660_v50 }
 0x857   : > { %2663 = vmatpush3.bf16.msra.mxu0 %v2660_v50 }
 0x8d6   : > { %v1644_v51 = vpop.xlane.xlu1 %1643 }
 0x8d7   : > { %v1647_v52 = vmax.f32 %v1644_v51, 1e-15 }
 0x8d9   : > { %2912 = vrsqrt.f32 %v1647_v52  ;;  %vm1651_vm13 = vcmp.eq.f32.partialorder %v1647_v52, inf  ;;  %v1654_v57 = vand.u32 2147483648, %v1647_v52  ;;  %vm1653_vm14 = vcmp.eq.f32.partialorder %v1647_v52, 0.0 }
 0x8da   : > { %v1646_v53 = vpop.xlane.xlu0 %1645 }
 0x8db   : > { %v1648_v54 = vmax.f32 %v1646_v53, 1e-15 }
 0x8dd   : > { %2914 = vrsqrt.f32 %v1648_v54  ;;  %vm1658_vm15 = vcmp.eq.f32.partialorder %v1648_v54, inf  ;;  %v1661_v0 = vand.u32 2147483648, %v1648_v54  ;;  %vm1660_vm1 = vcmp.eq.f32.partialorder %v1648_v54, 0.0 }
 0x8e3   : > { %v2913_v55 = vpop.eup %2912 }
 0x8e4   : > { %v1650_v56 = vmul.f32 %v2913_v55, %v1647_v52 }
 0x8e6   : > { %v1652_v58 = vsel %vm1651_vm13, %v1647_v52, %v1650_v56 }
 0x8e7   : > { %v1655_v59 = vsel %vm1653_vm14, %v1654_v57, %v1652_v58  ;;  %v2915_v61 = vpop.eup %2914 }
 0x8e8   : > { %v2335_v60 = vclamps-f32 %v1655_v59, 0.9999999  ;;  %v1657_v62 = vmul.f32 %v2915_v61, %v1648_v54 }
 0x8ea   : > { %v1669_v63 = vsub.f32 1.0, %v2335_v60  ;;  %v1659_v36 = vsel %vm1658_vm15, %v1648_v54, %v1657_v62  ;;  %v1667_v3 = vadd.f32 1.0, %v2335_v60 }
 0x8eb   : > { %v1662_v1 = vsel %vm1660_vm1, %v1661_v0, %v1659_v36 }
 0x8ec   : > { %2916 = vrcp.f32 %v1669_v63  ;;  %v2336_v38 = vclamps-f32 %v1662_v1, 0.9999999 }
 0x8ee   : > { %v1670_v2 = vsub.f32 1.0, %v2336_v38  ;;  %v1668_v7 = vadd.f32 1.0, %v2336_v38 }
 0x8f0   : > { %2918 = vrcp.f32 %v1670_v2 }
 0x8f6   : > { %v2917_v5 = vpop.eup %2916 }
 0x8f7   : > { %v1672_v6 = vmul.f32 %v2917_v5, %v1667_v3 }
 0x8f9   : > { %2920 = vlog2.f32 %v1672_v6 }
 0x8fa   : > { %v2919_v8 = vpop.eup %2918 }
 0x8fb   : > { %v1674_v44 = vmul.f32 %v2919_v8, %v1668_v7 }
 0x8fd   : > { %2922 = vlog2.f32 %v1674_v44 }
 0x903   : > { %v2921_v10 = vpop.eup %2920 }
 0x904   : > { %v1676_v11 = vmul.f32 0.6931472, %v2921_v10 }
 0x906   : > { %v1679_v13 = vmul.f32 0.5, %v1676_v11 }
 0x907   : > { %v2923_v14 = vpop.eup %2922 }
 0x908   : > { %v1682_v41 = vmul.f32 %v1681_v45, %v1679_v13  ;;  %v1678_v16 = vmul.f32 0.6931472, %v2923_v14 }
 0x90a   : > { %2924 = vtanh.f32 %v1682_v41  ;;  %v1680_v17 = vmul.f32 0.5, %v1678_v16 }
 0x90b   : > { %2926 = vrcp.f32 %v1655_v59 }
 0x90c   : > { %v1683_v18 = vmul.f32 %v1681_v45, %v1680_v17 }
 0x90e   : > { %2928 = vtanh.f32 %v1683_v18 }
 0x90f   : > { %2930 = vrcp.f32 %v1662_v1 }
 0x914   : > { %v2925_v19 = vpop.eup %2924 }
 0x915   : > { %v1686_v20 = vmul.f32 %v2925_v19, %v3965_v12  ;;  %v2927_v21 = vpop.eup %2926 }
 0x917   : > { %v1689_v24 = vmul.f32 %v2927_v21, %v1686_v20 }
 0x918   : > { %v2929_v26 = vpop.eup %2928 }
 0x919   : > { %2533 = vmatprep.mubr.f32.mxu0 %v1689_v24  ;;  %v1784_v25 = vmul.f32 %v1689_v24, %v1689_v24  ;;  %v1687_v27 = vmul.f32 %v2929_v26, %v3969_v15  ;;  %v2931_v30 = vpop.eup %2930  ;;  %v3987_v15 = vld [vmem:[%s4216_s16] sm:$0x1] }
 0x91a   : > { %v1878_v40 = vmul.f32 %v3987_v15, %v3987_v15 }
 0x91b   : > { %1786 = vadd.xlane.f32.xlu1 %v1784_v25  ;;  %v1691_v31 = vmul.f32 %v2931_v30, %v1687_v27 }
 0x91c   : > { %v1880_v29 = vsel %vm880_vm0, %v1878_v40, 0.0  ;;  %v1864_v40 = vrot.slane %v3987_v15, %v3795_v23 }
 0x91d   : > { %2534 = vmatmul.mubr.f32.vlgmr.msra.gmra.mrb[6].mxu0 %v1691_v31  ;;  %v1785_v33 = vmul.f32 %v1691_v31, %v1691_v31 }
 0x91f   : > { %1788 = vadd.xlane.f32.xlu0 %v1785_v33 }
 0x9a8   : > { %v1787_v42 = vpop.xlane.xlu1 %1786 }
 0x9a9   : > { %v1790_v46 = vmax.f32 %v1787_v42, 1e-15 }
 0x9ab   : > { %vm1794_vm3 = vcmp.eq.f32.partialorder %v1790_v46, inf  ;;  %v1797_v55 = vand.u32 2147483648, %v1790_v46  ;;  %vm1796_vm5 = vcmp.eq.f32.partialorder %v1790_v46, 0.0 }
 0x9ac   : > { %v1789_v32 = vpop.xlane.xlu0 %1788 }
 0x9ad   : > { %v1791_v22 = vmax.f32 %v1789_v32, 1e-15 }
 0x9af   : > { %2932 = vrsqrt.f32 %v1791_v22  ;;  %vm1801_vm2 = vcmp.eq.f32.partialorder %v1791_v22, inf  ;;  %v1804_v54 = vand.u32 2147483648, %v1791_v22  ;;  %vm1803_vm4 = vcmp.eq.f32.partialorder %v1791_v22, 0.0 }
 0x9b0   : > { %2934 = vrsqrt.f32 %v1790_v46 }
 0x9b9   : > { %v2933_v47 = vpop.eup %2932 }
 0x9ba   : > { %v2935_v48 = vpop.eup %2934  ;;  %v1800_v50 = vmul.f32 %v2933_v47, %v1791_v22 }
 0x9bb   : > { %v1793_v51 = vmul.f32 %v2935_v48, %v1790_v46 }
 0x9bc   : > { %v1802_v52 = vsel %vm1801_vm2, %v1791_v22, %v1800_v50 }
 0x9bd   : > { %v1795_v53 = vsel %vm1794_vm3, %v1790_v46, %v1793_v51  ;;  %v1805_v56 = vsel %vm1803_vm4, %v1804_v54, %v1802_v52  ;;  %v3997_v51 = vld [vmem:[%s3745_s18] sm:$0xff] }
 0x9be   : > { %v1798_v57 = vsel %vm1796_vm5, %v1797_v55, %v1795_v53  ;;  %v2338_v58 = vclamps-f32 %v1805_v56, 0.9999999  ;;  %v4000_v53 = vld [vmem:[%s3745_s18 + $0x8] sm:$0xff]  ;;  %s2326_s18 = sshll.u32 %s3738_s10, 5 }
 0x9bf   : > { %v2337_v59 = vclamps-f32 %v1798_v57, 0.9999999  ;;  %s668_s12 = scalar_lea.vmem [#allocation23], %s2326_s18 }
 0x9c0   : > { %v1839_v60 = vsub.f32 1.0, %v2338_v58  ;;  %v1837_v0 = vadd.f32 1.0, %v2338_v58  ;;  %s2047_s29 = sshll.u32 %s668_s12, 4  ;;  %s4033_s29 = int_to_ptr.vmem [resolvable:$true] %s2047_s29 }
 0x9c1   : > { %v1838_v61 = vsub.f32 1.0, %v2337_v59  ;;  %v1836_v36 = vadd.f32 1.0, %v2337_v59  ;;  %s3179_s8 = scalar_lea.vmem %s4033_s29, 512  ;;  %p3186_p8 = scmp.lt.s32.totalorder %s4033_s29, %s3184_s30 }
 0x9c2   : > { %2936 = vrcp.f32 %v1839_v60  ;;  %p3180_p13 = scmp.ne.s32.totalorder %s4033_s29, %s3179_s8  ;;  %p3187_p9 = scmp.lt.s32.totalorder %s3185_s15, %s3179_s8 }
 0x9c3   : > { %2938 = vrcp.f32 %v1838_v61 }
 0x9c4   : > { %p3181_p6 = pnand %p3180_p13, %p4219_p0  ;;  %p3188_p11 = por %p3187_p9, %p3186_p8 }
 0x9c6   : > { %p3182_p3 = pneg %p3181_p6 }
 0x9c8   : > { %p3189_p7 = pnand %p3188_p11, %p3182_p3 }
 0x9cc   : > { %v2937_v62 = vpop.eup %2936 }
 0x9cd   : > { %v2939_v63 = vpop.eup %2938  ;;  %v1843_v1 = vmul.f32 %v2937_v62, %v1837_v0 }
 0x9ce   : > { %v1841_v38 = vmul.f32 %v2939_v63, %v1836_v36 }
 0x9cf   : > { %2940 = vlog2.f32 %v1843_v1 }
 0x9d0   : > { %2942 = vlog2.f32 %v1841_v38 }
 0x9d9   : > { %v2941_v7 = vpop.eup %2940 }
 0x9da   : > { %v2943_v8 = vpop.eup %2942  ;;  %v1847_v45 = vmul.f32 0.6931472, %v2941_v7 }
 0x9db   : > { %v1845_v14 = vmul.f32 0.6931472, %v2943_v8 }
 0x9dc   : > { %v1849_v25 = vmul.f32 0.5, %v1847_v45 }
 0x9dd   : > { %v1848_v30 = vmul.f32 0.5, %v1845_v14 }
 0x9f0   : > { %v3976_v34 = vpop.f32.mrb[6].mxu0 }
 0x9f1   : > { %v3978_v35 = vpop.f32.mrb[7].mxu0  ;;  %v1807_v12 = vmul.f32 %v3976_v34, %v3976_v34 }
 0x9f2   : > { %v1806_v37 = vmul.f32 %v3978_v35, %v3978_v35 }
 0x9f3   : > { %1810 = vadd.xlane.f32.xlu0 %v1807_v12 }
 0x9f4   : > { %1808 = vadd.xlane.f32.xlu1 %v1806_v37 }
 0x9f8   : > { %1881 = vadd.xlane.f32.xlu1 %v1880_v29 }
 0xa80   : > { %v1811_v2 = vpop.xlane.xlu0 %1810 }
 0xa81   : > { %v1813_v3 = vmax.f32 %v1811_v2, 1e-15  ;;  %v1809_v5 = vpop.xlane.xlu1 %1808 }
 0xa82   : > { %v1812_v6 = vmax.f32 %v1809_v5, 1e-15 }
 0xa83   : > { %2944 = vrsqrt.f32 %v1813_v3  ;;  %vm1823_vm0 = vcmp.eq.f32.partialorder %v1813_v3, inf  ;;  %v1826_v13 = vand.u32 2147483648, %v1813_v3  ;;  %vm1825_vm6 = vcmp.eq.f32.partialorder %v1813_v3, 0.0 }
 0xa84   : > { %2946 = vrsqrt.f32 %v1812_v6  ;;  %vm1816_vm7 = vcmp.eq.f32.partialorder %v1812_v6, inf  ;;  %v1819_v17 = vand.u32 2147483648, %v1812_v6  ;;  %vm1818_vm8 = vcmp.eq.f32.partialorder %v1812_v6, 0.0 }
 0xa85   : > { %2948 = vrcp.f32 %v1805_v56  ;;  %v1882_v15 = vpop.xlane.xlu1 %1881 }
 0xa86   : > { %2950 = vrcp.f32 %v1798_v57  ;;  %v1890_v59 = vrot.slane %v1882_v15, %v3795_v23 }
 0xa8d   : > { %v2945_v44 = vpop.eup %2944 }
 0xa8e   : > { %v2947_v10 = vpop.eup %2946  ;;  %v1822_v11 = vmul.f32 %v2945_v44, %v1813_v3 }
 0xa8f   : > { %v1815_v41 = vmul.f32 %v2947_v10, %v1812_v6  ;;  %v2949_v18 = vpop.eup %2948 }
 0xa90   : > { %v1824_v16 = vsel %vm1823_vm0, %v1813_v3, %v1822_v11  ;;  %v2951_v21 = vpop.eup %2950 }
 0xa91   : > { %v1817_v19 = vsel %vm1816_vm7, %v1812_v6, %v1815_v41  ;;  %v1827_v20 = vsel %vm1825_vm6, %v1826_v13, %v1824_v16 }
 0xa92   : > { %v1831_v24 = vmul.f32 %v2949_v18, %v1827_v20  ;;  %v1820_v26 = vsel %vm1818_vm8, %v1819_v17, %v1817_v19 }
 0xa93   : > { %v1829_v27 = vmul.f32 %v2951_v21, %v1820_v26 }
 0xa94   : > { %v1851_v31 = vmul.f32 %v1849_v25, %v1831_v24 }
 0xa95   : > { %v1850_v33 = vmul.f32 %v1848_v30, %v1829_v27 }
 0xa96   : > { %2952 = vtanh.f32 %v1851_v31 }
 0xa97   : > { %2954 = vtanh.f32 %v1850_v33 }
 0xa98   : > { %2956 = vrcp.f32 %v1827_v20 }
 0xa99   : > { %2958 = vrcp.f32 %v1820_v26 }
 0xaa0   : > { %v2953_v12 = vpop.eup %2952 }
 0xaa1   : > { %v2955_v37 = vpop.eup %2954  ;;  %v1855_v29 = vmul.f32 %v2953_v12, %v3976_v34  ;;  %v1919_v34 = vmul.f32 %v3997_v51, %v3997_v51 }
 0xaa2   : > { %v2957_v32 = vpop.eup %2956  ;;  %v1854_v42 = vmul.f32 %v2955_v37, %v3978_v35  ;;  %v1920_v35 = vmul.f32 %v4000_v53, %v4000_v53 }
 0xaa3   : > { %v2959_v22 = vpop.eup %2958  ;;  %v1859_v46 = vmul.f32 %v2957_v32, %v1855_v29 }
 0xaa4   : > { %v1857_v47 = vmul.f32 %v2959_v22, %v1854_v42 }
 0xaa5   : > { %v1867_v48 = vmul.f32 %v1864_v40, %v1859_v46  ;;  %v1873_v54 = vmul.f32 %v1859_v46, %v1859_v46 }
 0xaa6   : > { %v1866_v50 = vmul.f32 %v1864_v40, %v1857_v47  ;;  %v1872_v52 = vmul.f32 %v1857_v47, %v1857_v47 }
 0xaa7   : > { %1870 = vadd.xlane.f32.xlu0 %v1867_v48 }
 0xaa8   : > { %1868 = vadd.xlane.f32.xlu1 %v1866_v50 }
 0xaab   : > { %1874 = vadd.xlane.f32.xlu0 %v1872_v52 }
 0xaac   : > { %1876 = vadd.xlane.f32.xlu1 %v1873_v54 }
 0xaaf   : > { %1921 = vadd.xlane.f32.xlu0 %v1919_v34 }
 0xab0   : > { %1923 = vadd.xlane.f32.xlu1 %v1920_v35 }
 0xb34   : > { %v1871_v55 = vpop.xlane.xlu0 %1870 }
 0xb35   : > { %v1869_v56 = vpop.xlane.xlu1 %1868  ;;  %v1884_v57 = vmul.f32 2.0, %v1871_v55 }
 0xb36   : > { %v1883_v58 = vmul.f32 2.0, %v1869_v56 }
 0xb37   : > { %v1886_v0 = vadd.f32 1.0, %v1884_v57 }
 0xb38   : > { %v1885_v60 = vadd.f32 1.0, %v1883_v58  ;;  %v1875_v61 = vpop.xlane.xlu0 %1874 }
 0xb39   : > { %v1901_v62 = vmul.f32 %v1890_v59, %v1875_v61  ;;  %v1877_v63 = vpop.xlane.xlu1 %1876  ;;  %v1895_v6 = vsub.f32 1.0, %v1875_v61  ;;  %v1892_v7 = vadd.f32 %v1890_v59, %v1886_v0 }
 0xb3a   : > { %v1902_v36 = vmul.f32 %v1890_v59, %v1877_v63  ;;  %v1891_v5 = vadd.f32 %v1890_v59, %v1885_v60  ;;  %v1896_v8 = vsub.f32 1.0, %v1877_v63 }
 0xb3b   : > { %v1903_v1 = vadd.f32 %v1901_v62, %v1885_v60  ;;  %v1897_v10 = vmul.f32 %v1895_v6, %v1864_v40  ;;  %v1894_v11 = vmul.f32 %v1892_v7, %v1859_v46 }
 0xb3c   : > { %v1904_v38 = vadd.f32 %v1902_v36, %v1886_v0  ;;  %v1893_v44 = vmul.f32 %v1891_v5, %v1857_v47  ;;  %v1898_v23 = vmul.f32 %v1896_v8, %v1864_v40  ;;  %v1922_v24 = vpop.xlane.xlu0 %1921 }
 0xb3d   : > { %v1905_v2 = vmax.f32 %v1903_v1, 1e-15  ;;  %v1924_v25 = vpop.xlane.xlu1 %1923  ;;  %v1939_v52 = vsub.f32 1.0, %v1922_v24 }
 0xb3e   : > { %v1906_v3 = vmax.f32 %v1904_v38, 1e-15  ;;  %v1899_v45 = vadd.f32 %v1897_v10, %v1893_v44  ;;  %v1900_v41 = vadd.f32 %v1898_v23, %v1894_v11  ;;  %v1940_v54 = vsub.f32 1.0, %v1924_v25 }
 0xb3f   : > { %2960 = vrcp.f32 %v1905_v2 }
 0xb40   : > { %2962 = vrcp.f32 %v1906_v3 }
 0xb49   : > { %v2961_v13 = vpop.eup %2960 }
 0xb4a   : > { %v2963_v14 = vpop.eup %2962  ;;  %v1908_v16 = vmul.f32 %v2961_v13, %v1899_v45 }
 0xb4b   : > { %v1910_v17 = vmul.f32 %v2963_v14, %v1900_v41 }
 0xb4c   : > { %v1913_v18 = vmul.f32 %v3997_v51, %v1908_v16  ;;  %v1925_v20 = vmul.f32 %v1908_v16, %v1908_v16  ;;  %v1941_v15 = vmul.f32 %v1939_v52, %v1908_v16 }
 0xb4d   : > { %v1914_v19 = vmul.f32 %v4000_v53, %v1910_v17  ;;  %v1926_v21 = vmul.f32 %v1910_v17, %v1910_v17  ;;  %v1942_v55 = vmul.f32 %v1940_v54, %v1910_v17 }
 0xb4e   : > { %1915 = vadd.xlane.f32.xlu0 %v1913_v18 }
 0xb4f   : > { %1917 = vadd.xlane.f32.xlu1 %v1914_v19 }
 0xb52   : > { %1927 = vadd.xlane.f32.xlu0 %v1925_v20 }
 0xb53   : > { %1929 = vadd.xlane.f32.xlu1 %v1926_v21 }
 0xbdb   : > { %v1916_v26 = vpop.xlane.xlu0 %1915 }
 0xbdc   : > { %v1931_v27 = vmul.f32 2.0, %v1916_v26  ;;  %v1918_v30 = vpop.xlane.xlu1 %1917 }
 0xbdd   : > { %v1932_v31 = vmul.f32 2.0, %v1918_v30 }
 0xbde   : > { %v1933_v12 = vadd.f32 1.0, %v1931_v27 }
 0xbdf   : > { %v1928_v33 = vpop.xlane.xlu0 %1927  ;;  %v1934_v29 = vadd.f32 1.0, %v1932_v31 }
 0xbe0   : > { %v1945_v37 = vmul.f32 %v1928_v33, %v1922_v24  ;;  %v1930_v40 = vpop.xlane.xlu1 %1929  ;;  %v1935_v48 = vadd.f32 %v1933_v12, %v1928_v33 }
 0xbe1   : > { %v1946_v32 = vmul.f32 %v1930_v40, %v1924_v25  ;;  %v1936_v50 = vadd.f32 %v1934_v29, %v1930_v40 }
 0xbe2   : > { %v1947_v42 = vadd.f32 %v1945_v37, %v1933_v12  ;;  %v1937_v34 = vmul.f32 %v1935_v48, %v3997_v51 }
 0xbe3   : > { %v1948_v22 = vadd.f32 %v1946_v32, %v1934_v29  ;;  %v1938_v35 = vmul.f32 %v1936_v50, %v4000_v53 }
 0xbe4   : > { %v1949_v46 = vmax.f32 %v1947_v42, 1e-15  ;;  %v1943_v56 = vadd.f32 %v1941_v15, %v1937_v34 }
 0xbe5   : > { %v1950_v47 = vmax.f32 %v1948_v22, 1e-15  ;;  %v1944_v58 = vadd.f32 %v1942_v55, %v1938_v35 }
 0xbe6   : > { %2964 = vrcp.f32 %v1949_v46 }
 0xbe7   : > { %2966 = vrcp.f32 %v1950_v47 }
 0xbf0   : > { %v2965_v57 = vpop.eup %2964 }
 0xbf1   : > { %v2967_v59 = vpop.eup %2966  ;;  %v4011_v60 = vmul.f32 %v2965_v57, %v1943_v56 }
 0xbf2   : > { %v4013_v61 = vmul.f32 %v2967_v59, %v1944_v58 }
 0xbf3   : > { %v1955_v62 = vmul.f32 %v4011_v60, %v4011_v60 }
 0xbf4   : > { %v1956_v51 = vmul.f32 %v4013_v61, %v4013_v61 }
 0xbf5   : > { %1957 = vadd.xlane.f32.xlu0 %v1955_v62 }
 0xbf6   : > { %1959 = vadd.xlane.f32.xlu1 %v1956_v51 }
 0xc07   : > { %1547 = vperm.xlu1 %2787, %v3960_v9  }
 0xc0b   : > { %1542 = vperm.xlu0 %2786, %v3957_v4  }
 0xc82   : > { %v1958_v53 = vpop.xlane.xlu0 %1957 }
 0xc83   : > { %v1961_v63 = vmax.f32 %v1958_v53, 1e-15  ;;  %v1960_v0 = vpop.xlane.xlu1 %1959 }
 0xc84   : > { %v4022_v36 = vmax.f32 %v1960_v0, 1e-15 }
 0xc85   : > { %2968 = vrsqrt.f32 %v1961_v63 }
 0xc86   : > { %2970 = vrsqrt.f32 %v4022_v36 }
 0xc87   : > { %v1548_v1 = vpop.permute.xlu1 %1547 }
 0xc88   : > { %v1552_v38 = vmul.f32 %v3943_v43, %v1548_v1  ;;  %v1553_v9 = vmul.f32 %v3945_v49, %v1548_v1 }
 0xc8a   : > { %1556 = vst [vmem:[%s668_s12 + $0x10] sm:$0xff] %v1552_v38  ;;  %1557 = vst [vmem:[%s668_s12 + $0x18] sm:$0xff] %v1553_v9  ;;  %v1543_v4 = vpop.permute.xlu0 %1542 }
 0xc8b   : > { %v1550_v2 = vmul.f32 %v3933_v39, %v1543_v4  ;;  %v1551_v3 = vmul.f32 %v3935_v28, %v1543_v4 }
 0xc8d   : > { %1554 = vst [vmem:[%s668_s12] sm:$0xff] %v1550_v2  ;;  %1555 = vst [vmem:[%s668_s12 + $0x8] sm:$0xff] %v1551_v3 }
 0xc8e   : > { %3192 = shalt.err (!%p3189_p7)
}
 0xc8f   : > { %s3193_s23 = scalar_lea.hbm %s4031_s19, 512  ;;  %s3197_s1 = scalar_lea.hbm %s4218_s13, 1024 }
 0xc90   : > { %p3194_p12 = scmp.ne.s32.totalorder %s4031_s19, %s3193_s23  ;;  %p3198_p1 = scmp.lt.u32.totalorder %s4031_s19, %s4218_s13 }
 0xc91   : > { %p3199_p4 = scmp.lt.u32.totalorder %s3197_s1, %s3193_s23  ;;  %p3201_p13 = scmp.lt.u32.totalorder %s3193_s23, %s4031_s19 }
 0xc92   : > { %p3195_p2 = pnand %p3194_p12, %p4219_p0 }
 0xc93   : > { %p3200_p10 = por %p3199_p4, %p3198_p1 }
 0xc94   : > { %p3196_p5 = pneg %p3195_p2 }
 0xc95   : > { %p3202_p6 = por %p3201_p13, %p3200_p10 }
 0xc97   : > { %p3203_p3 = pnand %p3202_p6, %p3196_p5 }
 0xc99   : > { %3206 = shalt.err (!%p3203_p3)
}
 0xc9a   : > { %s3328_s3 = smov 256   ;;  %s3329_s12 = smov 16   ;;  %v2969_v39 = vpop.eup %2968  ;;  %vm1965_vm9 = vcmp.eq.f32.partialorder %v1961_v63, inf  ;;  %v1968_v49 = vand.u32 2147483648, %v1961_v63  ;;  %vm1967_vm10 = vcmp.eq.f32.partialorder %v1961_v63, 0.0  ;;  %vm1972_vm11 = vcmp.eq.f32.partialorder %v4022_v36, inf }
 0xc9b   : > { %2685 = dma.vmem_to_hbm [thread:$0]  (%p4219_p0), %s4033_s29, 512, %s4031_s19, %s2013_s7, %s3328_s3, %s3328_s3, %s3329_s12   ;;  %v2971_v28 = vpop.eup %2970  ;;  %v1964_v43 = vmul.f32 %v2969_v39, %v1961_v63  ;;  %v1975_v7 = vand.u32 2147483648, %v4022_v36  ;;  %vm1974_vm12 = vcmp.eq.f32.partialorder %v4022_v36, 0.0 }
 0xc9c   : > { %v1971_v5 = vmul.f32 %v2971_v28, %v4022_v36  ;;  %s2354_s29 = sshll.u32 %s4214_s22, 8  ;;  %s661_s28 = scalar_lea.vmem [#allocation22], %s3741_s6 }
 0xc9d   : > { %v1966_v6 = vsel %vm1965_vm9, %v1961_v63, %v1964_v43  ;;  %s2028_s11 = sshll.u32 %s661_s28, 4  ;;  %s4220_s8 = sld [smem:[#allocation45_spill]]  ;;  %s4075_s11 = int_to_ptr.vmem [resolvable:$true] %s2028_s11 }
 0xc9e   : > { %v1969_v8 = vsel %vm1967_vm10, %v1968_v49, %v1966_v6  ;;  %v1973_v44 = vsel %vm1972_vm11, %v4022_v36, %v1971_v5  ;;  %s2008_s6 = scalar_lea.sflag [#allocation11], %s3738_s10  ;;  %s3207_s22 = scalar_lea.vmem %s4075_s11, 256 }
 0xc9f   : > { %v2339_v10 = vclamps-f32 %v1969_v8, 0.9999999  ;;  %v1976_v11 = vsel %vm1974_vm12, %v1975_v7, %v1973_v44  ;;  %p3208_p8 = scmp.ne.s32.totalorder %s4075_s11, %s3207_s22  ;;  %s3330_s30 = smov [#allocation22]  }
 0xca0   : > { %v2340_v23 = vclamps-f32 %v1976_v11, 0.9999999  ;;  %s3211_s15 = sshll.u32 %s3330_s30, 4  ;;  %s3212_s15 = int_to_ptr.vmem [resolvable:$false] %s3211_s15 }
 0xca1   : > { %v1983_v45 = vsub.f32 1.0, %v2339_v10  ;;  %v1981_v41 = vadd.f32 1.0, %v2339_v10  ;;  %p3209_p9 = pnand %p3208_p8, %p4219_p0  ;;  %s3213_s23 = scalar_lea.vmem %s3212_s15, 512 }
 0xca2   : > { %v1984_v13 = vsub.f32 1.0, %v2340_v23  ;;  %v1982_v16 = vadd.f32 1.0, %v2340_v23  ;;  %p3214_p7 = scmp.lt.s32.totalorder %s4075_s11, %s3212_s15  ;;  %p3215_p12 = scmp.lt.s32.totalorder %s3213_s23, %s3207_s22 }
 0xca3   : > { %2972 = vrcp.f32 %v1983_v45  ;;  %s4073_s26 = scalar_lea.hbm %s4220_s8, %s2354_s29  ;;  %p3210_p11 = pneg %p3209_p9 }
 0xca4   : > { %2974 = vrcp.f32 %v1984_v13  ;;  %p3216_p2 = por %p3215_p12, %p3214_p7 }
 0xca6   : > { %p3217_p5 = pnand %p3216_p2, %p3210_p11 }
 0xcad   : > { %v2973_v14 = vpop.eup %2972 }
 0xcae   : > { %v2975_v17 = vpop.eup %2974  ;;  %v1986_v18 = vmul.f32 %v2973_v14, %v1981_v41 }
 0xcaf   : > { %v1988_v19 = vmul.f32 %v2975_v17, %v1982_v16 }
 0xcb0   : > { %2976 = vlog2.f32 %v1986_v18 }
 0xcb1   : > { %2978 = vlog2.f32 %v1988_v19 }
 0xcba   : > { %v2977_v20 = vpop.eup %2976 }
 0xcbb   : > { %v2979_v21 = vpop.eup %2978  ;;  %v1990_v24 = vmul.f32 0.6931472, %v2977_v20 }
 0xcbc   : > { %v1992_v25 = vmul.f32 0.6931472, %v2979_v21 }
 0xcbd   : > { %v1993_v26 = vmul.f32 0.5, %v1990_v24 }
 0xcbe   : > { %v1994_v27 = vmul.f32 0.5, %v1992_v25 }
 0xcbf   : > { %v1995_v30 = vmul.f32 0.70710677, %v1993_v26 }
 0xcc0   : > { %v1996_v31 = vmul.f32 0.70710677, %v1994_v27 }
 0xcc1   : > { %2980 = vtanh.f32 %v1995_v30 }
 0xcc2   : > { %2982 = vtanh.f32 %v1996_v31 }
 0xcc3   : > { %2984 = vrcp.f32 %v1969_v8 }
 0xcc4   : > { %2986 = vrcp.f32 %v1976_v11 }
 0xccb   : > { %v2981_v33 = vpop.eup %2980 }
 0xccc   : > { %v2983_v12 = vpop.eup %2982  ;;  %v1999_v37 = vmul.f32 %v2981_v33, %v4011_v60 }
 0xccd   : > { %v2985_v40 = vpop.eup %2984  ;;  %v2000_v29 = vmul.f32 %v2983_v12, %v4013_v61 }
 0xcce   : > { %v2987_v32 = vpop.eup %2986  ;;  %v2002_v42 = vmul.f32 %v2985_v40, %v1999_v37 }
 0xccf   : > { %v2004_v22 = vmul.f32 %v2987_v32, %v2000_v29 }
 0xcd0   : > { %2005 = vst [vmem:[%s661_s28] sm:$0xff] %v2002_v42 }
 0xcd1   : > { %2006 = vst [vmem:[%s661_s28 + $0x8] sm:$0xff] %v2004_v22 }
 0xcd2   : > { %3220 = shalt.err (!%p3217_p5)
}
 0xcd3   : > { %s3221_s20 = scalar_lea.hbm %s4073_s26, 256  ;;  %s3225_s16 = scalar_lea.hbm %s4220_s8, 512 }
 0xcd4   : > { %p3222_p1 = scmp.ne.s32.totalorder %s4073_s26, %s3221_s20  ;;  %p3226_p13 = scmp.lt.u32.totalorder %s4073_s26, %s4220_s8 }
 0xcd5   : > { %p3227_p6 = scmp.lt.u32.totalorder %s3225_s16, %s3221_s20  ;;  %p3229_p8 = scmp.lt.u32.totalorder %s3221_s20, %s4073_s26 }
 0xcd6   : > { %p3223_p4 = pnand %p3222_p1, %p4219_p0 }
 0xcd7   : > { %p3228_p3 = por %p3227_p6, %p3226_p13 }
 0xcd8   : > { %p3224_p10 = pneg %p3223_p4 }
 0xcd9   : > { %p3230_p9 = por %p3229_p8, %p3228_p3 }
 0xcdb   : > { %p3231_p11 = pnand %p3230_p9, %p3224_p10 }
 0xcdd   : > { %3234 = shalt.err (!%p3231_p11)
}
 0xcde   : > { %s3331_s12 = smov 128   ;;  %s3332_s29 = smov 8  }
 0xcdf   : > { %2684 = dma.vmem_to_hbm [thread:$0]  (%p4219_p0), %s4075_s11, 256, %s4073_s26, %s2008_s6, %s3331_s12, %s3331_s12, %s3332_s29  }
 0xce0 PF: > { %s4221_s28 = sld [smem:[#allocation33_spill]]  ;;  %s4222_s19 = sld [smem:[#allocation37_spill]] }
 0xce1   : > { %p4224_p12 = scmp.ge.s32.totalorder %s3313_s27, 2 }
 0xce6   : > { %s2062_s7 = sand.u32 1, %s4221_s28   ;;  %p4223_p7 = scmp.ne.s32.totalorder %s4222_s19, 0 }
 0xce7   : > { %s2063_s22 = scalar_lea.sflag [#allocation11], %s2062_s7 }
 0xce8   : > { %p2712_p2 = pnand %p4224_p12, %p4223_p7 }
 0xcea   : > { %3284 = dma.done.wait (!%p2712_p2), %s2063_s22, 256  }
 0xceb   : > { %3286 = vsyncadd (!%p2712_p2), %s2063_s22, 4294967040  ;;  %s2072_s30 = scalar_lea.sflag [#allocation24], %s2062_s7 }
 0xcec   : > { %3288 = dma.done.wait (!%p2712_p2), %s2072_s30, 512  }
 0xced   : > { %3290 = vsyncadd (!%p2712_p2), %s2072_s30, 4294966784  ;;  %s41_s27 = sadd.s32 1, %s3313_s27   ;;  %s4225_s10 = sld [smem:[#allocation38_spill]] }
 0xcee   : > { %p38_p5 = scmp.ge.s32.totalorder %s41_s27, 4   ;;  %s4226_s23 = smov %s3297_s24 }
 0xcef   : > { %s4227_s24 = smov %s3301_s25  ;;  %s4228_s25 = smov %s3539_s14 }
 0xcf0   : > { %s4229_s26 = smov %s3309_s0  ;;  %40 = sbr.rel (!%p38_p5) target bundleno = 24 (0x18), region = 188 }
 0xcf3   : > { %s4230_s0 = smov %s4225_s10 }
 0xcf7   :  { %2077 = vsyncpa [#allocation10], 1 }
 0xcf8   :  { %2079 = vsyncpa [#allocation10 + $0x1], 1 }
 0xcf9   :  { %2080 = vsyncpa [#allocation15], 1 }
 0xcfa   :  { %2082 = vsyncpa [#allocation15 + $0x1], 1 }
 0xcfb   :  { %2083 = vsyncpa [#allocation18], 1 }
 0xcfc   :  { %2085 = vsyncpa [#allocation18 + $0x1], 1 }
 0xcfd   :  { %2086 = vsyncpa [#allocation21], 1 }
 0xcfe   :  { %2087 = vsyncpa [#allocation11], 1 }
 0xcff   :  { %2089 = vsyncpa [#allocation11 + $0x1], 1 }
 0xd00   :  { %2090 = vsyncpa [#allocation24], 1 }
 0xd01   :  { %2092 = vsyncpa [#allocation24 + $0x1], 1 }
 0xd02   :  { %2093 = vsyncpa [#allocation12], 1 }
 0xd03   :  { %2095 = vsyncpa [#allocation12 + $0x1], 1 }

</bundles_post_ra>
